<compile_context>
chip_gen: v6e
topology: v6e:2x2x1
jax: 0.10.0
libtpu: 0.0.40
codegen_flags: <defaults>
</compile_context>

<pallas_src>
import functools

import jax
import jax.numpy as jnp
from jax.experimental import pallas as pl
from jax.experimental.pallas import tpu as pltpu


def _round_up(x, m):
    return ((x + m - 1) // m) * m


def _attention_kernel(num_pixels, enc_ref, dec_ref,
                      weT_ref, be_ref,      # encoder_att: (E, A), (1, A)
                      wdT_ref, bd_ref,      # decoder_att: (D, A), (1, A)
                      wf_ref, bf_ref,       # full_att:    (1, A), (1, 1) SMEM
                      awe_ref, alpha_ref):
    enc = enc_ref[...]                                   # (TB, Pp, E) f32
    TB, Pp, E = enc.shape
    A = weT_ref.shape[1]
    gemm_dtype = weT_ref.dtype

    # att1 = encoder_att(encoder_out): one big (TB*Pp, E) @ (E, A) MXU GEMM.
    # Pp is a multiple of 8, so this reshape keeps the lane dim (E) unchanged
    # and sublane groups aligned (no relayout copy of the largest tensor).
    enc2d = enc.reshape(TB * Pp, E).astype(gemm_dtype)
    att1 = jnp.dot(enc2d, weT_ref[...],
                   preferred_element_type=jnp.float32)   # (TB*Pp, A) f32
    att1 = att1.reshape(TB, Pp, A) + be_ref[...]

    # att2 = decoder_att(decoder_hidden): (TB, D) @ (D, A).
    att2 = jnp.dot(dec_ref[...].astype(gemm_dtype), wdT_ref[...],
                   preferred_element_type=jnp.float32) + bd_ref[...]   # (TB, A)

    # relu(att1 + att2[:, None, :])
    h = jnp.maximum(att1 + att2[:, None, :], 0.0)        # (TB, Pp, A)

    # full_att (out_features == 1): VPU multiply + lane reduce instead of an
    # MXU column-slice.
    att = jnp.sum(h * wf_ref[...], axis=-1) + bf_ref[0, 0]   # (TB, Pp)

    # Mask padded pixel columns so they take no softmax mass (trace-time
    # branch: num_pixels and Pp are static).
    if num_pixels < Pp:
        col = jax.lax.broadcasted_iota(jnp.int32, (TB, Pp), 1)
        att = jnp.where(col < num_pixels, att, -1e30)

    # Softmax over the pixel axis. Exact normalizer: the approximate EUP
    # reciprocal (~1e-3 rel. error) broke the 1e-4 reference tolerance.
    m = jnp.max(att, axis=1, keepdims=True)
    e = jnp.exp(att - m)
    alpha = e / jnp.sum(e, axis=1, keepdims=True)        # (TB, Pp)

    # attention_weighted_encoding[b] = alpha[b] @ enc[b] on the MXU, expressed
    # as a rank-3 batched matmul (the pattern Mosaic lowers natively).
    awe = jnp.einsum("bqp,bpe->bqe", alpha[:, None, :], enc,
                     preferred_element_type=jnp.float32)[:, 0, :]   # (TB, E)

    awe_ref[...] = awe.astype(awe_ref.dtype)
    alpha_ref[...] = alpha.astype(alpha_ref.dtype)


def _const_spec(shape):
    """Weight/bias spec: same block every grid step -> VMEM-resident.

    pl.Buffered(1) disables pointless double-buffering of these constant
    blocks (their DMA is already skipped; the second buffer only wastes VMEM).
    """
    idx_map = lambda b: (0,) * len(shape)
    try:
        return pl.BlockSpec(shape, idx_map, pipeline_mode=pl.Buffered(1))
    except (AttributeError, TypeError):   # older jax without pipeline_mode
        return pl.BlockSpec(shape, idx_map)


def _choose_batch_tile(B_pad, P_pad, E, D, A, *, budget_bytes, itemsize=4,
                       min_grid_steps=2):
    """Largest multiple-of-8 batch tile that divides B_pad and fits the budget."""
    # Weights counted once (single-buffered via pl.Buffered(1)).
    weight_bytes = itemsize * (E * A + D * A + 3 * A + 8)
    per_row = itemsize * (
        2 * P_pad * E        # encoder tile, double-buffered
        + 2 * D              # decoder row, double-buffered
        + 2 * E              # awe output, double-buffered
        + 2 * P_pad          # alpha output, double-buffered
        + 2 * P_pad * A      # att1 and h live simultaneously
        + 4 * P_pad          # att / exp / alpha temporaries
        + 2 * E              # awe temporary
    )
    avail = max(budget_bytes - weight_bytes, per_row)
    cap = max(8, int(avail // per_row))
    # Keep >= min_grid_steps grid steps when possible so the "parallel" batch
    # axis can shard across both TensorCores on v7x.
    if B_pad // 8 >= min_grid_steps:
        cap = min(cap, B_pad // min_grid_steps)
    tb = min(cap, B_pad)
    tb = max(8, (tb // 8) * 8)           # sublane rule: multiple of 8, never <8
    while B_pad % tb != 0:               # B_pad % 8 == 0, so this terminates
        tb -= 8
    need = weight_bytes + tb * per_row
    return tb, int(need)
    # TODO(synk): for very large P*E on v7x (64 MiB VMEM), add a second
    # "arbitrary" grid axis over pixels with an online-softmax accumulator.


def _vmem_plan(B_pad, P_pad, E, D, A):
    """Generation-aware VMEM budget + matching vmem_limit_bytes."""
    try:
        phys = int(pltpu.get_tpu_info().vmem_capacity_bytes)
    except Exception:
        phys = 64 * 1024 * 1024          # assume the smallest part (v7x)
    headroom = 2 * 1024 * 1024           # compiler-internal scratch
    budget = phys // 2 - headroom        # v7x: ~30 MiB, v5e/v6e: ~62 MiB
    tb, need = _choose_batch_tile(B_pad, P_pad, E, D, A, budget_bytes=budget)
    vmem_limit = max(16 * 1024 * 1024,
                     min(phys - 2 * headroom, need + headroom))
    return tb, int(vmem_limit)


def attention_forward(encoder_out, decoder_hidden, params, *,
                      gemm_dtype=jnp.float32):
    """encoder_out: (B, P, E); decoder_hidden: (B, D).

    params (PyTorch nn.Linear layout): we (A, E), be (A,), wd (A, D), bd (A,),
    wf (1, A), bf (1,). Returns (awe (B, E), alpha (B, P)).
    Set gemm_dtype=jnp.bfloat16 for ~2x MXU throughput (small accuracy cost).
    """
    B, P, E = encoder_out.shape
    D = decoder_hidden.shape[1]
    A = params["we"].shape[0]

    # Pad batch to a multiple of 8 (sublane axis of the (TB, ·) blocks) and
    # pixels to a multiple of 128 (lane-dense alpha output; layout-clean
    # reshape of the encoder tile).
    B_pad = _round_up(B, 8)
    P_pad = _round_up(P, 128)
    enc = encoder_out.astype(jnp.float32)
    dec = decoder_hidden.astype(jnp.float32)
    if B_pad != B or P_pad != P:
        enc = jnp.pad(enc, ((0, B_pad - B), (0, P_pad - P), (0, 0)))
    if B_pad != B:
        dec = jnp.pad(dec, ((0, B_pad - B), (0, 0)))

    # Pre-transpose weights to (in, out) so the kernel runs plain (M,K)@(K,N).
    weT = params["we"].T.astype(gemm_dtype)              # (E, A)
    wdT = params["wd"].T.astype(gemm_dtype)              # (D, A)
    be = params["be"].reshape(1, A).astype(jnp.float32)
    bd = params["bd"].reshape(1, A).astype(jnp.float32)
    wf = params["wf"].reshape(1, A).astype(jnp.float32)
    bf = params["bf"].reshape(1, 1).astype(jnp.float32)

    TB, vmem_limit = _vmem_plan(B_pad, P_pad, E, D, A)
    grid = (B_pad // TB,)

    itemsize = 4
    cost = pl.CostEstimate(
        flops=int(2 * B_pad * P_pad * E * A + 2 * B_pad * D * A
                  + 2 * B_pad * P_pad * A + 2 * B_pad * P_pad * E),
        transcendentals=int(B_pad * P_pad),
        bytes_accessed=int(itemsize * (B_pad * P_pad * E + B_pad * D
                                       + E * A + D * A + 3 * A + 1
                                       + B_pad * E + B_pad * P_pad)),
    )

    awe, alpha = pl.pallas_call(
        functools.partial(_attention_kernel, P),
        out_shape=(
            jax.ShapeDtypeStruct((B_pad, E), jnp.float32),
            jax.ShapeDtypeStruct((B_pad, P_pad), jnp.float32),
        ),
        grid=grid,
        in_specs=[
            pl.BlockSpec((TB, P_pad, E), lambda b: (b, 0, 0)),   # encoder tile
            pl.BlockSpec((TB, D), lambda b: (b, 0)),             # decoder tile
            _const_spec((E, A)),                                 # weT
            _const_spec((1, A)),                                 # be
            _const_spec((D, A)),                                 # wdT
            _const_spec((1, A)),                                 # bd
            _const_spec((1, A)),                                 # wf
            pl.BlockSpec((1, 1), lambda b: (0, 0),
                         memory_space=pltpu.SMEM),               # bf scalar
        ],
        out_specs=(
            pl.BlockSpec((TB, E), lambda b: (b, 0)),
            pl.BlockSpec((TB, P_pad), lambda b: (b, 0)),
        ),
        compiler_params=pltpu.CompilerParams(
            dimension_semantics=("parallel",),
            vmem_limit_bytes=vmem_limit,
        ),
        cost_estimate=cost,
    )(enc, dec, weT, be, wdT, bd, wf, bf)

    return awe[:B], alpha[:B, :P]


def _reference(encoder_out, decoder_hidden, params):
    att1 = encoder_out @ params["we"].T + params["be"]
    att2 = decoder_hidden @ params["wd"].T + params["bd"]
    h = jnp.maximum(att1 + att2[:, None, :], 0.0)
    att = (h @ params["wf"].T + params["bf"])[..., 0]
    alpha = jax.nn.softmax(att, axis=1)
    awe = jnp.sum(encoder_out * alpha[:, :, None], axis=1)
    return awe, alpha


if __name__ == "__main__":
    # Small shapes consistent with the module's forward.
    B, P, E, D, A = 2, 16, 32, 32, 32

    key = jax.random.PRNGKey(0)
    k_enc, k_dec, k_we, k_be, k_wd, k_bd, k_wf, k_bf = jax.random.split(key, 8)

    encoder_out = jax.random.normal(k_enc, (B, P, E), dtype=jnp.float32)
    decoder_hidden = jax.random.normal(k_dec, (B, D), dtype=jnp.float32)

    # Deterministic synthetic parameters (PyTorch Linear layout: (out, in)).
    params = {
        "we": 0.1 * jax.random.normal(k_we, (A, E), dtype=jnp.float32),
        "be": 0.1 * jax.random.normal(k_be, (A,), dtype=jnp.float32),
        "wd": 0.1 * jax.random.normal(k_wd, (A, D), dtype=jnp.float32),
        "bd": 0.1 * jax.random.normal(k_bd, (A,), dtype=jnp.float32),
        "wf": 0.1 * jax.random.normal(k_wf, (1, A), dtype=jnp.float32),
        "bf": 0.1 * jax.random.normal(k_bf, (1,), dtype=jnp.float32),
    }

    awe, alpha = attention_forward(encoder_out, decoder_hidden, params)
    jax.block_until_ready((awe, alpha))

    awe_ref, alpha_ref = _reference(encoder_out, decoder_hidden, params)
    assert awe.shape == (B, E) and alpha.shape == (B, P)
    assert jnp.allclose(awe, awe_ref, atol=1e-4, rtol=1e-4)
    assert jnp.allclose(alpha, alpha_ref, atol=1e-4, rtol=1e-4)

    print("KERNEL_OK")
</pallas_src>

<mosaic_0001>
module attributes {stable_mosaic.version = 11 : i64} {
  func.func @_attention_kernel(%arg0: i32, %arg1: memref<8x128x32xf32, #tpu.memory_space<vmem>>, %arg2: memref<8x32xf32, #tpu.memory_space<vmem>>, %arg3: memref<32x32xf32, #tpu.memory_space<vmem>>, %arg4: memref<1x32xf32, #tpu.memory_space<vmem>>, %arg5: memref<32x32xf32, #tpu.memory_space<vmem>>, %arg6: memref<1x32xf32, #tpu.memory_space<vmem>>, %arg7: memref<1x32xf32, #tpu.memory_space<vmem>>, %arg8: memref<1x1xf32, #tpu.memory_space<smem>>, %arg9: memref<8x32xf32, #tpu.memory_space<vmem>>, %arg10: memref<8x128xf32, #tpu.memory_space<vmem>>) attributes {dimension_semantics = [#tpu.dimension_semantics<parallel>], iteration_bounds = array<i64: 1>, scalar_prefetch = 0 : i64, scratch_operands = 0 : i64, tpu.core_type = #tpu.core_type<tc>, window_params = [{transform_indices = @transform_0, window_bounds = array<i64: 8, 128, 32>}, {transform_indices = @transform_1, window_bounds = array<i64: 8, 32>}, {pipeline_mode = #tpu.pipeline_mode<synchronous>, transform_indices = @transform_2, window_bounds = array<i64: 32, 32>}, {pipeline_mode = #tpu.pipeline_mode<synchronous>, transform_indices = @transform_3, window_bounds = array<i64: 1, 32>}, {pipeline_mode = #tpu.pipeline_mode<synchronous>, transform_indices = @transform_4, window_bounds = array<i64: 32, 32>}, {pipeline_mode = #tpu.pipeline_mode<synchronous>, transform_indices = @transform_5, window_bounds = array<i64: 1, 32>}, {pipeline_mode = #tpu.pipeline_mode<synchronous>, transform_indices = @transform_6, window_bounds = array<i64: 1, 32>}, {transform_indices = @transform_7, window_bounds = array<i64: 1, 1>}, {transform_indices = @transform_8, window_bounds = array<i64: 8, 32>}, {transform_indices = @transform_9, window_bounds = array<i64: 8, 128>}]} {
    %c0 = arith.constant 0 : index
    %c0_0 = arith.constant 0 : index
    %c0_1 = arith.constant 0 : index
    %0 = vector.load %arg1[%c0, %c0_0, %c0_1] : memref<8x128x32xf32, #tpu.memory_space<vmem>>, vector<8x128x32xf32>
    %1 = vector.shape_cast %0 : vector<8x128x32xf32> to vector<1024x32xf32>
    %c0_2 = arith.constant 0 : index
    %c0_3 = arith.constant 0 : index
    %2 = vector.load %arg3[%c0_2, %c0_3] : memref<32x32xf32, #tpu.memory_space<vmem>>, vector<32x32xf32>
    %cst = arith.constant dense<0.000000e+00> : vector<1024x32xf32>
    %3 = tpu.matmul %1, %2, %cst {dimension_numbers = #tpu.dot_dimension_numbers<[1], [0], [0], [1], [0, 0, 1, 1], [], []>} : vector<1024x32xf32>, vector<32x32xf32>, vector<1024x32xf32> -> vector<1024x32xf32>
    %4 = vector.shape_cast %3 : vector<1024x32xf32> to vector<8x128x32xf32>
    %c0_4 = arith.constant 0 : index
    %c0_5 = arith.constant 0 : index
    %5 = vector.load %arg4[%c0_4, %c0_5] : memref<1x32xf32, #tpu.memory_space<vmem>>, vector<1x32xf32>
    %6 = vector.shape_cast %5 : vector<1x32xf32> to vector<1x1x32xf32>
    %7 = vector.broadcast %6 : vector<1x1x32xf32> to vector<8x128x32xf32>
    %8 = arith.addf %4, %7 : vector<8x128x32xf32>
    %c0_6 = arith.constant 0 : index
    %c0_7 = arith.constant 0 : index
    %9 = vector.load %arg2[%c0_6, %c0_7] : memref<8x32xf32, #tpu.memory_space<vmem>>, vector<8x32xf32>
    %c0_8 = arith.constant 0 : index
    %c0_9 = arith.constant 0 : index
    %10 = vector.load %arg5[%c0_8, %c0_9] : memref<32x32xf32, #tpu.memory_space<vmem>>, vector<32x32xf32>
    %cst_10 = arith.constant dense<0.000000e+00> : vector<8x32xf32>
    %11 = tpu.matmul %9, %10, %cst_10 {dimension_numbers = #tpu.dot_dimension_numbers<[1], [0], [0], [1], [0, 0, 1, 1], [], []>} : vector<8x32xf32>, vector<32x32xf32>, vector<8x32xf32> -> vector<8x32xf32>
    %c0_11 = arith.constant 0 : index
    %c0_12 = arith.constant 0 : index
    %12 = vector.load %arg6[%c0_11, %c0_12] : memref<1x32xf32, #tpu.memory_space<vmem>>, vector<1x32xf32>
    %13 = vector.broadcast %12 : vector<1x32xf32> to vector<8x32xf32>
    %14 = arith.addf %11, %13 : vector<8x32xf32>
    %15 = vector.shape_cast %14 : vector<8x32xf32> to vector<8x1x32xf32>
    %16 = vector.broadcast %15 : vector<8x1x32xf32> to vector<8x128x32xf32>
    %17 = arith.addf %8, %16 : vector<8x128x32xf32>
    %cst_13 = arith.constant 0.000000e+00 : f32
    %18 = vector.broadcast %cst_13 : f32 to vector<8x128x32xf32>
    %19 = arith.maximumf %17, %18 : vector<8x128x32xf32>
    %c0_14 = arith.constant 0 : index
    %c0_15 = arith.constant 0 : index
    %20 = vector.load %arg7[%c0_14, %c0_15] : memref<1x32xf32, #tpu.memory_space<vmem>>, vector<1x32xf32>
    %21 = vector.shape_cast %20 : vector<1x32xf32> to vector<1x1x32xf32>
    %22 = vector.broadcast %21 : vector<1x1x32xf32> to vector<8x128x32xf32>
    %23 = arith.mulf %19, %22 : vector<8x128x32xf32>
    %cst_16 = arith.constant dense<0.000000e+00> : vector<8x128xf32>
    %24 = vector.multi_reduction <add>, %23, %cst_16 [2] : vector<8x128x32xf32> to vector<8x128xf32>
    %c0_17 = arith.constant 0 : index
    %c0_18 = arith.constant 0 : index
    %25 = memref.load %arg8[%c0_17, %c0_18] : memref<1x1xf32, #tpu.memory_space<smem>>
    %26 = vector.broadcast %25 : f32 to vector<8x128xf32>
    %27 = arith.addf %24, %26 : vector<8x128xf32>
    %28 = tpu.iota {dimensions = array<i32: 1>} : vector<8x128xi32>
    %c16_i32 = arith.constant 16 : i32
    %29 = vector.broadcast %c16_i32 : i32 to vector<8x128xi32>
    %30 = arith.cmpi slt, %28, %29 : vector<8x128xi32>
    %cst_19 = arith.constant -1.000000e+30 : f32
    %31 = vector.broadcast %cst_19 : f32 to vector<8x128xf32>
    %32 = arith.select %30, %27, %31 : vector<8x128xi1>, vector<8x128xf32>
    %cst_20 = arith.constant dense<0xFF800000> : vector<8xf32>
    %33 = vector.multi_reduction <maximumf>, %32, %cst_20 [1] : vector<8x128xf32> to vector<8xf32>
    %34 = vector.shape_cast %33 : vector<8xf32> to vector<8x1xf32>
    %35 = vector.broadcast %34 : vector<8x1xf32> to vector<8x128xf32>
    %36 = arith.subf %32, %35 : vector<8x128xf32>
    %37 = math.exp %36 : vector<8x128xf32>
    %cst_21 = arith.constant dense<0.000000e+00> : vector<8xf32>
    %38 = vector.multi_reduction <add>, %37, %cst_21 [1] : vector<8x128xf32> to vector<8xf32>
    %39 = vector.shape_cast %38 : vector<8xf32> to vector<8x1xf32>
    %40 = vector.broadcast %39 : vector<8x1xf32> to vector<8x128xf32>
    %41 = arith.divf %37, %40 : vector<8x128xf32>
    %42 = vector.shape_cast %41 : vector<8x128xf32> to vector<8x1x128xf32>
    "tpu.trace_start"() <{level = 10 : i32, message = "bqp,bpe->bqe"}> : () -> ()
    %cst_22 = arith.constant dense<0.000000e+00> : vector<8x1x32xf32>
    %43 = tpu.matmul %42, %0, %cst_22 {dimension_numbers = #tpu.dot_dimension_numbers<[2], [1], [1], [2], [0, 0, 0, 1, 1, 2], [0], [0]>} : vector<8x1x128xf32>, vector<8x128x32xf32>, vector<8x1x32xf32> -> vector<8x1x32xf32>
    "tpu.trace_stop"() : () -> ()
    %44 = vector.shape_cast %43 : vector<8x1x32xf32> to vector<8x32xf32>
    %c0_23 = arith.constant 0 : index
    %c0_24 = arith.constant 0 : index
    %45 = vector.load %arg9[%c0_23, %c0_24] : memref<8x32xf32, #tpu.memory_space<vmem>>, vector<8x32xf32>
    tpu.vector_store %arg9[%c0_23, %c0_24], %44 {strides = array<i32>} : memref<8x32xf32, #tpu.memory_space<vmem>>, vector<8x32xf32>,
    %c0_25 = arith.constant 0 : index
    %c0_26 = arith.constant 0 : index
    %46 = vector.load %arg10[%c0_25, %c0_26] : memref<8x128xf32, #tpu.memory_space<vmem>>, vector<8x128xf32>
    tpu.vector_store %arg10[%c0_25, %c0_26], %41 {strides = array<i32>} : memref<8x128xf32, #tpu.memory_space<vmem>>, vector<8x128xf32>,
    return
  }
  func.func @transform_0(%arg0: i32) -> (i32, i32, i32) {
    %c0_i32 = arith.constant 0 : i32
    %c0_i32_0 = arith.constant 0 : i32
    %c0_i32_1 = arith.constant 0 : i32
    return %arg0, %c0_i32, %c0_i32_0 : i32, i32, i32
  }
  func.func @transform_1(%arg0: i32) -> (i32, i32) {
    %c0_i32 = arith.constant 0 : i32
    %c0_i32_0 = arith.constant 0 : i32
    return %arg0, %c0_i32 : i32, i32
  }
  func.func @transform_2(%arg0: i32) -> (i32, i32) {
    %c0_i32 = arith.constant 0 : i32
    %c0_i32_0 = arith.constant 0 : i32
    %c0_i32_1 = arith.constant 0 : i32
    return %c0_i32, %c0_i32_0 : i32, i32
  }
  func.func @transform_3(%arg0: i32) -> (i32, i32) {
    %c0_i32 = arith.constant 0 : i32
    %c0_i32_0 = arith.constant 0 : i32
    %c0_i32_1 = arith.constant 0 : i32
    return %c0_i32, %c0_i32_0 : i32, i32
  }
  func.func @transform_4(%arg0: i32) -> (i32, i32) {
    %c0_i32 = arith.constant 0 : i32
    %c0_i32_0 = arith.constant 0 : i32
    %c0_i32_1 = arith.constant 0 : i32
    return %c0_i32, %c0_i32_0 : i32, i32
  }
  func.func @transform_5(%arg0: i32) -> (i32, i32) {
    %c0_i32 = arith.constant 0 : i32
    %c0_i32_0 = arith.constant 0 : i32
    %c0_i32_1 = arith.constant 0 : i32
    return %c0_i32, %c0_i32_0 : i32, i32
  }
  func.func @transform_6(%arg0: i32) -> (i32, i32) {
    %c0_i32 = arith.constant 0 : i32
    %c0_i32_0 = arith.constant 0 : i32
    %c0_i32_1 = arith.constant 0 : i32
    return %c0_i32, %c0_i32_0 : i32, i32
  }
  func.func @transform_7(%arg0: i32) -> (i32, i32) {
    %c0_i32 = arith.constant 0 : i32
    %c0_i32_0 = arith.constant 0 : i32
    %c0_i32_1 = arith.constant 0 : i32
    return %c0_i32, %c0_i32_0 : i32, i32
  }
  func.func @transform_8(%arg0: i32) -> (i32, i32) {
    %c0_i32 = arith.constant 0 : i32
    %c0_i32_0 = arith.constant 0 : i32
    return %arg0, %c0_i32 : i32, i32
  }
  func.func @transform_9(%arg0: i32) -> (i32, i32) {
    %c0_i32 = arith.constant 0 : i32
    %c0_i32_0 = arith.constant 0 : i32
    return %arg0, %c0_i32 : i32, i32
  }
}

</mosaic_0001>

<bundles_post_ra>
// kernel: tpu_custom_call.1
= control target key start
LH: loop header
LB: loop body
LE: loop exit
PB: predicated region body
PF: predicated region fallthrough
CT: control target
= control target key end

     0   :  { %16 = vsyncpa [#allocation4], 0  ;;  %vm7632_vm0 = vcmask 261120   ;;  %v7623_v11 = vmov 0.0   ;;  %vm7628_vm1 = vmmov 0   ;;  %s7613_s0 = inlined_call_operand.vmem [shape: f32[8,128,32], index: 0, kind: input, shape index: {}]   ;;  %s7614_s1 = inlined_call_operand.vmem [shape: f32[8,32], index: 1, kind: input, shape index: {}]   ;;  %s7615_s2 = inlined_call_operand.vmem [shape: f32[32,32], index: 2, kind: input, shape index: {}]   ;;  %s7616_s3 = inlined_call_operand.vmem [shape: f32[1,32], index: 3, kind: input, shape index: {}]   ;;  %s7617_s4 = inlined_call_operand.vmem [shape: f32[32,32], index: 4, kind: input, shape index: {}]   ;;  %s7618_s5 = inlined_call_operand.vmem [shape: f32[1,32], index: 5, kind: input, shape index: {}]   ;;  %s7619_s6 = inlined_call_operand.vmem [shape: f32[1,32], index: 6, kind: input, shape index: {}]   ;;  %s7620_s7 = inlined_call_operand.<no memory space> [shape: f32[1,1], index: 7, kind: input, shape index: {}]   ;;  %s7621_s8 = inlined_call_operand.hbm [shape: f32[8,32], index: 8, kind: output, shape index: {0}]   ;;  %s7622_s9 = inlined_call_operand.hbm [shape: f32[8,128], index: 9, kind: output, shape index: {1}]  }
   0x1   :  { %v165_v0 = vld [vmem:[%s7615_s2 + $0x18] sm:$0xff]  ;;  %v164_v1 = vld [vmem:[%s7615_s2 + $0x10] sm:$0xff]  ;;  %v163_v2 = vld [vmem:[%s7615_s2 + $0x8] sm:$0xff] }
   0x2   :  { %4365 = vmatprep.subr.mxu0 %v165_v0  ;;  %4856 = vmatprep.subr.mxu1 %v165_v0  ;;  %v162_v3 = vld [vmem:[%s7615_s2] sm:$0xff]  ;;  %v5097_v6 = vld [vmem:[%s7613_s0 + $0x8] sm:$0xff]  ;;  %v5107_v8 = vld [vmem:[%s7613_s0 + $0x10] sm:$0xff] }
   0x3   :  { %4366 = vmatpush3.msra.mxu0 %v165_v0  ;;  %4860 = vmatpush3.msra.mxu1 %v165_v0  ;;  %v5087_v4 = vld [vmem:[%s7613_s0] sm:$0xff]  ;;  %v5102_v7 = vld [vmem:[%s7613_s0 + $0x3c8] sm:$0xff]  ;;  %v1395_v9 = vld [vmem:[%s7617_s4 + $0x18] sm:$0xff] }
   0x4   :  { %4367 = vmatprep.subr.mxu0 %v164_v1  ;;  %4857 = vmatprep.subr.mxu1 %v164_v1  ;;  %v5092_v5 = vld [vmem:[%s7613_s0 + $0x3c0] sm:$0xff]  ;;  %v5119_v10 = vld [vmem:[%s7613_s0 + $0x3d0] sm:$0xff]  ;;  %v5131_v12 = vld [vmem:[%s7613_s0 + $0x18] sm:$0xff] }
   0x5   :  { %4368 = vmatpush3.msra.mxu0 %v164_v1  ;;  %4861 = vmatpush3.msra.mxu1 %v164_v1  ;;  %v5136_v13 = vld [vmem:[%s7613_s0 + $0x3d8] sm:$0xff]  ;;  %v1394_v14 = vld [vmem:[%s7617_s4 + $0x10] sm:$0xff]  ;;  %v5146_v15 = vld [vmem:[%s7613_s0 + $0x20] sm:$0xff] }
   0x6   :  { %4369 = vmatprep.subr.mxu0 %v163_v2  ;;  %4858 = vmatprep.subr.mxu1 %v163_v2  ;;  %v158_v16 = vld [vmem:[%s7613_s0 + $0x3e0] sm:$0xff]  ;;  %v1393_v17 = vld [vmem:[%s7617_s4 + $0x8] sm:$0xff]  ;;  %v5175_v20 = vld [vmem:[%s7613_s0 + $0x30] sm:$0xff] }
   0x7   :  { %4370 = vmatpush3.msra.mxu0 %v163_v2  ;;  %4862 = vmatpush3.msra.mxu1 %v163_v2  ;;  %v5165_v18 = vld [vmem:[%s7613_s0 + $0x28] sm:$0xff]  ;;  %v160_v21 = vld [vmem:[%s7613_s0 + $0x3f0] sm:$0xff]  ;;  %v161_v22 = vld [vmem:[%s7613_s0 + $0x3f8] sm:$0xff] }
   0x8   :  { %4371 = vmatprep.subr.mxu0 %v162_v3  ;;  %4859 = vmatprep.subr.mxu1 %v162_v3  ;;  %v159_v19 = vld [vmem:[%s7613_s0 + $0x3e8] sm:$0xff]  ;;  %v1392_v23 = vld [vmem:[%s7617_s4] sm:$0xff]  ;;  %v41_v24 = vld [vmem:[%s7613_s0 + $0x38] sm:$0xff] }
   0x9   :  { %4372 = vmatpush3.msra.mxu0 %v162_v3  ;;  %4863 = vmatpush3.msra.mxu1 %v162_v3  ;;  %v42_v25 = vld [vmem:[%s7613_s0 + $0x40] sm:$0xff]  ;;  %v43_v26 = vld [vmem:[%s7613_s0 + $0x48] sm:$0xff]  ;;  %v44_v28 = vld [vmem:[%s7613_s0 + $0x50] sm:$0xff] }
   0xa   :  { %4373 = vmatprep.mubr.msk.f32.mxu0 %vm7632_vm0, %v5087_v4  ;;  %4553 = vmatprep.mubr.msk.f32.mxu1 %vm7632_vm0, %v5092_v5  ;;  %v1391_v27 = vld [vmem:[%s7614_s1] sm:$0xff]  ;;  %v49_v29 = vld [vmem:[%s7613_s0 + $0x78] sm:$0xff]  ;;  %v48_v32 = vld [vmem:[%s7613_s0 + $0x70] sm:$0xff] }
   0xb   :  { %4374 = vmatmul.mubr.msk.f32.vlgmr.msra.gmra.mxu0 %vm7632_vm0, %v5097_v6  ;;  %4554 = vmatmul.mubr.msk.f32.vlgmr.msra.gmra.mxu1 %vm7632_vm0, %v5102_v7  ;;  %v45_v30 = vld [vmem:[%s7613_s0 + $0x58] sm:$0xff]  ;;  %v46_v31 = vld [vmem:[%s7613_s0 + $0x60] sm:$0xff]  ;;  %v47_v33 = vld [vmem:[%s7613_s0 + $0x68] sm:$0xff] }
   0xc   :  { %4565 = vmatprep.subr.mxu1 %v7623_v11  ;;  %4376 = vmatprep.mubr.msk.f32.mxu0 %vm7632_vm0, %v5107_v8 }
   0xd   :  { %4566 = vmatpush3.msra.mxu1 %v1395_v9  ;;  %4556 = vmatprep.mubr.msk.f32.mxu1 %vm7632_vm0, %v5119_v10 }
   0xe   :  { %4567 = vmatprep.subr.mxu1 %v7623_v11  ;;  %4821 = vmatprep.subr.mxu0 %v7623_v11 }
   0xf   :  { %4377 = vmatmul.mubr.msk.f32.gmra.mxu0 %vm7632_vm0, %v5131_v12  ;;  %4557 = vmatmul.mubr.msk.f32.gmra.mxu1 %vm7632_vm0, %v5136_v13 }
  0x10   :  { %4568 = vmatpush3.msra.mxu1 %v1394_v14  ;;  %4379 = vmatprep.mubr.msk.f32.mxu0 %vm7632_vm0, %v5146_v15 }
  0x11   :  { %4559 = vmatprep.mubr.msk.f32.mxu1 %vm7632_vm0, %v158_v16  ;;  %4569 = vmatprep.subr.mxu1 %v7623_v11 }
  0x12   :  { %4570 = vmatpush3.msra.mxu1 %v1393_v17  ;;  %4822 = vmatpush3.msra.mxu0 %v161_v22 }
  0x13   :  { %4380 = vmatmul.mubr.msk.f32.gmra.mxu0 %vm7632_vm0, %v5165_v18  ;;  %4560 = vmatmul.mubr.msk.f32.gmra.mxu1 %vm7632_vm0, %v159_v19 }
  0x14   :  { %4382 = vmatprep.mubr.msk.f32.mxu0 %vm7632_vm0, %v5175_v20  ;;  %4562 = vmatprep.mubr.msk.f32.mxu1 %vm7632_vm0, %v160_v21 }
  0x15   :  { %4571 = vmatprep.subr.mxu1 %v7623_v11  ;;  %4823 = vmatprep.subr.mxu0 %v7623_v11 }
  0x16   :  { %4572 = vmatpush3.msra.mxu1 %v1392_v23  ;;  %4824 = vmatpush3.msra.mxu0 %v160_v21 }
  0x17   :  { %4383 = vmatmul.mubr.msk.f32.gmra.mxu0 %vm7632_vm0, %v41_v24  ;;  %4563 = vmatmul.mubr.msk.f32.gmra.mxu1 %vm7632_vm0, %v161_v22 }
  0x18   :  { %4385 = vmatprep.mubr.msk.f32.mxu0 %vm7632_vm0, %v42_v25  ;;  %4573 = vmatprep.mubr.msk.f32.mxu1 %vm7628_vm1, %v7623_v11 }
  0x19   :  { %4576 = vmatprep.subr.mxu1 %v7623_v11  ;;  %4825 = vmatprep.subr.mxu0 %v7623_v11 }
  0x1a   :  { %4826 = vmatpush3.msra.mxu0 %v159_v19 }
  0x1b   :  { %4386 = vmatmul.mubr.msk.f32.gmra.mxu0 %vm7632_vm0, %v43_v26  ;;  %4574 = vmatmul.mubr.msk.f32.vlgmr.msra.gmra.mxu1 %vm7632_vm0, %v1391_v27 }
  0x1c   :  { %4388 = vmatprep.mubr.msk.f32.mxu0 %vm7632_vm0, %v44_v28  ;;  %4577 = vmatpush3.msra.mxu1 %v49_v29 }
  0x1d   :  { %4578 = vmatprep.subr.mxu1 %v7623_v11  ;;  %4827 = vmatprep.subr.mxu0 %v7623_v11 }
  0x1e   :  { %4579 = vmatpush3.msra.mxu1 %v48_v32  ;;  %4828 = vmatpush3.msra.mxu0 %v158_v16 }
  0x1f   :  { %4389 = vmatmul.mubr.msk.f32.gmra.mxu0 %vm7632_vm0, %v45_v30  ;;  %4580 = vmatprep.subr.mxu1 %v7623_v11 }
  0x20   :  { %4391 = vmatprep.mubr.msk.f32.mxu0 %vm7632_vm0, %v46_v31  ;;  %4581 = vmatpush3.msra.mxu1 %v47_v33 }
  0x21   :  { %17 = vsyncpa [#allocation6], 0  ;;  %4582 = vmatprep.subr.mxu1 %v7623_v11  ;;  %4829 = vmatprep.subr.mxu0 %v7623_v11  ;;  %v50_v34 = vld [vmem:[%s7613_s0 + $0x80] sm:$0xff]  ;;  %v51_v35 = vld [vmem:[%s7613_s0 + $0x88] sm:$0xff]  ;;  %vm2611_vm2 = vcmask 130112   ;;  %vm2618_vm3 = vcmask 195712  }
  0x22   :  { %4583 = vmatpush3.msra.mxu1 %v46_v31  ;;  %4830 = vmatpush3.msra.mxu0 %v5136_v13  ;;  %v52_v36 = vld [vmem:[%s7613_s0 + $0x90] sm:$0xff]  ;;  %v53_v37 = vld [vmem:[%s7613_s0 + $0x98] sm:$0xff]  ;;  %v54_v38 = vld [vmem:[%s7613_s0 + $0xa0] sm:$0xff]  ;;  %vm2625_vm4 = vcmask 261312   ;;  %vm2632_vm5 = vcmask 326912   ;;  %vm7630_vm6 = vcmask 392512  }
  0x23   :  { %4392 = vmatmul.mubr.msk.f32.gmra.mxu0 %vm7632_vm0, %v47_v33  ;;  %4584 = vmatprep.subr.mxu1 %v7623_v11  ;;  %v55_v39 = vld [vmem:[%s7613_s0 + $0xa8] sm:$0xff]  ;;  %v56_v40 = vld [vmem:[%s7613_s0 + $0xb0] sm:$0xff]  ;;  %v57_v41 = vld [vmem:[%s7613_s0 + $0xb8] sm:$0xff]  ;;  %vm2646_vm7 = vcmask 458112   ;;  %vm2653_vm8 = vcmask 523712   ;;  %vm2660_vm9 = vcmask 589312  }
  0x24   :  { %4394 = vmatprep.mubr.msk.f32.mxu0 %vm7632_vm0, %v48_v32  ;;  %4585 = vmatpush3.msra.mxu1 %v45_v30  ;;  %v58_v42 = vld [vmem:[%s7613_s0 + $0xc0] sm:$0xff]  ;;  %v59_v43 = vld [vmem:[%s7613_s0 + $0xc8] sm:$0xff]  ;;  %v60_v44 = vld [vmem:[%s7613_s0 + $0xd0] sm:$0xff]  ;;  %vm2667_vm10 = vcmask 654912   ;;  %vm2674_vm11 = vcmask 720512   ;;  %vm2681_vm12 = vcmask 786112  }
  0x25   :  { %4586 = vmatprep.subr.mxu1 %v7623_v11  ;;  %4831 = vmatprep.subr.mxu0 %v7623_v11  ;;  %v61_v45 = vld [vmem:[%s7613_s0 + $0xd8] sm:$0xff]  ;;  %v62_v46 = vld [vmem:[%s7613_s0 + $0xe0] sm:$0xff]  ;;  %v63_v47 = vld [vmem:[%s7613_s0 + $0xe8] sm:$0xff]  ;;  %vm2688_vm13 = vcmask 851712   ;;  %vm2695_vm14 = vcmask 917312   ;;  %vm2702_vm15 = vcmask 982912  }
  0x26   :  { %4587 = vmatpush3.msra.mxu1 %v44_v28  ;;  %4832 = vmatpush3.msra.mxu0 %v5119_v10  ;;  %v64_v48 = vld [vmem:[%s7613_s0 + $0xf0] sm:$0xff]  ;;  %v65_v49 = vld [vmem:[%s7613_s0 + $0xf8] sm:$0xff]  ;;  %v66_v50 = vld [vmem:[%s7613_s0 + $0x100] sm:$0xff]  ;;  %s5020_s30 = smov [#allocation5]  }
  0x27   :  { %4395 = vmatmul.mubr.msk.f32.gmra.mxu0 %vm7632_vm0, %v49_v29  ;;  %4588 = vmatprep.subr.mxu1 %v7623_v11  ;;  %v67_v51 = vld [vmem:[%s7613_s0 + $0x108] sm:$0xff]  ;;  %v68_v52 = vld [vmem:[%s7613_s0 + $0x110] sm:$0xff]  ;;  %v69_v53 = vld [vmem:[%s7613_s0 + $0x118] sm:$0xff]  ;;  %s3948_s10 = sshll.u32 %s5020_s30, 4  ;;  %s3949_s10 = int_to_ptr.vmem [resolvable:$true] %s3948_s10 }
  0x28   :  { %4397 = vmatprep.mubr.msk.f32.mxu0 %vm7632_vm0, %v50_v34  ;;  %4589 = vmatpush3.msra.mxu1 %v43_v26  ;;  %v70_v54 = vld [vmem:[%s7613_s0 + $0x120] sm:$0xff]  ;;  %v71_v55 = vld [vmem:[%s7613_s0 + $0x128] sm:$0xff]  ;;  %v72_v56 = vld [vmem:[%s7613_s0 + $0x130] sm:$0xff]  ;;  %p4978_p1 = scmp.lt.s32.totalorder %s3949_s10, %s3949_s10 }
  0x29   :  { %4590 = vmatprep.subr.mxu1 %v7623_v11  ;;  %4833 = vmatprep.subr.mxu0 %v7623_v11  ;;  %v73_v57 = vld [vmem:[%s7613_s0 + $0x138] sm:$0xff]  ;;  %v74_v58 = vld [vmem:[%s7613_s0 + $0x140] sm:$0xff]  ;;  %v75_v59 = vld [vmem:[%s7613_s0 + $0x148] sm:$0xff] }
  0x2a   :  { %4591 = vmatpush3.msra.mxu1 %v42_v25  ;;  %4834 = vmatpush3.msra.mxu0 %v5102_v7  ;;  %v76_v60 = vld [vmem:[%s7613_s0 + $0x150] sm:$0xff]  ;;  %v77_v61 = vld [vmem:[%s7613_s0 + $0x158] sm:$0xff]  ;;  %v78_v62 = vld [vmem:[%s7613_s0 + $0x160] sm:$0xff] }
  0x2b   :  { %4398 = vmatmul.mubr.msk.f32.gmra.mxu0 %vm7632_vm0, %v51_v35  ;;  %4592 = vmatprep.subr.mxu1 %v7623_v11  ;;  %v79_v63 = vld [vmem:[%s7613_s0 + $0x168] sm:$0xff]  ;;  %v80_v0 = vld [vmem:[%s7613_s0 + $0x170] sm:$0xff]  ;;  %v81_v1 = vld [vmem:[%s7613_s0 + $0x178] sm:$0xff] }
  0x2c   :  { %4400 = vmatprep.mubr.msk.f32.mxu0 %vm7632_vm0, %v52_v36  ;;  %4593 = vmatpush3.msra.mxu1 %v41_v24  ;;  %v82_v2 = vld [vmem:[%s7613_s0 + $0x180] sm:$0xff]  ;;  %v83_v3 = vld [vmem:[%s7613_s0 + $0x188] sm:$0xff]  ;;  %v89_v9 = vld [vmem:[%s7613_s0 + $0x1b8] sm:$0xff] }
  0x2d   :  { %4594 = vmatprep.subr.mxu1 %v7623_v11  ;;  %4835 = vmatprep.subr.mxu0 %v7623_v11  ;;  %v87_v7 = vld [vmem:[%s7613_s0 + $0x1a8] sm:$0xff]  ;;  %v90_v10 = vld [vmem:[%s7613_s0 + $0x1c0] sm:$0xff]  ;;  %v92_v13 = vld [vmem:[%s7613_s0 + $0x1d0] sm:$0xff] }
  0x2e   :  { %4595 = vmatpush3.msra.mxu1 %v5175_v20  ;;  %4836 = vmatpush3.msra.mxu0 %v5092_v5  ;;  %v85_v5 = vld [vmem:[%s7613_s0 + $0x198] sm:$0xff]  ;;  %v94_v16 = vld [vmem:[%s7613_s0 + $0x1e0] sm:$0xff]  ;;  %v5461_v17 = vld [vmem:[%s7613_s0 + $0x3b0] sm:$0xff] }
  0x2f   :  { %4401 = vmatmul.mubr.msk.f32.gmra.mxu0 %vm7632_vm0, %v53_v37  ;;  %4596 = vmatprep.subr.mxu1 %v7623_v11  ;;  %v5448_v14 = vld [vmem:[%s7613_s0 + $0x3b8] sm:$0xff]  ;;  %v95_v19 = vld [vmem:[%s7613_s0 + $0x1e8] sm:$0xff]  ;;  %v96_v20 = vld [vmem:[%s7613_s0 + $0x1f0] sm:$0xff] }
  0x30   :  { %4403 = vmatprep.mubr.msk.f32.mxu0 %vm7632_vm0, %v54_v38  ;;  %4597 = vmatpush3.msra.mxu1 %v5165_v18  ;;  %v5469_v18 = vld [vmem:[%s7613_s0 + $0x3a8] sm:$0xff]  ;;  %v5483_v21 = vld [vmem:[%s7613_s0 + $0x3a0] sm:$0xff]  ;;  %v5491_v22 = vld [vmem:[%s7613_s0 + $0x398] sm:$0xff] }
  0x31   :  { %4598 = vmatprep.subr.mxu1 %v7623_v11  ;;  %4837 = vmatprep.subr.mxu0 %v7623_v11  ;;  %v97_v23 = vld [vmem:[%s7613_s0 + $0x1f8] sm:$0xff]  ;;  %v98_v24 = vld [vmem:[%s7613_s0 + $0x200] sm:$0xff]  ;;  %v5505_v25 = vld [vmem:[%s7613_s0 + $0x390] sm:$0xff] }
  0x32   :  { %4599 = vmatpush3.msra.mxu1 %v5146_v15  ;;  %4608 = vmatprep.mubr.msk.f32.mxu1 %vm7628_vm1, %v7623_v11  ;;  %v93_v15 = vld [vmem:[%s7613_s0 + $0x1d8] sm:$0xff]  ;;  %v5513_v26 = vld [vmem:[%s7613_s0 + $0x388] sm:$0xff]  ;;  %v100_v28 = vld [vmem:[%s7613_s0 + $0x210] sm:$0xff] }
  0x33   :  { %4404 = vmatmul.mubr.msk.f32.gmra.mxu0 %vm7632_vm0, %v55_v39  ;;  %4600 = vmatprep.subr.mxu1 %v7623_v11  ;;  %v99_v27 = vld [vmem:[%s7613_s0 + $0x208] sm:$0xff]  ;;  %v5527_v29 = vld [vmem:[%s7613_s0 + $0x380] sm:$0xff]  ;;  %v101_v30 = vld [vmem:[%s7613_s0 + $0x218] sm:$0xff] }
  0x34   :  { %4406 = vmatprep.mubr.msk.f32.mxu0 %vm7632_vm0, %v56_v40  ;;  %4601 = vmatpush3.msra.mxu1 %v5131_v12  ;;  %v91_v12 = vld [vmem:[%s7613_s0 + $0x1c8] sm:$0xff]  ;;  %v102_v31 = vld [vmem:[%s7613_s0 + $0x220] sm:$0xff]  ;;  %v104_v33 = vld [vmem:[%s7613_s0 + $0x230] sm:$0xff] }
  0x35   :  { %4602 = vmatprep.subr.mxu1 %v7623_v11  ;;  %4838 = vmatpush3.msra.mxu0 %v5448_v14  ;;  %v103_v32 = vld [vmem:[%s7613_s0 + $0x228] sm:$0xff]  ;;  %v105_v34 = vld [vmem:[%s7613_s0 + $0x238] sm:$0xff]  ;;  %v106_v35 = vld [vmem:[%s7613_s0 + $0x240] sm:$0xff] }
  0x36   :  { %4603 = vmatpush3.msra.mxu1 %v5107_v8  ;;  %v88_v8 = vld [vmem:[%s7613_s0 + $0x1b0] sm:$0xff]  ;;  %4839 = vmatprep.subr.mxu0 %v7623_v11  ;;  %v107_v36 = vld [vmem:[%s7613_s0 + $0x248] sm:$0xff]  ;;  %v109_v38 = vld [vmem:[%s7613_s0 + $0x258] sm:$0xff] }
  0x37   :  { %4407 = vmatmul.mubr.msk.f32.gmra.mxu0 %vm7632_vm0, %v57_v41  ;;  %4604 = vmatprep.subr.mxu1 %v7623_v11  ;;  %v108_v37 = vld [vmem:[%s7613_s0 + $0x250] sm:$0xff]  ;;  %v110_v39 = vld [vmem:[%s7613_s0 + $0x260] sm:$0xff]  ;;  %v111_v40 = vld [vmem:[%s7613_s0 + $0x268] sm:$0xff] }
  0x38   :  { %4409 = vmatprep.mubr.msk.f32.mxu0 %vm7632_vm0, %v58_v42  ;;  %4605 = vmatpush3.msra.mxu1 %v5097_v6  ;;  %v86_v6 = vld [vmem:[%s7613_s0 + $0x1a0] sm:$0xff]  ;;  %v112_v41 = vld [vmem:[%s7613_s0 + $0x270] sm:$0xff]  ;;  %v113_v42 = vld [vmem:[%s7613_s0 + $0x278] sm:$0xff] }
  0x39   :  { %4606 = vmatprep.subr.mxu1 %v7623_v11  ;;  %4840 = vmatpush3.msra.mxu0 %v5461_v17 }
  0x3a   :  { %4607 = vmatpush3.msra.mxu1 %v5087_v4  ;;  %v84_v4 = vld [vmem:[%s7613_s0 + $0x190] sm:$0xff]  ;;  %4841 = vmatprep.subr.mxu0 %v7623_v11 }
  0x3b   :  { %4410 = vmatmul.mubr.msk.f32.gmra.mxu0 %vm7632_vm0, %v59_v43  ;;  %4611 = vmatprep.subr.mxu1 %v7623_v11  ;;  %v114_v43 = vld [vmem:[%s7613_s0 + $0x280] sm:$0xff] }
  0x3c   :  { %4412 = vmatprep.mubr.msk.f32.mxu0 %vm7632_vm0, %v60_v44  ;;  %4842 = vmatpush3.msra.mxu0 %v5469_v18  ;;  %v115_v44 = vld [vmem:[%s7613_s0 + $0x288] sm:$0xff] }
  0x3d   :  { %4843 = vmatprep.subr.mxu0 %v7623_v11 }
  0x3e   :  { %4844 = vmatpush3.msra.mxu0 %v5483_v21 }
  0x3f   :  { %4413 = vmatmul.mubr.msk.f32.gmra.mxu0 %vm7632_vm0, %v61_v45  ;;  %4845 = vmatprep.subr.mxu0 %v7623_v11  ;;  %v116_v45 = vld [vmem:[%s7613_s0 + $0x290] sm:$0xff] }
  0x40   :  { %4415 = vmatprep.mubr.msk.f32.mxu0 %vm7632_vm0, %v62_v46  ;;  %4846 = vmatpush3.msra.mxu0 %v5491_v22  ;;  %v117_v46 = vld [vmem:[%s7613_s0 + $0x298] sm:$0xff] }
  0x41   :  { %4847 = vmatprep.subr.mxu0 %v7623_v11 }
  0x42   :  { %4848 = vmatpush3.msra.mxu0 %v5505_v25 }
  0x43   :  { %4416 = vmatmul.mubr.msk.f32.gmra.mxu0 %vm7632_vm0, %v63_v47  ;;  %4849 = vmatprep.subr.mxu0 %v7623_v11  ;;  %v118_v47 = vld [vmem:[%s7613_s0 + $0x2a0] sm:$0xff] }
  0x44   :  { %4418 = vmatprep.mubr.msk.f32.mxu0 %vm7632_vm0, %v64_v48  ;;  %4850 = vmatpush3.msra.mxu0 %v5513_v26  ;;  %v119_v48 = vld [vmem:[%s7613_s0 + $0x2a8] sm:$0xff] }
  0x45   :  { %4851 = vmatprep.subr.mxu0 %v7623_v11 }
  0x46   :  { %4852 = vmatpush3.msra.mxu0 %v5527_v29 }
  0x47   :  { %4419 = vmatmul.mubr.msk.f32.gmra.mxu0 %vm7632_vm0, %v65_v49  ;;  %v120_v49 = vld [vmem:[%s7613_s0 + $0x2b0] sm:$0xff] }
  0x48   :  { %4421 = vmatprep.mubr.msk.f32.mxu0 %vm7632_vm0, %v66_v50  ;;  %v121_v50 = vld [vmem:[%s7613_s0 + $0x2b8] sm:$0xff] }
  0x4b   :  { %4422 = vmatmul.mubr.msk.f32.gmra.mxu0 %vm7632_vm0, %v67_v51  ;;  %v122_v51 = vld [vmem:[%s7613_s0 + $0x2c0] sm:$0xff] }
  0x4c   :  { %4424 = vmatprep.mubr.msk.f32.mxu0 %vm7632_vm0, %v68_v52  ;;  %v123_v52 = vld [vmem:[%s7613_s0 + $0x2c8] sm:$0xff] }
  0x4f   :  { %4425 = vmatmul.mubr.msk.f32.gmra.mxu0 %vm7632_vm0, %v69_v53  ;;  %v124_v53 = vld [vmem:[%s7613_s0 + $0x2d0] sm:$0xff] }
  0x50   :  { %4427 = vmatprep.mubr.msk.f32.mxu0 %vm7632_vm0, %v70_v54  ;;  %v125_v54 = vld [vmem:[%s7613_s0 + $0x2d8] sm:$0xff] }
  0x53   :  { %4428 = vmatmul.mubr.msk.f32.gmra.mxu0 %vm7632_vm0, %v71_v55  ;;  %v126_v55 = vld [vmem:[%s7613_s0 + $0x2e0] sm:$0xff] }
  0x54   :  { %4430 = vmatprep.mubr.msk.f32.mxu0 %vm7632_vm0, %v72_v56  ;;  %v127_v56 = vld [vmem:[%s7613_s0 + $0x2e8] sm:$0xff] }
  0x57   :  { %4431 = vmatmul.mubr.msk.f32.gmra.mxu0 %vm7632_vm0, %v73_v57  ;;  %v128_v57 = vld [vmem:[%s7613_s0 + $0x2f0] sm:$0xff] }
  0x58   :  { %4433 = vmatprep.mubr.msk.f32.mxu0 %vm7632_vm0, %v74_v58  ;;  %v129_v58 = vld [vmem:[%s7613_s0 + $0x2f8] sm:$0xff] }
  0x5b   :  { %4434 = vmatmul.mubr.msk.f32.gmra.mxu0 %vm7632_vm0, %v75_v59  ;;  %v130_v59 = vld [vmem:[%s7613_s0 + $0x300] sm:$0xff] }
  0x5c   :  { %4436 = vmatprep.mubr.msk.f32.mxu0 %vm7632_vm0, %v76_v60  ;;  %v131_v60 = vld [vmem:[%s7613_s0 + $0x308] sm:$0xff] }
  0x5f   :  { %4437 = vmatmul.mubr.msk.f32.gmra.mxu0 %vm7632_vm0, %v77_v61  ;;  %v132_v61 = vld [vmem:[%s7613_s0 + $0x310] sm:$0xff] }
  0x60   :  { %4439 = vmatprep.mubr.msk.f32.mxu0 %vm7632_vm0, %v78_v62 }
  0x63   :  { %4440 = vmatmul.mubr.msk.f32.gmra.mxu0 %vm7632_vm0, %v79_v63 }
  0x64   :  { %4442 = vmatprep.mubr.msk.f32.mxu0 %vm7632_vm0, %v80_v0  ;;  %v133_v0 = vld [vmem:[%s7613_s0 + $0x318] sm:$0xff] }
  0x67   :  { %4443 = vmatmul.mubr.msk.f32.gmra.mxu0 %vm7632_vm0, %v81_v1 }
  0x68   :  { %4445 = vmatprep.mubr.msk.f32.mxu0 %vm7632_vm0, %v82_v2 }
  0x6b   :  { %4446 = vmatmul.mubr.msk.f32.gmra.mxu0 %vm7632_vm0, %v83_v3  ;;  %v134_v3 = vld [vmem:[%s7613_s0 + $0x320] sm:$0xff] }
  0x6c   :  { %4448 = vmatprep.mubr.msk.f32.mxu0 %vm7632_vm0, %v84_v4 }
  0x6f   :  { %4449 = vmatmul.mubr.msk.f32.gmra.mxu0 %vm7632_vm0, %v85_v5 }
  0x70   :  { %4451 = vmatprep.mubr.msk.f32.mxu0 %vm7632_vm0, %v86_v6  ;;  %v135_v6 = vld [vmem:[%s7613_s0 + $0x328] sm:$0xff] }
  0x73   :  { %4452 = vmatmul.mubr.msk.f32.gmra.mxu0 %vm7632_vm0, %v87_v7 }
  0x74   :  { %4454 = vmatprep.mubr.msk.f32.mxu0 %vm7632_vm0, %v88_v8 }
  0x77   :  { %4455 = vmatmul.mubr.msk.f32.gmra.mxu0 %vm7632_vm0, %v89_v9  ;;  %v136_v9 = vld [vmem:[%s7613_s0 + $0x330] sm:$0xff] }
  0x78   :  { %4457 = vmatprep.mubr.msk.f32.mxu0 %vm7632_vm0, %v90_v10  ;;  %v5019_v10 = vmov 1966171168  }
  0x7b   :  { %4458 = vmatmul.mubr.msk.f32.gmra.mxu0 %vm7632_vm0, %v91_v12  ;;  %v1479_v12 = vunpack.c.l.s4 %v5019_v10 }
  0x7c   :  { %4460 = vmatprep.mubr.msk.f32.mxu0 %vm7632_vm0, %v92_v13  ;;  %v1481_v13 = vlaneseq }
  0x7f   :  { %4461 = vmatmul.mubr.msk.f32.gmra.mxu0 %vm7632_vm0, %v93_v15 }
  0x80   :  { %4463 = vmatprep.mubr.msk.f32.mxu0 %vm7632_vm0, %v94_v16 }
  0x83   :  { %4464 = vmatmul.mubr.msk.f32.gmra.mxu0 %vm7632_vm0, %v95_v19  ;;  %v137_v19 = vld [vmem:[%s7613_s0 + $0x338] sm:$0xff] }
  0x84   :  { %4466 = vmatprep.mubr.msk.f32.mxu0 %vm7632_vm0, %v96_v20 }
  0x87   :  { %4467 = vmatmul.mubr.msk.f32.gmra.mxu0 %vm7632_vm0, %v97_v23 }
  0x88   :  { %4469 = vmatprep.mubr.msk.f32.mxu0 %vm7632_vm0, %v98_v24  ;;  %v138_v24 = vld [vmem:[%s7613_s0 + $0x340] sm:$0xff] }
  0x8b   :  { %4470 = vmatmul.mubr.msk.f32.gmra.mxu0 %vm7632_vm0, %v99_v27  ;;  %v1480_v27 = vunpack.c.0.s8 %v1479_v12 }
  0x8c   :  { %4472 = vmatprep.mubr.msk.f32.mxu0 %vm7632_vm0, %v100_v28  ;;  %v5704_v28 = vshrl.u32 %v1481_v13, 7 }
  0x8f   :  { %4473 = vmatmul.mubr.msk.f32.gmra.mxu0 %vm7632_vm0, %v101_v30 }
  0x90   :  { %4475 = vmatprep.mubr.msk.f32.mxu0 %vm7632_vm0, %v102_v31 }
  0x93   :  { %4476 = vmatmul.mubr.msk.f32.gmra.mxu0 %vm7632_vm0, %v103_v32  ;;  %v139_v32 = vld [vmem:[%s7613_s0 + $0x348] sm:$0xff] }
  0x94   :  { %4478 = vmatprep.mubr.msk.f32.mxu0 %vm7632_vm0, %v104_v33 }
  0x97   :  { %4479 = vmatmul.mubr.msk.f32.gmra.mxu0 %vm7632_vm0, %v105_v34 }
  0x98   :  { %4481 = vmatprep.mubr.msk.f32.mxu0 %vm7632_vm0, %v106_v35  ;;  %v4089_v35 = vld [vmem:[%s7618_s5] ss:$0 sm:$0xff] }
  0x9b   :  { %4482 = vmatmul.mubr.msk.f32.gmra.mxu0 %vm7632_vm0, %v107_v36  ;;  %v140_v36 = vld [vmem:[%s7613_s0 + $0x350] sm:$0xff] }
  0x9c   :  { %4484 = vmatprep.mubr.msk.f32.mxu0 %vm7632_vm0, %v108_v37  ;;  %v5726_v37 = vsub.s32 %v1480_v27, %v5704_v28 }
  0x9e   :  { %7638 = vst [vmem:[#allocation11_spill] sm:$0xff] %v5726_v37 }
  0x9f   :  { %4485 = vmatmul.mubr.msk.f32.gmra.mxu0 %vm7632_vm0, %v109_v38 }
  0xa0   :  { %4487 = vmatprep.mubr.msk.f32.mxu0 %vm7632_vm0, %v110_v39 }
  0xa3   :  { %4488 = vmatmul.mubr.msk.f32.gmra.mxu0 %vm7632_vm0, %v111_v40 }
  0xa4   :  { %4490 = vmatprep.mubr.msk.f32.mxu0 %vm7632_vm0, %v112_v41  ;;  %v141_v41 = vld [vmem:[%s7613_s0 + $0x358] sm:$0xff] }
  0xa7   :  { %4491 = vmatmul.mubr.msk.f32.gmra.mxu0 %vm7632_vm0, %v113_v42 }
  0xa8   :  { %4493 = vmatprep.mubr.msk.f32.mxu0 %vm7632_vm0, %v114_v43 }
  0xab   :  { %4494 = vmatmul.mubr.msk.f32.gmra.mxu0 %vm7632_vm0, %v115_v44  ;;  %v142_v44 = vld [vmem:[%s7613_s0 + $0x360] sm:$0xff] }
  0xac   :  { %4496 = vmatprep.mubr.msk.f32.mxu0 %vm7632_vm0, %v116_v45 }
  0xaf   :  { %4497 = vmatmul.mubr.msk.f32.gmra.mxu0 %vm7632_vm0, %v117_v46 }
  0xb0   :  { %4499 = vmatprep.mubr.msk.f32.mxu0 %vm7632_vm0, %v118_v47 }
  0xb3   :  { %4500 = vmatmul.mubr.msk.f32.gmra.mxu0 %vm7632_vm0, %v119_v48 }
  0xb4   :  { %4502 = vmatprep.mubr.msk.f32.mxu0 %vm7632_vm0, %v120_v49 }
  0xb7   :  { %4503 = vmatmul.mubr.msk.f32.gmra.mxu0 %vm7632_vm0, %v121_v50  ;;  %v5746_v50 = vsub.s32 0, %v5704_v28 }
  0xb8   :  { %4505 = vmatprep.mubr.msk.f32.mxu0 %vm7632_vm0, %v122_v51  ;;  %v143_v51 = vld [vmem:[%s7613_s0 + $0x368] sm:$0xff] }
  0xbb   :  { %4506 = vmatmul.mubr.msk.f32.gmra.mxu0 %vm7632_vm0, %v123_v52 }
  0xbc   :  { %4508 = vmatprep.mubr.msk.f32.mxu0 %vm7632_vm0, %v124_v53  ;;  %v144_v53 = vld [vmem:[%s7613_s0 + $0x370] sm:$0xff] }
  0xbf   :  { %4509 = vmatmul.mubr.msk.f32.gmra.mxu0 %vm7632_vm0, %v125_v54 }
  0xc0   :  { %4511 = vmatprep.mubr.msk.f32.mxu0 %vm7632_vm0, %v126_v55 }
  0xc3   :  { %4512 = vmatmul.mubr.msk.f32.gmra.mxu0 %vm7632_vm0, %v127_v56 }
  0xc4   :  { %4514 = vmatprep.mubr.msk.f32.mxu0 %vm7632_vm0, %v128_v57 }
  0xc7   :  { %4515 = vmatmul.mubr.msk.f32.gmra.mxu0 %vm7632_vm0, %v129_v58  ;;  %v5762_v58 = vld [vmem:[%s7616_s3] ss:$0 sm:$0xff] }
  0xc8   :  { %4517 = vmatprep.mubr.msk.f32.mxu0 %vm7632_vm0, %v130_v59 }
  0xcb   :  { %v5659_v62 = vpop.f32.mrf.mxu0  ;;  %4518 = vmatmul.mubr.msk.f32.gmra.mxu0 %vm7632_vm0, %v131_v60  ;;  %v5662_v63 = vpop.f32.mrf.mxu1 }
  0xcc   :  { %4520 = vmatprep.mubr.msk.f32.mxu0 %vm7632_vm0, %v132_v61  ;;  %v1264_v27 = vadd.f32 %v5659_v62, %v5762_v58 }
  0xcd   :  { %v5668_v1 = vpop.f32.mrf.mxu0  ;;  %v5670_v2 = vpop.f32.mrf.mxu1 }
  0xce   :  { %v1263_v12 = vadd.f32 %v5762_v58, %v5668_v1 }
  0xcf   :  { %v5675_v4 = vpop.f32.mrf.mxu0  ;;  %4521 = vmatmul.mubr.msk.f32.gmra.mxu0 %vm7632_vm0, %v133_v0  ;;  %v5678_v5 = vpop.f32.mrf.mxu1  ;;  %v145_v0 = vld [vmem:[%s7613_s0 + $0x378] sm:$0xff] }
  0xd0   :  { %4523 = vmatprep.mubr.msk.f32.mxu0 %vm7632_vm0, %v134_v3 }
  0xd1   :  { %v5684_v7 = vpop.f32.mrf.mxu0  ;;  %v5686_v8 = vpop.f32.mrf.mxu1 }
  0xd3   :  { %v4381_v15 = vpop.f32.mrf.mxu0  ;;  %4524 = vmatmul.mubr.msk.f32.gmra.mxu0 %vm7632_vm0, %v135_v6  ;;  %v5692_v16 = vpop.f32.mrf.mxu1 }
  0xd4   :  { %4526 = vmatprep.mubr.msk.f32.mxu0 %vm7632_vm0, %v136_v9 }
  0xd5   :  { %v637_v20 = vpop.f32.mrf.mxu0  ;;  %v5698_v23 = vpop.f32.mrf.mxu1 }
  0xd6   :  { %v1267_v3 = vadd.f32 %v5762_v58, %v637_v20 }
  0xd7   :  { %v5706_v30 = vpop.f32.mrf.mxu0  ;;  %4527 = vmatmul.mubr.msk.f32.gmra.mxu0 %vm7632_vm0, %v137_v19  ;;  %v5709_v31 = vpop.f32.mrf.mxu1 }
  0xd8   :  { %7636 = vst [vmem:[#allocation9_spill] sm:$0xff] %v5709_v31  ;;  %4529 = vmatprep.mubr.msk.f32.mxu0 %vm7632_vm0, %v138_v24 }
  0xd9   :  { %v5715_v33 = vpop.f32.mrf.mxu0  ;;  %v5717_v34 = vpop.f32.mrf.mxu1 }
  0xda   :  { %7637 = vst [vmem:[#allocation10_spill] sm:$0xff] %v5717_v34 }
  0xdb   :  { %v4387_v38 = vpop.f32.mrf.mxu0  ;;  %4530 = vmatmul.mubr.msk.f32.gmra.mxu0 %vm7632_vm0, %v139_v32  ;;  %v1472_v39 = vpop.f32.mrf.mxu1  ;;  %v1268_v32 = vadd.f32 %v4381_v15, %v5762_v58 }
  0xdc   :  { %v1473_v40 = vadd.f32 %v4089_v35, %v1472_v39  ;;  %4532 = vmatprep.mubr.msk.f32.mxu0 %vm7632_vm0, %v140_v36  ;;  %v5807_v39 = vld [vmem:[%s7619_s6] ss:$0 sm:$0xff] }
  0xdd   :  { %v657_v42 = vpop.f32.mrf.mxu0  ;;  %v4575_v43 = vpop.f32.mrf.mxu1 }
  0xde   :  { %v1477_v45 = vcombine.high %v1473_v40, %v1473_v40  ;;  %v5737_v46 = vrot.slane %v1473_v40, %v5726_v37  ;;  %v1271_v20 = vadd.f32 %v5762_v58, %v657_v42 }
  0xdf   :  { %v5739_v47 = vpop.f32.mrf.mxu0  ;;  %4533 = vmatmul.mubr.msk.f32.gmra.mxu0 %vm7632_vm0, %v141_v41 }
  0xe0   :  { %v1491_v48 = vrot.slane %v1477_v45, %v5726_v37  ;;  %v1500_v49 = vrot.slane %v5737_v46, %v5726_v37  ;;  %4535 = vmatprep.mubr.msk.f32.mxu0 %vm7632_vm0, %v142_v44  ;;  %v1265_v45 = vadd.f32 %v5762_v58, %v5684_v7 }
  0xe1   :  { %v667_v52 = vpop.f32.mrf.mxu0 }
  0xe2   :  { %v1493_v54 = vcombine.high %v1491_v48, %v1491_v48  ;;  %v1507_v55 = vrot.slane %v1491_v48, %v5726_v37  ;;  %v1522_v56 = vcombine.high %v1500_v49, %v1500_v49  ;;  %v5768_v61 = vrot.slane %v1500_v49, %v5746_v50 }
  0xe3   :  { %v5756_v57 = vpop.f32.mrf.mxu0  ;;  %4536 = vmatmul.mubr.msk.f32.gmra.mxu0 %vm7632_vm0, %v143_v51  ;;  %v1272_v49 = vadd.f32 %v4387_v38, %v5762_v58  ;;  %v1273_v51 = vadd.f32 %v5762_v58, %v667_v52 }
  0xe4   :  { %v5765_v59 = vrot.slane %v1493_v54, %v5726_v37  ;;  %v1523_v60 = vcombine.high %v1507_v55, %v1507_v55  ;;  %4538 = vmatprep.mubr.msk.f32.mxu0 %vm7632_vm0, %v144_v53  ;;  %v5776_v6 = vrot.slane %v1522_v56, %v5746_v50  ;;  %v5779_v9 = vrot.slane %v1507_v55, %v5746_v50 }
  0xe5   :  { %v5781_v10 = vpop.f32.mrf.mxu0  ;;  %v1566_v1 = vadd.f32 %v5768_v61, %v1263_v12  ;;  %v1570_v62 = vadd.f32 %v5768_v61, %v1267_v3  ;;  %v1567_v15 = vadd.f32 %v5768_v61, %v1264_v27  ;;  %v1574_v40 = vadd.f32 %v5768_v61, %v1271_v20 }
  0xe6   :  { %v5787_v19 = vrot.slane %v5765_v59, %v5746_v50  ;;  %v5790_v24 = vrot.slane %v1523_v60, %v5746_v50  ;;  %v1571_v44 = vadd.f32 %v5768_v61, %v1268_v32  ;;  %v1568_v7 = vadd.f32 %v5768_v61, %v1265_v45 }
  0xe7   :  { %v5796_v35 = vpop.f32.mrf.mxu0  ;;  %4539 = vmatmul.mubr.msk.f32.gmra.mxu0 %vm7632_vm0, %v145_v0  ;;  %v1694_v41 = vmax.f32 %v1566_v1, 0.0  ;;  %v1695_v43 = vmax.f32 %v1567_v15, 0.0  ;;  %v1702_v55 = vmax.f32 %v1574_v40, 0.0  ;;  %v1266_v0 = vadd.f32 %v5675_v4, %v5762_v58 }
  0xe8   :  { %4541 = vmatprep.mubr.msk.f32.mxu0 %vm7632_vm0, %v5527_v29  ;;  %v1698_v29 = vmax.f32 %v1570_v62, 0.0  ;;  %v1699_v54 = vmax.f32 %v1571_v44, 0.0  ;;  %v1270_v12 = vadd.f32 %v5706_v30, %v5762_v58  ;;  %v1696_v4 = vmax.f32 %v1568_v7, 0.0 }
  0xe9   :  { %v5802_v36 = vpop.f32.mrf.mxu0  ;;  %v1829_v48 = vmul.f32 %v5807_v39, %v1694_v41  ;;  %v1830_v60 = vmul.f32 %v5807_v39, %v1695_v43  ;;  %v1274_v20 = vadd.f32 %v5739_v47, %v5762_v58  ;;  %v1575_v32 = vadd.f32 %v5768_v61, %v1272_v49 }
  0xea   :  { %v1834_v52 = vmul.f32 %v5807_v39, %v1699_v54  ;;  %v1576_v1 = vadd.f32 %v5768_v61, %v1273_v51  ;;  %v1831_v62 = vmul.f32 %v5807_v39, %v1696_v4  ;;  %v1573_v49 = vadd.f32 %v5768_v61, %v1270_v12 }
  0xeb   :  { %4542 = vmatmul.mubr.msk.f32.gmra.mxu0 %vm7632_vm0, %v5513_v26  ;;  %v5814_v42 = vpop.f32.mrf.mxu0  ;;  %v1833_v26 = vmul.f32 %v5807_v39, %v1698_v29  ;;  %v1957_v56 = vsel %vm7632_vm0, %v1829_v48, 0.0  ;;  %v1960_v30 = vsel %vm7632_vm0, %v1830_v60, 0.0  ;;  %v1703_v40 = vmax.f32 %v1575_v32, 0.0 }
  0xec   :  { %4544 = vmatprep.mubr.msk.f32.mxu0 %vm7632_vm0, %v5505_v25  ;;  %v1269_v25 = vadd.f32 %v5762_v58, %v5715_v33  ;;  %1958 = vadd.xlane.f32.xlu0 %v1957_v56  ;;  %v1525_v33 = vcombine.high %v5765_v59, %v5765_v59  ;;  %v1972_v59 = vsel %vm7632_vm0, %v1834_v52, 0.0  ;;  %v1577_v43 = vadd.f32 %v5768_v61, %v1274_v20 }
  0xed   :  { %v5825_v53 = vpop.f32.mrf.mxu0  ;;  %v1969_v38 = vsel %vm7632_vm0, %v1833_v26, 0.0  ;;  %v1963_v45 = vsel %vm7632_vm0, %v1831_v62, 0.0  ;;  %v1704_v51 = vmax.f32 %v1576_v1, 0.0  ;;  %v1276_v26 = vadd.f32 %v5756_v57, %v5762_v58 }
  0xee   :  { %1970 = vadd.xlane.f32.xlu1 %v1969_v38  ;;  %v1572_v41 = vadd.f32 %v5768_v61, %v1269_v25  ;;  %v5863_v29 = vrot.slane %v1525_v33, %v5746_v50  ;;  %v1838_v54 = vmul.f32 %v5807_v39, %v1703_v40  ;;  %v1383_v56 = vadd.f32 %v5762_v58, %v5670_v2 }
  0xef   :  { %4545 = vmatmul.mubr.msk.f32.gmra.mxu0 %vm7632_vm0, %v5491_v22  ;;  %v5838_v3 = vpop.f32.mrf.mxu0  ;;  %v1569_v22 = vadd.f32 %v5768_v61, %v1266_v0  ;;  %v1705_v60 = vmax.f32 %v1577_v43, 0.0  ;;  %v1701_v25 = vmax.f32 %v1573_v49, 0.0  ;;  %v1579_v38 = vadd.f32 %v5768_v61, %v1276_v26 }
  0xf0   :  { %4547 = vmatprep.mubr.msk.f32.mxu0 %vm7632_vm0, %v5483_v21  ;;  %v1837_v21 = vmul.f32 %v5807_v39, %v1702_v55  ;;  %1961 = vadd.xlane.f32.xlu0 %v1960_v30  ;;  %v1275_v52 = vadd.f32 %v5762_v58, %v5781_v10  ;;  %v1984_v2 = vsel %vm7632_vm0, %v1838_v54, 0.0  ;;  %v1839_v12 = vmul.f32 %v5807_v39, %v1704_v51 }
  0xf1   :  { %v5848_v27 = vpop.f32.mrf.mxu0  ;;  %v1697_v15 = vmax.f32 %v1569_v22, 0.0  ;;  %v1384_v33 = vadd.f32 %v5662_v63, %v5762_v58  ;;  %v1492_v20 = vcombine.high %v5737_v46, %v5737_v46  ;;  %v1278_v22 = vadd.f32 %v5796_v35, %v5762_v58 }
  0xf2   :  { %1973 = vadd.xlane.f32.xlu1 %v1972_v59  ;;  %v1836_v10 = vmul.f32 %v5807_v39, %v1701_v25  ;;  %v1578_v59 = vadd.f32 %v5768_v61, %v1275_v52  ;;  %v1987_v63 = vsel %vm7632_vm0, %v1839_v12, 0.0  ;;  %v1840_v46 = vmul.f32 %v5807_v39, %v1705_v60 }
  0xf3   :  { %4548 = vmatmul.mubr.msk.f32.gmra.mxu0 %vm7632_vm0, %v5469_v18  ;;  %v4405_v47 = vpop.f32.mrf.mxu0  ;;  %v1832_v48 = vmul.f32 %v5807_v39, %v1697_v15  ;;  %v1700_v18 = vmax.f32 %v1572_v41, 0.0  ;;  %v1687_v62 = vadd.f32 %v5863_v29, %v1384_v33  ;;  %v1385_v35 = vadd.f32 %v5762_v58, %v5686_v8 }
  0xf4   :  { %4550 = vmatprep.mubr.msk.f32.mxu0 %vm7632_vm0, %v5461_v17  ;;  %1964 = vadd.xlane.f32.xlu0 %v1963_v45  ;;  %v1981_v17 = vsel %vm7632_vm0, %v1837_v21, 0.0  ;;  %v1707_v21 = vmax.f32 %v1579_v38, 0.0  ;;  %v5906_v40 = vrot.slane %v1492_v20, %v5726_v37  ;;  %v1284_v41 = vadd.f32 %v4405_v47, %v5762_v58 }
  0xf5   :  { %v717_v44 = vpop.f32.mrf.mxu0  ;;  %v1966_v57 = vsel %vm7632_vm0, %v1832_v48, 0.0  ;;  %v1835_v0 = vmul.f32 %v5807_v39, %v1700_v18  ;;  %v1978_v45 = vsel %vm7632_vm0, %v1836_v10, 0.0  ;;  %v1815_v18 = vmax.f32 %v1687_v62, 0.0 }
  0xf6   :  { %1982 = vadd.xlane.f32.xlu1 %v1981_v17  ;;  %v1688_v49 = vadd.f32 %v5863_v29, %v1385_v35  ;;  %v1706_v51 = vmax.f32 %v1578_v59, 0.0  ;;  %v1581_v26 = vadd.f32 %v5768_v61, %v1278_v22  ;;  %v1990_v8 = vsel %vm7632_vm0, %v1840_v46, 0.0 }
  0xf7   :  { %4551 = vmatmul.mubr.msk.f32.gmra.mxu0 %vm7632_vm0, %v5448_v14  ;;  %v5875_v55 = vpop.f32.mrf.mxu0  ;;  %v1686_v14 = vadd.f32 %v5863_v29, %v1383_v56  ;;  %v1975_v1 = vsel %vm7632_vm0, %v1835_v0, 0.0  ;;  %v1842_v17 = vmul.f32 %v5807_v39, %v1707_v21  ;;  %v5921_v47 = vrot.slane %v5906_v40, %v5746_v50 }
  0xf8   :  { %4853 = vmatprep.mubr.msk.f32.mxu0 %vm7628_vm1, %v7623_v11  ;;  %1967 = vadd.xlane.f32.xlu0 %v1966_v57  ;;  %v1386_v56 = vadd.f32 %v5678_v5, %v5762_v58  ;;  %v1277_v60 = vadd.f32 %v5762_v58, %v5802_v36  ;;  %v1283_v57 = vadd.f32 %v5762_v58, %v717_v44  ;;  %v1816_v52 = vmax.f32 %v1688_v49, 0.0 }
  0xf9   :  { %v5881_v7 = vpop.f32.mrf.mxu0  ;;  %v1814_v30 = vmax.f32 %v1686_v14, 0.0  ;;  %v1587_v25 = vadd.f32 %v5921_v47, %v1284_v41  ;;  %v1950_v38 = vmul.f32 %v5807_v39, %v1815_v18  ;;  %v1996_v12 = vsel %vm7632_vm0, %v1842_v17, 0.0 }
  0xfa   :  { %1985 = vadd.xlane.f32.xlu1 %v1984_v2  ;;  %v1709_v2 = vmax.f32 %v1581_v26, 0.0  ;;  %v1841_v5 = vmul.f32 %v5807_v39, %v1706_v51  ;;  %v1689_v36 = vadd.f32 %v5863_v29, %v1386_v56  ;;  %v1580_v44 = vadd.f32 %v5768_v61, %v1277_v60 }
  0xfb   :  { %v4411_v4 = vpop.f32.mrf.mxu0  ;;  %v1949_v48 = vmul.f32 %v5807_v39, %v1814_v30  ;;  %v1586_v20 = vadd.f32 %v5921_v47, %v1283_v57  ;;  %v2320_v30 = vsel %vm7632_vm0, %v1950_v38, 0.0  ;;  %v1951_v62 = vmul.f32 %v5807_v39, %v1816_v52 }
  0xfc   :  { %1976 = vadd.xlane.f32.xlu0 %v1975_v1  ;;  %v1715_v1 = vmax.f32 %v1587_v25, 0.0  ;;  %v1288_v10 = vadd.f32 %v4411_v4, %v5762_v58  ;;  %v1280_v21 = vadd.f32 %v5814_v42, %v5762_v58  ;;  %v1993_v59 = vsel %vm7632_vm0, %v1841_v5, 0.0 }
  0xfd   :  { %v737_v32 = vpop.f32.mrf.mxu0  ;;  %v2317_v14 = vsel %vm7632_vm0, %v1949_v48, 0.0  ;;  %v1817_v46 = vmax.f32 %v1689_v36, 0.0  ;;  %v1279_v35 = vadd.f32 %v5762_v58, %v5825_v53  ;;  %v1714_v4 = vmax.f32 %v1586_v20, 0.0 }
  0xfe   :  { %1988 = vadd.xlane.f32.xlu1 %v1987_v63  ;;  %v1844_v63 = vmul.f32 %v5807_v39, %v1709_v2  ;;  %v1287_v48 = vadd.f32 %v5762_v58, %v737_v32  ;;  %v2323_v42 = vsel %vm7632_vm0, %v1951_v62, 0.0  ;;  %v1850_v18 = vmul.f32 %v5807_v39, %v1715_v1 }
  0xff   :  { %v4414_v15 = vpop.f32.mrf.mxu0  ;;  %v1708_v49 = vmax.f32 %v1580_v44, 0.0  ;;  %v1583_v51 = vadd.f32 %v5921_v47, %v1280_v21  ;;  %v1582_v17 = vadd.f32 %v5921_v47, %v1279_v35  ;;  %v1282_v52 = vadd.f32 %v5838_v3, %v5762_v58 }
 0x100   :  { %1979 = vadd.xlane.f32.xlu0 %v1978_v45  ;;  %v1591_v45 = vadd.f32 %v5921_v47, %v1288_v10  ;;  %v2002_v26 = vsel %vm7632_vm0, %v1844_v63, 0.0  ;;  %v1290_v56 = vadd.f32 %v4414_v15, %v5762_v58  ;;  %v1590_v57 = vadd.f32 %v5921_v47, %v1287_v48 }
 0x101   :  { %v5909_v43 = vpop.f32.mrf.mxu0  ;;  %v2020_v25 = vsel %vm7632_vm0, %v1850_v18, 0.0  ;;  %v1711_v38 = vmax.f32 %v1583_v51, 0.0  ;;  %v1710_v15 = vmax.f32 %v1582_v17, 0.0  ;;  %v1281_v62 = vadd.f32 %v5762_v58, %v5848_v27 }
 0x102   :  { %1991 = vadd.xlane.f32.xlu1 %v1990_v8  ;;  %v1952_v8 = vmul.f32 %v5807_v39, %v1817_v46  ;;  %v1719_v60 = vmax.f32 %v1591_v45, 0.0  ;;  %v1593_v36 = vadd.f32 %v5921_v47, %v1290_v56  ;;  %v1718_v20 = vmax.f32 %v1590_v57, 0.0 }
 0x103   :  { %v5917_v54 = vpop.f32.mrf.mxu0  ;;  %v1289_v1 = vadd.f32 %v5762_v58, %v5909_v43  ;;  %v1286_v43 = vadd.f32 %v5875_v55, %v5762_v58  ;;  %v1584_v18 = vadd.f32 %v5921_v47, %v1281_v62  ;;  %v1845_v55 = vmul.f32 %v5807_v39, %v1710_v15 }
 0x104   :  { %2318 = vadd.xlane.f32.xlu0 %v2317_v14  ;;  %v1849_v14 = vmul.f32 %v5807_v39, %v1714_v4  ;;  %v2326_v2 = vsel %vm7632_vm0, %v1952_v8, 0.0  ;;  %v1854_v3 = vmul.f32 %v5807_v39, %v1719_v60  ;;  %v1721_v46 = vmax.f32 %v1593_v36, 0.0 }
 0x105   :  { %v5928_v0 = vpop.f32.mrf.mxu0  ;;  %v1592_v4 = vadd.f32 %v5921_v47, %v1289_v1  ;;  %v1292_v45 = vadd.f32 %v5917_v54, %v5762_v58  ;;  %v1853_v48 = vmul.f32 %v5807_v39, %v1718_v20  ;;  %vm2709_vm1 = vcmask 1048512  }
 0x106   :  { %1997 = vadd.xlane.f32.xlu1 %v1996_v12  ;;  %v1843_v12 = vmul.f32 %v5807_v39, %v1708_v49  ;;  %v2017_v10 = vsel %vm7632_vm0, %v1849_v14, 0.0  ;;  %v2032_v27 = vsel %vm7632_vm0, %v1854_v3, 0.0  ;;  %v1291_v54 = vadd.f32 %v5762_v58, %v5928_v0 }
 0x107   :  { %v5935_v33 = vpop.f32.mrf.mxu0  ;;  %v1720_v17 = vmax.f32 %v1592_v4, 0.0  ;;  %v1595_v56 = vadd.f32 %v5921_v47, %v1292_v45  ;;  %v2029_v60 = vsel %vm7632_vm0, %v1853_v48, 0.0  ;;  %v1856_v57 = vmul.f32 %v5807_v39, %v1721_v46 }
 0x108   :  { %2321 = vadd.xlane.f32.xlu0 %v2320_v30  ;;  %v1585_v30 = vadd.f32 %v5921_v47, %v1282_v52  ;;  %v1999_v21 = vsel %vm7632_vm0, %v1843_v12, 0.0  ;;  %v1285_v14 = vadd.f32 %v5762_v58, %v5881_v7  ;;  %v1594_v12 = vadd.f32 %v5921_v47, %v1291_v54 }
 0x109   :  { %v5940_v22 = vpop.f32.mrf.mxu0  ;;  %v1723_v36 = vmax.f32 %v1595_v56, 0.0  ;;  %v1294_v20 = vadd.f32 %v5935_v33, %v5762_v58  ;;  %v2038_v1 = vsel %vm7632_vm0, %v1856_v57, 0.0  ;;  %v1855_v7 = vmul.f32 %v5807_v39, %v1720_v17 }
 0x10a   :  { %1994 = vadd.xlane.f32.xlu1 %v1993_v59  ;;  %v1846_v59 = vmul.f32 %v5807_v39, %v1711_v38  ;;  %v2005_v38 = vsel %vm7632_vm0, %v1845_v55, 0.0  ;;  %v1293_v33 = vadd.f32 %v5762_v58, %v5940_v22 }
 0x10b   :  { %v5949_v61 = vpop.f32.mrf.mxu0  ;;  %v1597_v46 = vadd.f32 %v5921_v47, %v1294_v20  ;;  %v2035_v4 = vsel %vm7632_vm0, %v1855_v7, 0.0  ;;  %v1858_v45 = vmul.f32 %v5807_v39, %v1723_v36 }
 0x10c   :  { %2324 = vadd.xlane.f32.xlu0 %v2323_v42  ;;  %v1713_v42 = vmax.f32 %v1585_v30, 0.0  ;;  %v2008_v49 = vsel %vm7632_vm0, %v1846_v59, 0.0  ;;  %v1296_v3 = vadd.f32 %v5949_v61, %v5762_v58  ;;  %v1722_v59 = vmax.f32 %v1594_v12, 0.0 }
 0x10d   :  { %v5953_v41 = vpop.f32.mrf.mxu0  ;;  %v1725_v54 = vmax.f32 %v1597_v46, 0.0  ;;  %v2044_v56 = vsel %vm7632_vm0, %v1858_v45, 0.0 }
 0x10e   :  { %2003 = vadd.xlane.f32.xlu1 %v2002_v26  ;;  %v1589_v26 = vadd.f32 %v5921_v47, %v1286_v43  ;;  %v1848_v52 = vmul.f32 %v5807_v39, %v1713_v42  ;;  %v1599_v48 = vadd.f32 %v5776_v6, %v1296_v3  ;;  %v1295_v55 = vadd.f32 %v5762_v58, %v5953_v41 }
 0x10f   :  { %v5962_v53 = vpop.f32.mrf.mxu0 }
 0x110   :  { %2021 = vadd.xlane.f32.xlu0 %v2020_v25  ;;  %v1712_v25 = vmax.f32 %v1584_v18, 0.0  ;;  %v1717_v0 = vmax.f32 %v1589_v26, 0.0  ;;  %v2014_v30 = vsel %vm7632_vm0, %v1848_v52, 0.0  ;;  %v1298_v42 = vadd.f32 %v5962_v53, %v5762_v58 }
 0x111   :  { %v5966_v32 = vpop.f32.mrf.mxu0  ;;  %v1857_v53 = vmul.f32 %v5807_v39, %v1722_v59 }
 0x112   :  { %2327 = vadd.xlane.f32.xlu1 %v2326_v2  ;;  %v1847_v62 = vmul.f32 %v5807_v39, %v1712_v25  ;;  %v1852_v61 = vmul.f32 %v5807_v39, %v1717_v0  ;;  %v1601_v57 = vadd.f32 %v5776_v6, %v1298_v42  ;;  %v1297_v0 = vadd.f32 %v5762_v58, %v5966_v32 }
 0x113   :  { %v5975_v5 = vpop.f32.mrf.mxu0  ;;  %v2041_v36 = vsel %vm7632_vm0, %v1857_v53, 0.0 }
 0x114   :  { %2018 = vadd.xlane.f32.xlu0 %v2017_v10  ;;  %v1588_v10 = vadd.f32 %v5921_v47, %v1285_v14  ;;  %v2011_v18 = vsel %vm7632_vm0, %v1847_v62, 0.0  ;;  %v2026_v17 = vsel %vm7632_vm0, %v1852_v61, 0.0  ;;  %v1729_v20 = vmax.f32 %v1601_v57, 0.0 }
 0x115   :  { %v5978_v44 = vpop.f32.mrf.mxu0  ;;  %v1300_v32 = vadd.f32 %v5975_v5, %v5762_v58 }
 0x116   :  { %2000 = vadd.xlane.f32.xlu1 %v1999_v21  ;;  %v1299_v25 = vadd.f32 %v5762_v58, %v5978_v44  ;;  %v1860_v44 = vmul.f32 %v5807_v39, %v1725_v54 }
 0x117   :  { %v5989_v63 = vpop.f32.mrf.mxu0  ;;  %v1603_v5 = vadd.f32 %v5776_v6, %v1300_v32 }
 0x118   :  { %2033 = vadd.xlane.f32.xlu0 %v2032_v27  ;;  %v1716_v27 = vmax.f32 %v1588_v10, 0.0  ;;  %v1302_v12 = vadd.f32 %v5989_v63, %v5762_v58  ;;  %v1600_v63 = vadd.f32 %v5776_v6, %v1297_v0 }
 0x119   :  { %v5993_v35 = vpop.f32.mrf.mxu0 }
 0x11a   :  { %2009 = vadd.xlane.f32.xlu1 %v2008_v49  ;;  %v1596_v49 = vadd.f32 %v5921_v47, %v1293_v33  ;;  %v1851_v47 = vmul.f32 %v5807_v39, %v1716_v27  ;;  %v1605_v59 = vadd.f32 %v5776_v6, %v1302_v12  ;;  %v2050_v33 = vsel %vm7632_vm0, %v1860_v44, 0.0 }
 0x11b   :  { %v6003_v51 = vpop.f32.mrf.mxu0  ;;  %v1864_v27 = vmul.f32 %v5807_v39, %v1729_v20  ;;  %v1301_v54 = vadd.f32 %v5762_v58, %v5993_v35 }
 0x11c   :  { %2030 = vadd.xlane.f32.xlu0 %v2029_v60  ;;  %v1727_v60 = vmax.f32 %v1599_v48, 0.0  ;;  %v1724_v41 = vmax.f32 %v1596_v49, 0.0  ;;  %v2023_v7 = vsel %vm7632_vm0, %v1851_v47, 0.0  ;;  %v1304_v61 = vadd.f32 %v6003_v51, %v5762_v58 }
 0x11d   :  { %v6008_v8 = vpop.f32.mrf.mxu0  ;;  %v1728_v49 = vmax.f32 %v1600_v63, 0.0  ;;  %v2062_v53 = vsel %vm7632_vm0, %v1864_v27, 0.0  ;;  %v1731_v47 = vmax.f32 %v1603_v5, 0.0 }
 0x11e   :  { %2006 = vadd.xlane.f32.xlu1 %v2005_v38  ;;  %v1598_v38 = vadd.f32 %v5776_v6, %v1295_v55  ;;  %v1862_v10 = vmul.f32 %v5807_v39, %v1727_v60  ;;  %v1859_v46 = vmul.f32 %v5807_v39, %v1724_v41  ;;  %v1733_v55 = vmax.f32 %v1605_v59, 0.0 }
 0x11f   :  { %v6017_v2 = vpop.f32.mrf.mxu0 }
 0x120   :  { %2039 = vadd.xlane.f32.xlu0 %v2038_v1  ;;  %v1602_v1 = vadd.f32 %v5776_v6, %v1299_v25  ;;  %v2056_v45 = vsel %vm7632_vm0, %v1862_v10, 0.0  ;;  %v2047_v51 = vsel %vm7632_vm0, %v1859_v46, 0.0  ;;  %v1524_v25 = vcombine.high %v5906_v40, %v5906_v40 }
 0x121   :  { %v6020_v15 = vpop.f32.mrf.mxu0  ;;  %v1868_v12 = vmul.f32 %v5807_v39, %v1733_v55  ;;  %v1306_v20 = vadd.f32 %v6017_v2, %v5762_v58 }
 0x122   :  { %2015 = vadd.xlane.f32.xlu1 %v2014_v30  ;;  %v1726_v30 = vmax.f32 %v1598_v38, 0.0  ;;  %v1604_v38 = vadd.f32 %v5776_v6, %v1301_v54 }
 0x123   :  { %v6031_v21 = vpop.f32.mrf.mxu0  ;;  %v2074_v59 = vsel %vm7632_vm0, %v1868_v12, 0.0  ;;  %v1609_v46 = vadd.f32 %v5776_v6, %v1306_v20 }
 0x124   :  { %2036 = vadd.xlane.f32.xlu0 %v2035_v4  ;;  %v1730_v4 = vmax.f32 %v1602_v1, 0.0  ;;  %v1732_v32 = vmax.f32 %v1604_v38, 0.0 }
 0x125   :  { %v6035_v43 = vpop.f32.mrf.mxu0  ;;  %v1737_v55 = vmax.f32 %v1609_v46, 0.0 }
 0x126   :  { %2012 = vadd.xlane.f32.xlu1 %v2011_v18  ;;  %v1861_v18 = vmul.f32 %v5807_v39, %v1726_v30  ;;  %v1865_v60 = vmul.f32 %v5807_v39, %v1730_v4  ;;  %v1866_v30 = vmul.f32 %v5807_v39, %v1731_v47 }
 0x127   :  { %v6045_v22 = vpop.f32.mrf.mxu0  ;;  %v1872_v12 = vmul.f32 %v5807_v39, %v1737_v55 }
 0x128   :  { %2045 = vadd.xlane.f32.xlu0 %v2044_v56  ;;  %v1303_v56 = vadd.f32 %v5762_v58, %v6008_v8  ;;  %v2053_v35 = vsel %vm7632_vm0, %v1861_v18, 0.0  ;;  %v1863_v8 = vmul.f32 %v5807_v39, %v1728_v49  ;;  %v2065_v40 = vsel %vm7632_vm0, %v1865_v60, 0.0 }
 0x129   :  { %v6050_v26 = vpop.f32.mrf.mxu0  ;;  %v2068_v49 = vsel %vm7632_vm0, %v1866_v30, 0.0 }
 0x12a   :  { %2027 = vadd.xlane.f32.xlu1 %v2026_v17  ;;  %v1607_v17 = vadd.f32 %v5776_v6, %v1304_v61  ;;  %v1606_v44 = vadd.f32 %v5776_v6, %v1303_v56  ;;  %v2059_v2 = vsel %vm7632_vm0, %v1863_v8, 0.0  ;;  %v1308_v61 = vadd.f32 %v6031_v21, %v5762_v58 }
 0x12b   :  { %v4447_v14 = vpop.f32.mrf.mxu0  ;;  %v1309_v46 = vadd.f32 %v5762_v58, %v6050_v26 }
 0x12c   :  { %2042 = vadd.xlane.f32.xlu0 %v2041_v36  ;;  %v1312_v0 = vadd.f32 %v4447_v14, %v5762_v58  ;;  %v1735_v36 = vmax.f32 %v1607_v17, 0.0  ;;  %v1611_v56 = vadd.f32 %v5776_v6, %v1308_v61 }
 0x12d   :  { %v6060_v52 = vpop.f32.mrf.mxu0  ;;  %v1612_v55 = vadd.f32 %v5776_v6, %v1309_v46 }
 0x12e   :  { %2024 = vadd.xlane.f32.xlu1 %v2023_v7  ;;  %v6109_v7 = vrot.slane %v1524_v25, %v5746_v50  ;;  %v1305_v50 = vadd.f32 %v5762_v58, %v6020_v15  ;;  %v1867_v15 = vmul.f32 %v5807_v39, %v1732_v32 }
 0x12f   :  { %v4450_v3 = vpop.f32.mrf.mxu0 }
 0x130   :  { %2051 = vadd.xlane.f32.xlu0 %v2050_v33  ;;  %v1314_v14 = vadd.f32 %v4450_v3, %v5762_v58  ;;  %v1615_v63 = vadd.f32 %v6109_v7, %v1312_v0  ;;  %v1734_v33 = vmax.f32 %v1606_v44, 0.0  ;;  %v1870_v3 = vmul.f32 %v5807_v39, %v1735_v36 }
 0x131   :  { %v867_v62 = vpop.f32.mrf.mxu0  ;;  %v1608_v54 = vadd.f32 %v5776_v6, %v1305_v50  ;;  %v2071_v47 = vsel %vm7632_vm0, %v1867_v15, 0.0  ;;  %v1307_v0 = vadd.f32 %v5762_v58, %v6035_v43  ;;  %v1739_v44 = vmax.f32 %v1611_v56, 0.0 }
 0x132   :  { %2057 = vadd.xlane.f32.xlu1 %v2056_v45  ;;  %v1617_v45 = vadd.f32 %v6109_v7, %v1314_v14  ;;  %v1743_v5 = vmax.f32 %v1615_v63, 0.0  ;;  %v1313_v18 = vadd.f32 %v5762_v58, %v867_v62  ;;  %v1869_v17 = vmul.f32 %v5807_v39, %v1734_v33 }
 0x133   :  { %v6081_v48 = vpop.f32.mrf.mxu0  ;;  %v1736_v38 = vmax.f32 %v1608_v54, 0.0  ;;  %v1610_v32 = vadd.f32 %v5776_v6, %v1307_v0  ;;  %v1310_v63 = vadd.f32 %v6045_v22, %v5762_v58  ;;  %v1874_v26 = vmul.f32 %v5807_v39, %v1739_v44 }
 0x134   :  { %2048 = vadd.xlane.f32.xlu0 %v2047_v51  ;;  %v2080_v51 = vsel %vm7632_vm0, %v1870_v3, 0.0  ;;  %v1616_v62 = vadd.f32 %v6109_v7, %v1313_v18  ;;  %v2077_v8 = vsel %vm7632_vm0, %v1869_v17, 0.0 }
 0x135   :  { %v6084_v42 = vpop.f32.mrf.mxu0  ;;  %v1613_v18 = vadd.f32 %v5776_v6, %v1310_v63 }
 0x136   :  { %2063 = vadd.xlane.f32.xlu1 %v2062_v53  ;;  %v1745_v53 = vmax.f32 %v1617_v45, 0.0 }
 0x137   :  { %v4456_v57 = vpop.f32.mrf.mxu0 }
 0x138   :  { %2054 = vadd.xlane.f32.xlu0 %v2053_v35  ;;  %v1318_v25 = vadd.f32 %v4456_v57, %v5762_v58  ;;  %v1878_v35 = vmul.f32 %v5807_v39, %v1743_v5  ;;  %v1880_v57 = vmul.f32 %v5807_v39, %v1745_v53  ;;  %v1738_v5 = vmax.f32 %v1610_v32, 0.0 }
 0x139   :  { %v887_v41 = vpop.f32.mrf.mxu0 }
 0x13a   :  { %2066 = vadd.xlane.f32.xlu1 %v2065_v40  ;;  %v1744_v40 = vmax.f32 %v1616_v62, 0.0  ;;  %v1621_v14 = vadd.f32 %v6109_v7, %v1318_v25  ;;  %v1317_v30 = vadd.f32 %v5762_v58, %v887_v41  ;;  %v2104_v43 = vsel %vm7632_vm0, %v1878_v35, 0.0 }
 0x13b   :  { %v6106_v1 = vpop.f32.mrf.mxu0  ;;  %v2110_v41 = vsel %vm7632_vm0, %v1880_v57, 0.0  ;;  %v1741_v62 = vmax.f32 %v1613_v18, 0.0  ;;  %v1311_v25 = vadd.f32 %v5762_v58, %v6060_v52  ;;  %v1873_v6 = vmul.f32 %v5807_v39, %v1738_v5 }
 0x13c   :  { %2060 = vadd.xlane.f32.xlu0 %v2059_v2  ;;  %v2086_v2 = vsel %vm7632_vm0, %v1872_v12, 0.0  ;;  %v1749_v3 = vmax.f32 %v1621_v14, 0.0  ;;  %v1620_v61 = vadd.f32 %v6109_v7, %v1317_v30  ;;  %v1320_v22 = vadd.f32 %v6106_v1, %v5762_v58 }
 0x13d   :  { %v6112_v10 = vpop.f32.mrf.mxu0  ;;  %v1879_v45 = vmul.f32 %v5807_v39, %v1744_v40  ;;  %v1614_v57 = vadd.f32 %v6109_v7, %v1311_v25  ;;  %v1316_v40 = vadd.f32 %v6081_v48, %v5762_v58  ;;  %v2089_v14 = vsel %vm7632_vm0, %v1873_v6, 0.0 }
 0x13e   :  { %2075 = vadd.xlane.f32.xlu1 %v2074_v59  ;;  %v1871_v59 = vmul.f32 %v5807_v39, %v1736_v38  ;;  %v1319_v54 = vadd.f32 %v5762_v58, %v6112_v10  ;;  %v1748_v1 = vmax.f32 %v1620_v61, 0.0  ;;  %v1623_v17 = vadd.f32 %v6109_v7, %v1320_v22 }
 0x13f   :  { %v6122_v4 = vpop.f32.mrf.mxu0  ;;  %v2107_v56 = vsel %vm7632_vm0, %v1879_v45, 0.0  ;;  %v1884_v53 = vmul.f32 %v5807_v39, %v1749_v3  ;;  %v1740_v10 = vmax.f32 %v1612_v55, 0.0  ;;  %v1876_v30 = vmul.f32 %v5807_v39, %v1741_v62 }
 0x140   :  { %2069 = vadd.xlane.f32.xlu0 %v2068_v49  ;;  %v2083_v49 = vsel %vm7632_vm0, %v1871_v59, 0.0  ;;  %v1622_v38 = vadd.f32 %v6109_v7, %v1319_v54  ;;  %v1322_v12 = vadd.f32 %v6122_v4, %v5762_v58  ;;  %v1883_v52 = vmul.f32 %v5807_v39, %v1748_v1 }
 0x141   :  { %v6127_v27 = vpop.f32.mrf.mxu0  ;;  %v2122_v44 = vsel %vm7632_vm0, %v1884_v53, 0.0  ;;  %v1315_v4 = vadd.f32 %v5762_v58, %v6084_v42  ;;  %v1619_v3 = vadd.f32 %v6109_v7, %v1316_v40  ;;  %v2098_v61 = vsel %vm7632_vm0, %v1876_v30, 0.0 }
 0x142   :  { %2081 = vadd.xlane.f32.xlu1 %v2080_v51  ;;  %v1750_v32 = vmax.f32 %v1622_v38, 0.0  ;;  %v1321_v59 = vadd.f32 %v5762_v58, %v6127_v27  ;;  %v2119_v48 = vsel %vm7632_vm0, %v1883_v52, 0.0  ;;  %v1875_v42 = vmul.f32 %v5807_v39, %v1740_v10 }
 0x143   :  { %v6135_v21 = vpop.f32.mrf.mxu0  ;;  %v1618_v45 = vadd.f32 %v6109_v7, %v1315_v4  ;;  %v1747_v54 = vmax.f32 %v1619_v3, 0.0 }
 0x144   :  { %2072 = vadd.xlane.f32.xlu0 %v2071_v47  ;;  %v2092_v47 = vsel %vm7632_vm0, %v1874_v26, 0.0  ;;  %v1324_v27 = vadd.f32 %v6135_v21, %v5762_v58  ;;  %v1885_v55 = vmul.f32 %v5807_v39, %v1750_v32 }
 0x145   :  { %v6138_v60 = vpop.f32.mrf.mxu0  ;;  %v1746_v21 = vmax.f32 %v1618_v45, 0.0 }
 0x146   :  { %2078 = vadd.xlane.f32.xlu1 %v2077_v8  ;;  %v1751_v8 = vmax.f32 %v1623_v17, 0.0  ;;  %v2095_v17 = vsel %vm7632_vm0, %v1875_v42, 0.0  ;;  %v1627_v62 = vadd.f32 %v6109_v7, %v1324_v27  ;;  %v1323_v6 = vadd.f32 %v5762_v58, %v6138_v60 }
 0x147   :  { %v6148_v36 = vpop.f32.mrf.mxu0  ;;  %v2125_v10 = vsel %vm7632_vm0, %v1885_v55, 0.0  ;;  %v1881_v60 = vmul.f32 %v5807_v39, %v1746_v21 }
 0x148   :  { %2105 = vadd.xlane.f32.xlu0 %v2104_v43  ;;  %v1886_v46 = vmul.f32 %v5807_v39, %v1751_v8  ;;  %v1326_v1 = vadd.f32 %v6148_v36, %v5762_v58 }
 0x149   :  { %v6150_v20 = vpop.f32.mrf.mxu0  ;;  %v2113_v3 = vsel %vm7632_vm0, %v1881_v60, 0.0 }
 0x14a   :  { %2087 = vadd.xlane.f32.xlu1 %v2086_v2  ;;  %v1625_v2 = vadd.f32 %v6109_v7, %v1322_v12  ;;  %v2128_v26 = vsel %vm7632_vm0, %v1886_v46, 0.0  ;;  %v1629_v38 = vadd.f32 %v6109_v7, %v1326_v1  ;;  %v1325_v30 = vadd.f32 %v5762_v58, %v6150_v20 }
 0x14b   :  { %v6161_v33 = vpop.f32.mrf.mxu0 }
 0x14c   :  { %2111 = vadd.xlane.f32.xlu0 %v2110_v41  ;;  %v1742_v41 = vmax.f32 %v1614_v57, 0.0  ;;  %v1753_v18 = vmax.f32 %v1625_v2, 0.0  ;;  %v1755_v57 = vmax.f32 %v1627_v62, 0.0  ;;  %v1757_v32 = vmax.f32 %v1629_v38, 0.0 }
 0x14d   :  { %v6166_v50 = vpop.f32.mrf.mxu0  ;;  %v1328_v20 = vadd.f32 %v6161_v33, %v5762_v58  ;;  %v1628_v45 = vadd.f32 %v6109_v7, %v1325_v30 }
 0x14e   :  { %2084 = vadd.xlane.f32.xlu1 %v2083_v49  ;;  %v1624_v49 = vadd.f32 %v6109_v7, %v1321_v59  ;;  %v1888_v36 = vmul.f32 %v5807_v39, %v1753_v18  ;;  %v1327_v8 = vadd.f32 %v5762_v58, %v6166_v50  ;;  %v1890_v27 = vmul.f32 %v5807_v39, %v1755_v57 }
 0x14f   :  { %v6175_v15 = vpop.f32.mrf.mxu0  ;;  %v1892_v33 = vmul.f32 %v5807_v39, %v1757_v32  ;;  %v6325_v32 = vld [vmem:[%s7616_s3] ss:$0 sm:$0xff] }
 0x150   :  { %2108 = vadd.xlane.f32.xlu0 %v2107_v56  ;;  %v1877_v56 = vmul.f32 %v5807_v39, %v1742_v41  ;;  %v2134_v50 = vsel %vm7632_vm0, %v1888_v36, 0.0  ;;  %v1630_v2 = vadd.f32 %v5779_v9, %v1327_v8  ;;  %v6262_v41 = vand.u32 127, %v1481_v13 }
 0x151   :  { %v6180_v51 = vpop.f32.mrf.mxu0 }
 0x152   :  { %2093 = vadd.xlane.f32.xlu1 %v2092_v47  ;;  %v1752_v47 = vmax.f32 %v1624_v49, 0.0  ;;  %v2101_v12 = vsel %vm7632_vm0, %v1877_v56, 0.0  ;;  %v1329_v59 = vadd.f32 %v5762_v58, %v6180_v51  ;;  %7639 = vst [vmem:[#allocation12_spill] sm:$0xff] %v6262_v41  ;;  %v1758_v18 = vmax.f32 %v1630_v2, 0.0 }
 0x153   :  { %v6189_v35 = vpop.f32.mrf.mxu0  ;;  %v2627_v55 = vadd.s32 4294967264, %v6262_v41  ;;  %v2634_v1 = vadd.s32 4294967256, %v6262_v41  ;;  %v6293_v21 = vsub.s32 %v6262_v41, %v5704_v28  ;;  %v2613_v62 = vadd.s32 4294967280, %v6262_v41 }
 0x154   :  { %2123 = vadd.xlane.f32.xlu0 %v2122_v44  ;;  %v1882_v44 = vmul.f32 %v5807_v39, %v1747_v54  ;;  %v1887_v4 = vmul.f32 %v5807_v39, %v1752_v47  ;;  %v1632_v49 = vadd.f32 %v5779_v9, %v1329_v59  ;;  %v1332_v13 = vadd.f32 %v6189_v35, %v5762_v58 }
 0x155   :  { %v6192_v0 = vpop.f32.mrf.mxu0  ;;  %v2606_v54 = vadd.s32 4294967288, %v6262_v41  ;;  %v1330_v35 = vadd.f32 %v6175_v15, %v5762_v58  ;;  %v1756_v47 = vmax.f32 %v1628_v45, 0.0  ;;  %v2146_v15 = vsel %vm7632_vm0, %v1892_v33, 0.0 }
 0x156   :  { %2090 = vadd.xlane.f32.xlu1 %v2089_v14  ;;  %v1626_v14 = vadd.f32 %v6109_v7, %v1323_v6  ;;  %v2131_v51 = vsel %vm7632_vm0, %v1887_v4, 0.0  ;;  %v6281_v7 = vstv %s7620_s7  ;;  %v1760_v38 = vmax.f32 %v1632_v49, 0.0 }
 0x157   :  { %v6203_v43 = vpop.f32.mrf.mxu0  ;;  %v1635_v8 = vadd.f32 %v5779_v9, %v1332_v13  ;;  %v6306_v57 = vsub.s32 %v2627_v55, %v5704_v28  ;;  %v2655_v60 = vadd.s32 4294967232, %v6262_v41  ;;  %v1633_v30 = vadd.f32 %v5779_v9, %v1330_v35 }
 0x158   :  { %2120 = vadd.xlane.f32.xlu0 %v2119_v48  ;;  %v2116_v48 = vsel %vm7632_vm0, %v1882_v44, 0.0  ;;  %v1754_v42 = vmax.f32 %v1626_v14, 0.0  ;;  %v1334_v6 = vadd.f32 %v6203_v43, %v5762_v58  ;;  %v6309_v58 = vsub.s32 %v2606_v54, %v5704_v28 }
 0x159   :  { %v6207_v63 = vpop.f32.mrf.mxu0  ;;  %v6312_v43 = vsub.s32 %v2634_v1, %v5704_v28  ;;  %v2620_v4 = vadd.s32 4294967272, %v6262_v41  ;;  %v1331_v2 = vadd.f32 %v6325_v32, %v6192_v0  ;;  %v6346_v49 = vsub.s32 %v2655_v60, %v5704_v28 }
 0x15a   :  { %2099 = vadd.xlane.f32.xlu1 %v2098_v61  ;;  %v1889_v36 = vmul.f32 %v5807_v39, %v1754_v42  ;;  %v1637_v59 = vadd.f32 %v5779_v9, %v1334_v6  ;;  %v1763_v42 = vmax.f32 %v1635_v8, 0.0  ;;  %v1333_v45 = vadd.f32 %v6325_v32, %v6207_v63 }
 0x15b   :  { %v6217_v22 = vpop.f32.mrf.mxu0  ;;  %v2662_v13 = vadd.s32 4294967224, %v6262_v41  ;;  %v2641_v33 = vadd.s32 4294967248, %v6262_v41  ;;  %v1761_v55 = vmax.f32 %v1633_v30, 0.0  ;;  %v6354_v1 = vsub.s32 %v2620_v4, %v5704_v28 }
 0x15c   :  { %2129 = vadd.xlane.f32.xlu0 %v2128_v26  ;;  %v1765_v35 = vmax.f32 %v1637_v59, 0.0  ;;  %v1636_v6 = vadd.f32 %v5779_v9, %v1333_v45  ;;  %v2648_v8 = vadd.s32 4294967240, %v6262_v41 }
 0x15d   :  { %v6222_v5 = vpop.f32.mrf.mxu0  ;;  %v6371_v60 = vsub.s32 %v2662_v13, %v5704_v28 }
 0x15e   :  { %2096 = vadd.xlane.f32.xlu1 %v2095_v17  ;;  %v1631_v17 = vadd.f32 %v5779_v9, %v1328_v20  ;;  %v6334_v20 = vld [vmem:[%s7619_s6] ss:$0 sm:$0xff] }
 0x15f   :  { %v6231_v53 = vpop.f32.mrf.mxu0  ;;  %v1895_v0 = vmul.f32 %v6334_v20, %v1760_v38  ;;  %v1896_v59 = vmul.f32 %v6334_v20, %v1761_v55 }
 0x160   :  { %2126 = vadd.xlane.f32.xlu0 %v2125_v10  ;;  %v2140_v10 = vsel %vm7632_vm0, %v1890_v27, 0.0  ;;  %v1759_v14 = vmax.f32 %v1631_v17, 0.0  ;;  %v2669_v17 = vadd.s32 4294967216, %v6262_v41 }
 0x161   :  { %v6234_v25 = vpop.f32.mrf.mxu0 }
 0x162   :  { %2102 = vadd.xlane.f32.xlu1 %v2101_v12  ;;  %v1893_v12 = vmul.f32 %v5807_v39, %v1758_v18  ;;  %v6319_v39 = vsub.s32 %v2613_v62, %v5704_v28  ;;  %v1336_v18 = vadd.f32 %v6325_v32, %v6217_v22  ;;  %v1894_v54 = vmul.f32 %v6334_v20, %v1759_v14 }
 0x163   :  { %v6245_v52 = vpop.f32.mrf.mxu0  ;;  %v1634_v22 = vadd.f32 %v5779_v9, %v1331_v2  ;;  %v6374_v14 = vsub.s32 %v2641_v33, %v5704_v28  ;;  %v6395_v33 = vsub.s32 %v2648_v8, %v5704_v28 }
 0x164   :  { %2135 = vadd.xlane.f32.xlu0 %v2134_v50  ;;  %v2152_v45 = vsel %vm7632_vm0, %v1894_v54, 0.0  ;;  %v1338_v54 = vadd.f32 %v6325_v32, %v6231_v53 }
 0x165   :  { %v6247_v40 = vpop.f32.mrf.mxu0 }
 0x166   :  { %2117 = vadd.xlane.f32.xlu1 %v2116_v48  ;;  %v2137_v48 = vsel %vm7632_vm0, %v1889_v36, 0.0  ;;  %v1898_v36 = vmul.f32 %v6334_v20, %v1763_v42 }
 0x167   :  { %v6259_v46 = vpop.f32.mrf.mxu0 }
 0x168   :  { %2132 = vadd.xlane.f32.xlu0 %v2131_v51  ;;  %v2149_v51 = vsel %vm7632_vm0, %v1893_v12, 0.0  ;;  %v1342_v62 = vadd.f32 %v6325_v32, %v6259_v46  ;;  %v1335_v12 = vadd.f32 %v6325_v32, %v6222_v5  ;;  %v2676_v5 = vadd.s32 4294967208, %v6262_v41 }
 0x169   :  { %v6267_v61 = vpop.f32.mrf.mxu0 }
 0x16a   :  { %2114 = vadd.xlane.f32.xlu1 %v2113_v3  ;;  %v1891_v3 = vmul.f32 %v6334_v20, %v1756_v47  ;;  %v1341_v30 = vadd.f32 %v6325_v32, %v6267_v61  ;;  %v1645_v42 = vadd.f32 %v5779_v9, %v1342_v62  ;;  %v1764_v61 = vmax.f32 %v1636_v6, 0.0 }
 0x16b   :  { %v6276_v26 = vpop.f32.mrf.mxu0  ;;  %v6407_v8 = vsub.s32 %v2676_v5, %v5704_v28 }
 0x16c   :  { %2141 = vadd.xlane.f32.xlu0 %v2140_v10  ;;  %v2143_v47 = vsel %vm7632_vm0, %v1891_v3, 0.0  ;;  %v2155_v10 = vsel %vm7632_vm0, %v1895_v0, 0.0  ;;  %v1762_v3 = vmax.f32 %v1634_v22, 0.0  ;;  %v1644_v62 = vadd.f32 %v5779_v9, %v1341_v30 }
 0x16d   :  { %v6289_v56 = vpop.f32.mrf.mxu0  ;;  %v1337_v30 = vadd.f32 %v6325_v32, %v6234_v25  ;;  %v1899_v5 = vmul.f32 %v6334_v20, %v1764_v61 }
 0x16e   :  { %2147 = vadd.xlane.f32.xlu1 %v2146_v15  ;;  %v1639_v15 = vadd.f32 %v5779_v9, %v1336_v18  ;;  %v2164_v18 = vsel %vm7632_vm0, %v1898_v36, 0.0  ;;  %v1343_v53 = vadd.f32 %v6325_v32, %v6289_v56  ;;  %v1641_v56 = vadd.f32 %v5779_v9, %v1338_v54 }
 0x16f   :  { %v6303_v44 = vpop.f32.mrf.mxu0 }
 0x170   :  { %2138 = vadd.xlane.f32.xlu0 %v2137_v48  ;;  %v6384_v48 = vsub.s32 %v2669_v17, %v5704_v28  ;;  %v1767_v55 = vmax.f32 %v1639_v15, 0.0  ;;  %v1638_v17 = vadd.f32 %v5779_v9, %v1335_v12  ;;  %v1773_v15 = vmax.f32 %v1645_v42, 0.0 }
 0x171   :  { %v6316_v50 = vpop.f32.mrf.mxu0  ;;  %v1646_v54 = vadd.f32 %v5787_v19, %v1343_v53  ;;  %v1769_v53 = vmax.f32 %v1641_v56, 0.0 }
 0x172   :  { %2150 = vadd.xlane.f32.xlu1 %v2149_v51  ;;  %v1900_v51 = vmul.f32 %v6334_v20, %v1765_v35  ;;  %v2690_v35 = vadd.s32 4294967192, %v6262_v41  ;;  %v1766_v42 = vmax.f32 %v1638_v17, 0.0  ;;  %v6432_v17 = vadd.s32 4294967200, %v6262_v41 }
 0x173   :  { %v6341_v27 = vpop.f32.mrf.mxu0  ;;  %v1774_v34 = vmax.f32 %v1646_v54, 0.0 }
 0x174   :  { %2144 = vadd.xlane.f32.xlu0 %v2143_v47  ;;  %v2170_v12 = vsel %vm7632_vm0, %v1900_v51, 0.0  ;;  %v6423_v25 = vsub.s32 %v2690_v35, %v5704_v28 }
 0x175   :  { %v6350_v63 = vpop.f32.mrf.mxu0  ;;  %v1959_v46 = vpop.xlane.xlu0 %1958 }
 0x176   :  { %2156 = vadd.xlane.f32.xlu1 %v2155_v10  ;;  %v2343_v0 = vadd.f32 %v6281_v7, %v1959_v46  ;;  %v2158_v10 = vsel %vm7632_vm0, %v1896_v59, 0.0  ;;  %v1897_v46 = vmul.f32 %v6334_v20, %v1762_v3  ;;  %v1902_v3 = vmul.f32 %v6334_v20, %v1767_v55 }
 0x177   :  { %v6364_v38 = vpop.f32.mrf.mxu0  ;;  %v6378_v4 = vpop.xlane.xlu1 %1970  ;;  %v1348_v55 = vadd.f32 %v6325_v32, %v6341_v27 }
 0x178   :  { %2153 = vadd.xlane.f32.xlu0 %v2152_v45  ;;  %v2605_v45 = vrot.slane %v2343_v0, %v6293_v21  ;;  %v1772_v0 = vmax.f32 %v1644_v62, 0.0  ;;  %v2161_v35 = vsel %vm7632_vm0, %v1897_v46, 0.0  ;;  %v1908_v62 = vmul.f32 %v6334_v20, %v1773_v15 }
 0x179   :  { %v6380_v2 = vpop.f32.mrf.mxu0  ;;  %v1962_v22 = vpop.xlane.xlu0 %1961  ;;  %v2347_v27 = vadd.f32 %v6281_v7, %v6378_v4  ;;  %v2176_v15 = vsel %vm7632_vm0, %v1902_v3, 0.0  ;;  %v1651_v4 = vadd.f32 %v5787_v19, %v1348_v55 }
 0x17a   :  { %2165 = vadd.xlane.f32.xlu1 %v2164_v18  ;;  %v2344_v47 = vadd.f32 %v6281_v7, %v1962_v22  ;;  %v1907_v56 = vmul.f32 %v6334_v20, %v1772_v0  ;;  %v2194_v3 = vsel %vm7632_vm0, %v1908_v62, 0.0  ;;  %v1904_v62 = vmul.f32 %v6334_v20, %v1769_v53 }
 0x17b   :  { %v6392_v13 = vpop.f32.mrf.mxu0  ;;  %v1974_v6 = vpop.xlane.xlu1 %1973  ;;  %v2631_v0 = vrot.slane %v2347_v27, %v6306_v57  ;;  %v1909_v53 = vmul.f32 %v6334_v20, %v1774_v34 }
 0x17c   :  { %v2610_v59 = vrot.slane %v2344_v47, %v6309_v58  ;;  %2159 = vadd.xlane.f32.xlu0 %v2158_v10  ;;  %v2348_v37 = vadd.f32 %v6281_v7, %v1974_v6  ;;  %v2182_v34 = vsel %vm7632_vm0, %v1904_v62, 0.0 }
 0x17d   :  { %v6404_v36 = vpop.f32.mrf.mxu0  ;;  %v1965_v51 = vpop.xlane.xlu0 %1964 }
 0x17e   :  { %2171 = vadd.xlane.f32.xlu1 %v2170_v12  ;;  %v2612_v22 = vsel %vm2611_vm2, %v2610_v59, %v2605_v45  ;;  %v2345_v47 = vadd.f32 %v6281_v7, %v1965_v51  ;;  %v1640_v12 = vadd.f32 %v5779_v9, %v1337_v30  ;;  %v1340_v45 = vadd.f32 %v6325_v32, %v6245_v52 }
 0x17f   :  { %v6418_v18 = vpop.f32.mrf.mxu0  ;;  %v6427_v61 = vpop.xlane.xlu1 %1982  ;;  %v2167_v51 = vsel %vm7632_vm0, %v1899_v5, 0.0  ;;  %v1901_v30 = vmul.f32 %v6334_v20, %v1766_v42 }
 0x180   :  { %v2617_v59 = vrot.slane %v2345_v47, %v6319_v39  ;;  %2162 = vadd.xlane.f32.xlu0 %v2161_v35  ;;  %v1768_v42 = vmax.f32 %v1640_v12, 0.0  ;;  %v1643_v6 = vadd.f32 %v5779_v9, %v1340_v45 }
 0x181   :  { %v6429_v10 = vpop.f32.mrf.mxu0  ;;  %v1968_v46 = vpop.xlane.xlu0 %1967  ;;  %v2173_v55 = vsel %vm7632_vm0, %v1901_v30, 0.0 }
 0x182   :  { %2168 = vadd.xlane.f32.xlu1 %v2167_v51  ;;  %v2619_v52 = vsel %vm2618_vm3, %v2617_v59, %v2612_v22  ;;  %v2346_v47 = vadd.f32 %v6281_v7, %v1968_v46  ;;  %v1347_v51 = vadd.f32 %v6325_v32, %v6350_v63  ;;  %v1339_v22 = vadd.f32 %v6325_v32, %v6247_v40 }
 0x183   :  { %v6444_v11 = vpop.f32.mrf.mxu0  ;;  %v1986_v35 = vpop.xlane.xlu1 %1985  ;;  %v1350_v63 = vadd.f32 %v6325_v32, %v6364_v38  ;;  %v2638_v40 = vrot.slane %v2348_v37, %v6312_v43  ;;  %v1779_v38 = vmax.f32 %v1651_v4, 0.0  ;;  %v1771_v31 = vmax.f32 %v1643_v6, 0.0 }
 0x184   :  { %v2624_v59 = vrot.slane %v2346_v47, %v6354_v1  ;;  %2195 = vadd.xlane.f32.xlu0 %v2194_v3  ;;  %v2191_v3 = vsel %vm7632_vm0, %v1907_v56, 0.0  ;;  %v6481_v37 = vadd.f32 %v5779_v9, %v1339_v22  ;;  %v1903_v6 = vmul.f32 %v6334_v20, %v1768_v42 }
 0x185   :  { %v6453_v5 = vpop.f32.mrf.mxu0  ;;  %v1977_v54 = vpop.xlane.xlu0 %1976  ;;  %v1653_v4 = vadd.f32 %v5787_v19, %v1350_v63  ;;  %v1349_v9 = vadd.f32 %v6325_v32, %v6380_v2  ;;  %v2352_v22 = vadd.f32 %v6281_v7, %v1986_v35  ;;  %v1914_v62 = vmul.f32 %v6334_v20, %v1779_v38 }
 0x186   :  { %2177 = vadd.xlane.f32.xlu1 %v2176_v15  ;;  %v2626_v12 = vsel %vm2625_vm4, %v2624_v59, %v2619_v52  ;;  %v2349_v45 = vadd.f32 %v6281_v7, %v1977_v54  ;;  %v1650_v15 = vadd.f32 %v5787_v19, %v1347_v51  ;;  %v2351_v51 = vadd.f32 %v6281_v7, %v6427_v61 }
 0x187   :  { %v6464_v46 = vpop.f32.mrf.mxu0  ;;  %v1989_v47 = vpop.xlane.xlu1 %1988  ;;  %v2633_v30 = vsel %vm2632_vm5, %v2631_v0, %v2626_v12  ;;  %v1770_v42 = vmax.f32 %v6481_v37, 0.0  ;;  %v1344_v2 = vadd.f32 %v6325_v32, %v6276_v26  ;;  %v2179_v38 = vsel %vm7632_vm0, %v1903_v6, 0.0 }
 0x188   :  { %v2640_v52 = vsel %vm7630_vm6, %v2638_v40, %v2633_v30  ;;  %v2645_v59 = vrot.slane %v2349_v45, %v6374_v14  ;;  %2192 = vadd.xlane.f32.xlu0 %v2191_v3  ;;  %v1778_v45 = vmax.f32 %v1650_v15, 0.0  ;;  %v2353_v61 = vadd.f32 %v6281_v7, %v1989_v47 }
 0x189   :  { %v6475_v27 = vpop.f32.mrf.mxu0  ;;  %v1980_v0 = vpop.xlane.xlu0 %1979  ;;  %v1781_v15 = vmax.f32 %v1653_v4, 0.0  ;;  %v2659_v47 = vrot.slane %v2351_v51, %v6346_v49  ;;  %v1906_v37 = vmul.f32 %v6334_v20, %v1771_v31  ;;  %v1652_v26 = vadd.f32 %v5787_v19, %v1349_v9 }
 0x18a   :  { %2174 = vadd.xlane.f32.xlu1 %v2173_v55  ;;  %v2647_v54 = vsel %vm2646_vm7, %v2645_v59, %v2640_v52  ;;  %v2350_v40 = vadd.f32 %v6281_v7, %v1980_v0  ;;  %v2197_v55 = vsel %vm7632_vm0, %v1909_v53, 0.0  ;;  %v1352_v52 = vadd.f32 %v6325_v32, %v6392_v13 }
 0x18b   :  { %v6485_v56 = vpop.f32.mrf.mxu0  ;;  %v1992_v12 = vpop.xlane.xlu1 %1991  ;;  %v2666_v59 = vrot.slane %v2352_v22, %v6371_v60  ;;  %v2673_v51 = vrot.slane %v2353_v61, %v6384_v48  ;;  %v2212_v6 = vsel %vm7632_vm0, %v1914_v62, 0.0  ;;  %v1913_v31 = vmul.f32 %v6334_v20, %v1778_v45 }
 0x18c   :  { %v2652_v35 = vrot.slane %v2350_v40, %v6395_v33  ;;  %v2354_v3 = vadd.f32 %v6281_v7, %v1992_v12  ;;  %2198 = vadd.xlane.f32.xlu0 %v2197_v55  ;;  %v1647_v9 = vadd.f32 %v5787_v19, %v1344_v2  ;;  %v1346_v13 = vadd.f32 %v6325_v32, %v6303_v44 }
 0x18d   :  { %v6497_v63 = vpop.f32.mrf.mxu0  ;;  %v6510_v53 = vpop.xlane.xlu0 %2318  ;;  %v1345_v61 = vadd.f32 %v6325_v32, %v6316_v50  ;;  %v6539_v45 = vsub.s32 %v6432_v17, %v5704_v28  ;;  %v2704_v44 = vadd.s32 4294967176, %v6262_v41  ;;  %v1655_v2 = vadd.f32 %v5787_v19, %v1352_v52 }
 0x18e   :  { %2183 = vadd.xlane.f32.xlu1 %v2182_v34  ;;  %7640 = vst [vmem:[#allocation13_spill] sm:$0xff] %v6510_v53  ;;  %v2654_v0 = vsel %vm2653_vm8, %v2652_v35, %v2647_v54  ;;  %v2680_v54 = vrot.slane %v2354_v3, %v6407_v8  ;;  %v1351_v35 = vadd.f32 %v6325_v32, %v6404_v36  ;;  %v2209_v17 = vsel %vm7632_vm0, %v1913_v31, 0.0 }
 0x18f   :  { %v6507_v30 = vpop.f32.mrf.mxu0  ;;  %v1998_v40 = vpop.xlane.xlu1 %1997  ;;  %v2661_v34 = vsel %vm2660_vm9, %v2659_v47, %v2654_v0  ;;  %v1649_v52 = vadd.f32 %v5787_v19, %v1346_v13  ;;  %v1905_v36 = vmul.f32 %v6334_v20, %v1770_v42  ;;  %v1783_v31 = vmax.f32 %v1655_v2, 0.0 }
 0x190   :  { %v2668_v22 = vsel %vm2667_vm10, %v2666_v59, %v2661_v34  ;;  %2213 = vadd.xlane.f32.xlu0 %v2212_v6  ;;  %v2356_v50 = vadd.f32 %v6281_v7, %v1998_v40  ;;  %v1775_v34 = vmax.f32 %v1647_v9, 0.0  ;;  %v2188_v6 = vsel %vm7632_vm0, %v1906_v37, 0.0 }
 0x191   :  { %v6519_v4 = vpop.f32.mrf.mxu0  ;;  %v2675_v55 = vsel %vm2674_vm11, %v2673_v51, %v2668_v22  ;;  %v6535_v62 = vpop.xlane.xlu0 %2321  ;;  %v1916_v51 = vmul.f32 %v6334_v20, %v1781_v15  ;;  %v1648_v40 = vadd.f32 %v5787_v19, %v1345_v61  ;;  %v2697_v15 = vadd.s32 4294967184, %v6262_v41 }
 0x192   :  { %2180 = vadd.xlane.f32.xlu1 %v2179_v38  ;;  %7641 = vst [vmem:[#allocation14_spill] sm:$0xff] %v6535_v62  ;;  %v2682_v3 = vsel %vm2681_vm12, %v2680_v54, %v2675_v55  ;;  %v1780_v38 = vmax.f32 %v1652_v26, 0.0  ;;  %v1654_v9 = vadd.f32 %v5787_v19, %v1351_v35  ;;  %v1354_v37 = vadd.f32 %v6325_v32, %v6418_v18 }
 0x193   :  { %v6530_v12 = vpop.f32.mrf.mxu0  ;;  %v1995_v47 = vpop.xlane.xlu1 %1994  ;;  %v2694_v42 = vrot.slane %v2356_v50, %v6423_v25  ;;  %v1356_v61 = vadd.f32 %v6325_v32, %v6444_v11  ;;  %v1777_v2 = vmax.f32 %v1649_v52, 0.0  ;;  %v2185_v35 = vsel %vm7632_vm0, %v1905_v36, 0.0 }
 0x194   :  { %v2355_v0 = vadd.f32 %v6281_v7, %v1995_v47  ;;  %2210 = vadd.xlane.f32.xlu0 %v2209_v17  ;;  %v1915_v17 = vmul.f32 %v6334_v20, %v1780_v38  ;;  %v1910_v18 = vmul.f32 %v6334_v20, %v1775_v34  ;;  %v1776_v41 = vmax.f32 %v1648_v40, 0.0 }
 0x195   :  { %v6547_v59 = vpop.f32.mrf.mxu0  ;;  %v6559_v54 = vpop.xlane.xlu0 %2324  ;;  %v1353_v11 = vadd.f32 %v6325_v32, %v6429_v10  ;;  %v1657_v38 = vadd.f32 %v5787_v19, %v1354_v37  ;;  %v1918_v34 = vmul.f32 %v6334_v20, %v1783_v31  ;;  %v1357_v10 = vadd.f32 %v6325_v32, %v6475_v27 }
 0x196   :  { %v2687_v26 = vrot.slane %v2355_v0, %v6539_v45  ;;  %2189 = vadd.xlane.f32.xlu1 %v2188_v6  ;;  %7642 = vst [vmem:[#allocation15_spill] sm:$0xff] %v6559_v54  ;;  %v2218_v0 = vsel %vm7632_vm0, %v1916_v51, 0.0  ;;  %v1782_v51 = vmax.f32 %v1654_v9, 0.0  ;;  %v2215_v40 = vsel %vm7632_vm0, %v1915_v17, 0.0 }
 0x197   :  { %v6555_v22 = vpop.f32.mrf.mxu0  ;;  %v2004_v13 = vpop.xlane.xlu1 %2003  ;;  %v2200_v9 = vsel %vm7632_vm0, %v1910_v18, 0.0  ;;  %v6597_v37 = vsub.s32 %v2697_v15, %v5704_v28  ;;  %v1911_v27 = vmul.f32 %v6334_v20, %v1776_v41  ;;  %v1785_v17 = vmax.f32 %v1657_v38, 0.0 }
 0x198   :  { %v2689_v47 = vsel %vm2688_vm13, %v2687_v26, %v2682_v3  ;;  %2219 = vadd.xlane.f32.xlu0 %v2218_v0  ;;  %v1659_v26 = vadd.f32 %v5787_v19, %v1356_v61  ;;  %v1656_v61 = vadd.f32 %v5787_v19, %v1353_v11  ;;  %v2224_v15 = vsel %vm7632_vm0, %v1918_v34, 0.0 }
 0x199   :  { %v6566_v55 = vpop.f32.mrf.mxu0  ;;  %v2696_v50 = vsel %vm2695_vm14, %v2694_v42, %v2689_v47  ;;  %v6580_v3 = vpop.xlane.xlu0 %2021  ;;  %v6590_v42 = vsub.s32 %v2704_v44, %v5704_v28  ;;  %v1912_v47 = vmul.f32 %v6334_v20, %v1777_v2  ;;  %v1355_v44 = vadd.f32 %v6325_v32, %v6453_v5 }
 0x19a   :  { %2186 = vadd.xlane.f32.xlu1 %v2185_v35  ;;  %v2358_v35 = vadd.f32 %v6281_v7, %v2004_v13  ;;  %v1917_v18 = vmul.f32 %v6334_v20, %v1782_v51  ;;  %v1787_v11 = vmax.f32 %v1659_v26, 0.0  ;;  %v1358_v5 = vadd.f32 %v6325_v32, %v6464_v46 }
 0x19b   :  { %v6575_v6 = vpop.f32.mrf.mxu0  ;;  %v6583_v52 = vpop.xlane.xlu1 %2327  ;;  %v1660_v41 = vadd.f32 %v5787_v19, %v1357_v10  ;;  %v1359_v13 = vadd.f32 %v6325_v32, %v6497_v63  ;;  %v1362_v38 = vadd.f32 %v6325_v32, %v6507_v30  ;;  %v2206_v34 = vsel %vm7632_vm0, %v1912_v47, 0.0 }
 0x19c   :  { %7643 = vst [vmem:[#allocation16_spill] sm:$0xff] %v6583_v52  ;;  %2216 = vadd.xlane.f32.xlu0 %v2215_v40  ;;  %v1360_v40 = vadd.f32 %v6325_v32, %v6485_v56  ;;  %v1784_v26 = vmax.f32 %v1656_v61, 0.0  ;;  %v1658_v46 = vadd.f32 %v5787_v19, %v1355_v44  ;;  %v2203_v10 = vsel %vm7632_vm0, %v1911_v27, 0.0 }
 0x19d   :  { %v6585_v36 = vpop.f32.mrf.mxu0  ;;  %v6605_v0 = vpop.xlane.xlu0 %2018  ;;  %v1361_v63 = vadd.f32 %v6325_v32, %v6519_v4  ;;  %v2221_v47 = vsel %vm7632_vm0, %v1917_v18, 0.0  ;;  %v1920_v61 = vmul.f32 %v6334_v20, %v1785_v17  ;;  %v1661_v44 = vadd.f32 %v5787_v19, %v1358_v5 }
 0x19e   :  { %2201 = vadd.xlane.f32.xlu1 %v2200_v9  ;;  %v1922_v54 = vmul.f32 %v6334_v20, %v1787_v11  ;;  %v1788_v27 = vmax.f32 %v1660_v41, 0.0  ;;  %v1662_v62 = vadd.f32 %v5790_v24, %v1359_v13  ;;  %v1665_v4 = vadd.f32 %v5790_v24, %v1362_v38 }
 0x19f   :  { %v6600_v31 = vpop.f32.mrf.mxu0  ;;  %v2001_v28 = vpop.xlane.xlu1 %2000  ;;  %v1786_v18 = vmax.f32 %v1658_v46, 0.0  ;;  %v1364_v17 = vadd.f32 %v6325_v32, %v6530_v12  ;;  %v1919_v13 = vmul.f32 %v6334_v20, %v1784_v26  ;;  %v1789_v38 = vmax.f32 %v1661_v44, 0.0 }
 0x1a0   :  { %v2357_v9 = vadd.f32 %v6281_v7, %v2001_v28  ;;  %2225 = vadd.xlane.f32.xlu0 %v2224_v15  ;;  %v2708_v28 = vrot.slane %v2358_v35, %v6590_v42 }
 0x1a1   :  { %v6610_v2 = vpop.f32.mrf.mxu0  ;;  %v6626_v56 = vpop.xlane.xlu0 %2033 }
 0x1a2   :  { %v2701_v52 = vrot.slane %v2357_v9, %v6597_v37  ;;  %2207 = vadd.xlane.f32.xlu1 %v2206_v34  ;;  %v1663_v9 = vadd.f32 %v5790_v24, %v1360_v40  ;;  %v2230_v40 = vsel %vm7632_vm0, %v1920_v61, 0.0 }
 0x1a3   :  { %v4537_v51 = vpop.f32.mrf.mxu0  ;;  %v2010_v30 = vpop.xlane.xlu1 %2009 }
 0x1a4   :  { %v2703_v34 = vsel %vm2702_vm15, %v2701_v52, %v2696_v50  ;;  %2222 = vadd.xlane.f32.xlu0 %v2221_v47  ;;  %v2360_v19 = vadd.f32 %v6281_v7, %v2010_v30  ;;  %v1664_v50 = vadd.f32 %v5790_v24, %v1361_v63  ;;  %v1363_v52 = vadd.f32 %v6325_v32, %v6547_v59 }
 0x1a5   :  { %v1157_v15 = vpop.f32.mrf.mxu0  ;;  %v6641_v35 = vsel %vm2709_vm1, %v2708_v28, %v2703_v34  ;;  %v6646_v5 = vpop.xlane.xlu0 %2030  ;;  %v1791_v46 = vmax.f32 %v1663_v9, 0.0  ;;  %v1790_v28 = vmax.f32 %v1662_v62, 0.0  ;;  %v1793_v30 = vmax.f32 %v1665_v4, 0.0 }
 0x1a6   :  { %2204 = vadd.xlane.f32.xlu1 %v2203_v10  ;;  %v2236_v10 = vsel %vm7632_vm0, %v1922_v54, 0.0  ;;  %v1366_v63 = vadd.f32 %v6325_v32, %v6555_v22  ;;  %v1923_v59 = vmul.f32 %v6334_v20, %v1788_v27  ;;  %v1667_v47 = vadd.f32 %v5790_v24, %v1364_v17 }
 0x1a7   :  { %v2007_v11 = vpop.xlane.xlu1 %2006  ;;  %v6652_v41 = vpop.f32.mrf.mxu0  ;;  %v2718_v61 = vrot.slane %v2360_v19, %v6309_v58  ;;  %v1921_v9 = vmul.f32 %v6334_v20, %v1786_v18  ;;  %v6668_v62 = vadd.f32 %v6325_v32, %v5698_v23  ;;  %v1792_v54 = vmax.f32 %v1664_v50, 0.0 }
 0x1a8   :  { %v2359_v12 = vadd.f32 %v6281_v7, %v2007_v11  ;;  %2231 = vadd.xlane.f32.xlu0 %v2230_v40  ;;  %v1666_v22 = vadd.f32 %v5790_v24, %v1363_v52  ;;  %v2227_v4 = vsel %vm7632_vm0, %v1919_v13, 0.0  ;;  %v1372_v17 = vadd.f32 %v6325_v32, %v4537_v51 }
 0x1a9   :  { %v6663_v44 = vpop.xlane.xlu0 %2039  ;;  %v6671_v27 = vpop.f32.mrf.mxu0  ;;  %v1926_v11 = vmul.f32 %v6334_v20, %v1791_v46  ;;  %v6678_v18 = vmul.f32 %v6334_v20, %v1789_v38  ;;  %v1669_v23 = vadd.f32 %v5790_v24, %v1366_v63  ;;  %v2239_v50 = vsel %vm7632_vm0, %v1923_v59, 0.0 }
 0x1aa   :  { %v2714_v26 = vrot.slane %v2359_v12, %v6293_v21  ;;  %2237 = vadd.xlane.f32.xlu1 %v2236_v10  ;;  %v1925_v52 = vmul.f32 %v6334_v20, %v1790_v28  ;;  %v1928_v40 = vmul.f32 %v6334_v20, %v1793_v30  ;;  %v1795_v12 = vmax.f32 %v1667_v47, 0.0 }
 0x1ab   :  { %v2016_v34 = vpop.xlane.xlu1 %2015  ;;  %v1365_v51 = vadd.f32 %v6325_v32, %v6566_v55  ;;  %v1371_v13 = vadd.f32 %v6325_v32, %v1157_v15  ;;  %v2233_v38 = vsel %vm7632_vm0, %v1921_v9, 0.0  ;;  %v1794_v10 = vmax.f32 %v1666_v22, 0.0 }
 0x1ac   :  { %v2719_v19 = vsel %vm2611_vm2, %v2718_v61, %v2714_v26  ;;  %2228 = vadd.xlane.f32.xlu0 %v2227_v4  ;;  %v1368_v63 = vadd.f32 %v6325_v32, %v6575_v6  ;;  %v2362_v59 = vadd.f32 %v6281_v7, %v2016_v34  ;;  %v4543_v61 = vpop.f32.mrf.mxu0  ;;  %v1927_v30 = vmul.f32 %v6334_v20, %v1792_v54 }
 0x1ad   :  { %v2037_v46 = vpop.xlane.xlu0 %2036  ;;  %v2363_v47 = vadd.f32 %v6281_v7, %v6605_v0  ;;  %v1675_v55 = vadd.f32 %v5790_v24, %v1372_v17  ;;  %v2248_v26 = vsel %vm7632_vm0, %v1926_v11, 0.0  ;;  %v1797_v9 = vmax.f32 %v1669_v23, 0.0 }
 0x1ae   :  { %2240 = vadd.xlane.f32.xlu1 %v2239_v50  ;;  %v2364_v22 = vadd.f32 %v6281_v7, %v6580_v3  ;;  %v2245_v6 = vsel %vm7632_vm0, %v1925_v52, 0.0  ;;  %v2254_v34 = vsel %vm7632_vm0, %v1928_v40, 0.0  ;;  %v1668_v54 = vadd.f32 %v5790_v24, %v1365_v51  ;;  %v6709_v23 = vpop.f32.mrf.mxu0 }
 0x1af   :  { %v2013_v28 = vpop.xlane.xlu1 %2012  ;;  %v1674_v4 = vadd.f32 %v5790_v24, %v1371_v13  ;;  %v1930_v50 = vmul.f32 %v6334_v20, %v1795_v12  ;;  %v6706_v11 = vadd.f32 %v5790_v24, %v1368_v63  ;;  %v2728_v3 = vrot.slane %v2362_v59, %v6354_v1 }
 0x1b0   :  { %v2361_v15 = vadd.f32 %v6281_v7, %v2013_v28  ;;  %2234 = vadd.xlane.f32.xlu0 %v2233_v38  ;;  %v2251_v40 = vsel %vm7632_vm0, %v1927_v30, 0.0  ;;  %v1929_v51 = vmul.f32 %v6334_v20, %v1794_v10  ;;  %v2733_v13 = vrot.slane %v2363_v47, %v6306_v57 }
 0x1b1   :  { %v2046_v17 = vpop.xlane.xlu0 %2045  ;;  %v1803_v38 = vmax.f32 %v1675_v55, 0.0  ;;  %v1376_v28 = vadd.f32 %v6325_v32, %v4543_v61  ;;  %v2738_v12 = vrot.slane %v2364_v22, %v6312_v43  ;;  %v1367_v63 = vadd.f32 %v6325_v32, %v6585_v36  ;;  %v4546_v55 = vpop.f32.mrf.mxu0 }
 0x1b2   :  { %v2723_v0 = vrot.slane %v2361_v15, %v6319_v39  ;;  %2249 = vadd.xlane.f32.xlu1 %v2248_v26  ;;  %v1932_v26 = vmul.f32 %v6334_v20, %v1797_v9  ;;  %v1796_v30 = vmax.f32 %v1668_v54, 0.0  ;;  %v1802_v53 = vmax.f32 %v1674_v4, 0.0 }
 0x1b3   :  { %v2028_v52 = vpop.xlane.xlu1 %2027  ;;  %v2260_v61 = vsel %vm7632_vm0, %v1930_v50, 0.0  ;;  %v1799_v9 = vmax.f32 %v6706_v11, 0.0  ;;  %v1938_v4 = vmul.f32 %v6334_v20, %v1803_v38  ;;  %v6733_v50 = vadd.f32 %v5790_v24, %v1367_v63 }
 0x1b4   :  { %v2724_v15 = vsel %vm2618_vm3, %v2723_v0, %v2719_v19  ;;  %2246 = vadd.xlane.f32.xlu0 %v2245_v6  ;;  %v2367_v19 = vadd.f32 %v6281_v7, %v6646_v5  ;;  %v2366_v22 = vadd.f32 %v6281_v7, %v2028_v52  ;;  %v2257_v6 = vsel %vm7632_vm0, %v1929_v51, 0.0 }
 0x1b5   :  { %v2729_v59 = vsel %vm2625_vm4, %v2728_v3, %v2724_v15  ;;  %v2043_v47 = vpop.xlane.xlu0 %2042  ;;  %v1370_v5 = vadd.f32 %v6325_v32, %v6600_v31  ;;  %v2368_v3 = vadd.f32 %v6281_v7, %v6626_v56  ;;  %v2266_v52 = vsel %vm7632_vm0, %v1932_v26, 0.0 }
 0x1b6   :  { %2255 = vadd.xlane.f32.xlu1 %v2254_v34  ;;  %v2734_v10 = vsel %vm2632_vm5, %v2733_v13, %v2729_v59  ;;  %v1679_v34 = vadd.f32 %v5863_v29, %v1376_v28  ;;  %v2370_v51 = vadd.f32 %v6281_v7, %v6663_v44  ;;  %v2369_v13 = vadd.f32 %v6281_v7, %v2037_v46 }
 0x1b7   :  { %v2739_v36 = vsel %vm7630_vm6, %v2738_v12, %v2734_v10  ;;  %v2025_v0 = vpop.xlane.xlu1 %2024  ;;  %v1937_v15 = vmul.f32 %v6334_v20, %v1802_v53  ;;  %v2753_v12 = vrot.slane %v2367_v19, %v6346_v49  ;;  %v1378_v31 = vadd.f32 %v6325_v32, %v4546_v55 }
 0x1b8   :  { %v2365_v54 = vadd.f32 %v6281_v7, %v2025_v0  ;;  %2252 = vadd.xlane.f32.xlu0 %v2251_v40  ;;  %v2748_v56 = vrot.slane %v2366_v22, %v6395_v33  ;;  %v1187_v40 = vpop.f32.mrf.mxu0  ;;  %vm7631_vm6 = vcmask 1041409   ;;  %v1931_v59 = vmul.f32 %v6334_v20, %v1796_v30 }
 0x1b9   :  { %v2052_v38 = vpop.xlane.xlu0 %2051  ;;  %v1807_v44 = vmax.f32 %v1679_v34, 0.0  ;;  %v2371_v26 = vadd.f32 %v6281_v7, %v2043_v47  ;;  %v2284_v10 = vsel %vm7632_vm0, %v1938_v4, 0.0  ;;  %v1798_v53 = vmax.f32 %v6733_v50, 0.0 }
 0x1ba   :  { %v2743_v28 = vrot.slane %v2365_v54, %v6374_v14  ;;  %2261 = vadd.xlane.f32.xlu1 %v2260_v61  ;;  %v2758_v61 = vrot.slane %v2368_v3, %v6371_v60  ;;  %v2372_v19 = vadd.f32 %v6281_v7, %v2046_v17  ;;  %v2768_v22 = vrot.slane %v2370_v51, %v6407_v8  ;;  %v4549_v54 = vpop.f32.mrf.mxu0 }
 0x1bb   :  { %v2058_v63 = vpop.xlane.xlu1 %2057  ;;  %v2763_v30 = vrot.slane %v2369_v13, %v6384_v48  ;;  %v2281_v47 = vsel %vm7632_vm0, %v1937_v15, 0.0  ;;  %v1681_v34 = vadd.f32 %v5863_v29, %v1378_v31  ;;  %v2374_v17 = vadd.f32 %v6281_v7, %v2052_v38 }
 0x1bc   :  { %v2744_v46 = vsel %vm2646_vm7, %v2743_v28, %v2739_v36  ;;  %2285 = vadd.xlane.f32.xlu0 %v2284_v10  ;;  %v1377_v51 = vadd.f32 %v6325_v32, %v1187_v40  ;;  %v2773_v28 = vrot.slane %v2371_v26, %v6539_v45  ;;  %v2778_v15 = vrot.slane %v2372_v19, %v6423_v25 }
 0x1bd   :  { %v2749_v55 = vsel %vm2653_vm8, %v2748_v56, %v2744_v46  ;;  %v2049_v36 = vpop.xlane.xlu0 %2048  ;;  %v2376_v31 = vadd.f32 %v6281_v7, %v2058_v63  ;;  %v6773_v38 = vadd.f32 %v5790_v24, %v1370_v5  ;;  %v1369_v40 = vadd.f32 %v6325_v32, %v6610_v2 }
 0x1be   :  { %v2754_v0 = vsel %vm2660_vm9, %v2753_v12, %v2749_v55  ;;  %2258 = vadd.xlane.f32.xlu1 %v2257_v6  ;;  %v2373_v50 = vadd.f32 %v6281_v7, %v2049_v36  ;;  %v1942_v6 = vmul.f32 %v6334_v20, %v1807_v44  ;;  %v2263_v44 = vsel %vm7632_vm0, %v1931_v59, 0.0 }
 0x1bf   :  { %v2759_v4 = vsel %vm2667_vm10, %v2758_v61, %v2754_v0  ;;  %v2064_v3 = vpop.xlane.xlu1 %2063  ;;  %v1809_v10 = vmax.f32 %v1681_v34, 0.0  ;;  %v1197_v61 = vpop.f32.mrf.mxu0  ;;  %v2788_v19 = vrot.slane %v2374_v17, %v6590_v42  ;;  %v1680_v5 = vadd.f32 %v5863_v29, %v1377_v51 }
 0x1c0   :  { %v2764_v13 = vsel %vm2674_vm11, %v2763_v30, %v2759_v4  ;;  %v2783_v56 = vrot.slane %v2373_v50, %v6597_v37  ;;  %2282 = vadd.xlane.f32.xlu0 %v2281_v47  ;;  %v1380_v30 = vadd.f32 %v6325_v32, %v4549_v54  ;;  %v2797_v0 = vrot.slane %v2376_v31, %v6309_v58 }
 0x1c1   :  { %v2769_v12 = vsel %vm2681_vm12, %v2768_v22, %v2764_v13  ;;  %v2055_v26 = vpop.xlane.xlu0 %2054  ;;  %v1934_v47 = vmul.f32 %v6334_v20, %v1799_v9  ;;  %v1672_v34 = vadd.f32 %v5790_v24, %v1369_v40  ;;  %v2378_v4 = vadd.f32 %v6281_v7, %v2064_v3  ;;  %v4552_v13 = vpop.f32.mrf.mxu0 }
 0x1c2   :  { %v2774_v46 = vsel %vm2688_vm13, %v2773_v28, %v2769_v12  ;;  %2267 = vadd.xlane.f32.xlu1 %v2266_v52  ;;  %v2375_v55 = vadd.f32 %v6281_v7, %v2055_v26  ;;  %v2296_v52 = vsel %vm7632_vm0, %v1942_v6, 0.0  ;;  %v1933_v50 = vmul.f32 %v6334_v20, %v1798_v53 }
 0x1c3   :  { %v2779_v63 = vsel %vm2695_vm14, %v2778_v15, %v2774_v46  ;;  %v2067_v22 = vpop.xlane.xlu1 %2066  ;;  %v1379_v51 = vadd.f32 %v6325_v32, %v1197_v61  ;;  %v1808_v15 = vmax.f32 %v1680_v5, 0.0  ;;  %v2242_v3 = vsel %vm7632_vm0, %v6678_v18, 0.0 }
 0x1c4   :  { %v2784_v2 = vsel %vm2702_vm15, %v2783_v56, %v2779_v63  ;;  %v2793_v36 = vrot.slane %v2375_v55, %v6293_v21  ;;  %2297 = vadd.xlane.f32.xlu0 %v2296_v52  ;;  %v2379_v11 = vadd.f32 %v6281_v7, %v2067_v22  ;;  %v1944_v12 = vmul.f32 %v6334_v20, %v1809_v10  ;;  %v1207_v22 = vpop.f32.mrf.mxu0 }
 0x1c5   :  { %v2789_v59 = vsel %vm2709_vm1, %v2788_v19, %v2784_v2  ;;  %v2061_v17 = vpop.xlane.xlu0 %2060  ;;  %v1801_v53 = vmax.f32 %v6773_v38, 0.0  ;;  %v1375_v31 = vadd.f32 %v6325_v32, %v6709_v23  ;;  %v2272_v40 = vsel %vm7632_vm0, %v1934_v47, 0.0 }
 0x1c6   :  { %v6795_v54 = vsel %vm7631_vm6, %v2789_v59, %v6641_v35  ;;  %2264 = vadd.xlane.f32.xlu1 %v2263_v44  ;;  %v2798_v28 = vsel %vm2611_vm2, %v2797_v0, %v2793_v36  ;;  %v2377_v9 = vadd.f32 %v6281_v7, %v2061_v17  ;;  %v1683_v35 = vadd.f32 %v5863_v29, %v1380_v30 }
 0x1c7   :  { %v2076_v6 = vpop.xlane.xlu1 %2075  ;;  %v1800_v46 = vmax.f32 %v1672_v34, 0.0  ;;  %v1382_v26 = vadd.f32 %v6325_v32, %v4552_v13  ;;  %v2807_v44 = vrot.slane %v2378_v4, %v6354_v1  ;;  %v2269_v18 = vsel %vm7632_vm0, %v1933_v50, 0.0  ;;  %v6831_v4 = vld [vmem:[%s7619_s6] ss:$0 sm:$0xff] }
 0x1c8   :  { %v2802_v56 = vrot.slane %v2377_v9, %v6319_v39  ;;  %2243 = vadd.xlane.f32.xlu0 %v2242_v3  ;;  %v1682_v10 = vadd.f32 %v5863_v29, %v1379_v51  ;;  %v2812_v38 = vrot.slane %v2379_v11, %v6306_v57  ;;  %v1811_v55 = vmax.f32 %v1683_v35, 0.0 }
 0x1c9   :  { %v2070_v61 = vpop.xlane.xlu0 %2069  ;;  %v2302_v32 = vsel %vm7632_vm0, %v1944_v12, 0.0  ;;  %v1943_v30 = vmul.f32 %v6334_v20, %v1808_v15  ;;  %v1678_v2 = vadd.f32 %v5863_v29, %v1375_v31  ;;  %v1936_v59 = vmul.f32 %v6334_v20, %v1801_v53  ;;  %v4876_v20 = vld [vmem:[%s7616_s3] ss:$0 sm:$0xff] }
 0x1ca   :  { %2273 = vadd.xlane.f32.xlu1 %v2272_v40  ;;  %v2803_v23 = vsel %vm2618_vm3, %v2802_v56, %v2798_v28  ;;  %v2380_v19 = vadd.f32 %v6281_v7, %v2070_v61  ;;  %v1685_v36 = vadd.f32 %v5863_v29, %v1382_v26  ;;  %v2382_v47 = vadd.f32 %v6281_v7, %v2076_v6 }
 0x1cb   :  { %v2082_v63 = vpop.xlane.xlu1 %2081  ;;  %v2808_v5 = vsel %vm2625_vm4, %v2807_v44, %v2803_v23  ;;  %v1935_v17 = vmul.f32 %v6831_v4, %v1800_v46  ;;  %v1690_v50 = vadd.f32 %v5863_v29, %v6668_v62  ;;  %v1810_v51 = vmax.f32 %v1682_v10, 0.0 }
 0x1cc   :  { %v2813_v52 = vsel %vm2632_vm5, %v2812_v38, %v2808_v5  ;;  %v2817_v0 = vrot.slane %v2380_v19, %v6312_v43  ;;  %2303 = vadd.xlane.f32.xlu0 %v2302_v32  ;;  %v1381_v13 = vadd.f32 %v4876_v20, %v1207_v22  ;;  %vm7644_vm6 = vcmask 392512  }
 0x1cd   :  { %v2073_v34 = vpop.xlane.xlu0 %2072  ;;  %v2384_v6 = vadd.f32 %v6281_v7, %v2082_v63  ;;  %v2299_v35 = vsel %vm7632_vm0, %v1943_v30, 0.0  ;;  %v1946_v3 = vmul.f32 %v6831_v4, %v1811_v55  ;;  %v1373_v62 = vadd.f32 %v4876_v20, %v6671_v27 }
 0x1ce   :  { %2270 = vadd.xlane.f32.xlu1 %v2269_v18  ;;  %v2818_v28 = vsel %vm7644_vm6, %v2817_v0, %v2813_v52  ;;  %v2381_v11 = vadd.f32 %v6281_v7, %v2073_v34  ;;  %v1806_v12 = vmax.f32 %v1678_v2, 0.0  ;;  %v2278_v31 = vsel %vm7632_vm0, %v1936_v59, 0.0  ;;  %v7645_v2 = vld [vmem:[#allocation9_spill] sm:$0xff] }
 0x1cf   :  { %v2079_v9 = vpop.xlane.xlu1 %2078  ;;  %v1388_v56 = vadd.f32 %v4876_v20, %v5692_v16  ;;  %v1374_v40 = vadd.f32 %v4876_v20, %v6652_v41  ;;  %v2827_v46 = vrot.slane %v2382_v47, %v6395_v33  ;;  %v1818_v44 = vmax.f32 %v1690_v50, 0.0 }
 0x1d0   :  { %v2383_v15 = vadd.f32 %v6281_v7, %v2079_v9  ;;  %v2822_v53 = vrot.slane %v2381_v11, %v6374_v14  ;;  %2300 = vadd.xlane.f32.xlu0 %v2299_v35  ;;  %v1813_v61 = vmax.f32 %v1685_v36, 0.0  ;;  %v1684_v18 = vadd.f32 %v5863_v29, %v1381_v13  ;;  %v7646_v9 = vld [vmem:[#allocation10_spill] sm:$0xff] }
 0x1d1   :  { %v6851_v26 = vpop.xlane.xlu0 %2105  ;;  %v2837_v23 = vrot.slane %v2384_v6, %v6371_v60  ;;  %v2308_v41 = vsel %vm7632_vm0, %v1946_v3, 0.0  ;;  %v1945_v19 = vmul.f32 %v6831_v4, %v1810_v51  ;;  %v1676_v63 = vadd.f32 %v5790_v24, %v1373_v62 }
 0x1d2   :  { %2279 = vadd.xlane.f32.xlu1 %v2278_v31  ;;  %v2823_v27 = vsel %vm2646_vm7, %v2822_v53, %v2818_v28  ;;  %v2832_v10 = vrot.slane %v2383_v15, %v6346_v49  ;;  %v2275_v22 = vsel %vm7632_vm0, %v1935_v17, 0.0  ;;  %v1941_v5 = vmul.f32 %v6831_v4, %v1806_v12 }
 0x1d3   :  { %v2088_v38 = vpop.xlane.xlu1 %2087  ;;  %v2828_v16 = vsel %vm2653_vm8, %v2827_v46, %v2823_v27  ;;  %v1390_v52 = vadd.f32 %v4876_v20, %v7645_v2  ;;  %v1691_v36 = vadd.f32 %v5863_v29, %v1388_v56  ;;  %v1812_v47 = vmax.f32 %v1684_v18, 0.0 }
 0x1d4   :  { %v2833_v55 = vsel %vm2660_vm9, %v2832_v10, %v2828_v16  ;;  %2309 = vadd.xlane.f32.xlu0 %v2308_v41  ;;  %v2386_v0 = vadd.f32 %v6281_v7, %v2088_v38  ;;  %v2305_v17 = vsel %vm7632_vm0, %v1945_v19, 0.0  ;;  %v1948_v50 = vmul.f32 %v6831_v4, %v1813_v61 }
 0x1d5   :  { %v2838_v32 = vsel %vm2667_vm10, %v2837_v23, %v2833_v55  ;;  %v6865_v30 = vpop.xlane.xlu0 %2111  ;;  %v1677_v51 = vadd.f32 %v5790_v24, %v1374_v40  ;;  %v1804_v13 = vmax.f32 %v1676_v63, 0.0  ;;  %v2293_v28 = vsel %vm7632_vm0, %v1941_v5, 0.0 }
 0x1d6   :  { %2276 = vadd.xlane.f32.xlu1 %v2275_v22  ;;  %v1953_v11 = vmul.f32 %v6831_v4, %v1818_v44  ;;  %v1389_v6 = vadd.f32 %v4876_v20, %v7646_v9  ;;  %v2847_v3 = vrot.slane %v2386_v0, %v6407_v8  ;;  %v1819_v12 = vmax.f32 %v1691_v36, 0.0 }
 0x1d7   :  { %v2085_v59 = vpop.xlane.xlu1 %2084  ;;  %v1693_v53 = vadd.f32 %v5863_v29, %v1390_v52  ;;  %v2314_v31 = vsel %vm7632_vm0, %v1948_v50, 0.0  ;;  %v1947_v56 = vmul.f32 %v6831_v4, %v1812_v47  ;;  %v1805_v46 = vmax.f32 %v1677_v51, 0.0 }
 0x1d8   :  { %v2385_v34 = vadd.f32 %v6281_v7, %v2085_v59  ;;  %2306 = vadd.xlane.f32.xlu0 %v2305_v17  ;;  %v1692_v40 = vadd.f32 %v5863_v29, %v1389_v6  ;;  %v2329_v20 = vsel %vm7632_vm0, %v1953_v11, 0.0  ;;  %v1939_v61 = vmul.f32 %v6831_v4, %v1804_v13 }
 0x1d9   :  { %v2109_v35 = vpop.xlane.xlu0 %2108  ;;  %v2311_v23 = vsel %vm7632_vm0, %v1947_v56, 0.0  ;;  %v1954_v16 = vmul.f32 %v6831_v4, %v1819_v12  ;;  %v1940_v19 = vmul.f32 %v6831_v4, %v1805_v46  ;;  %v1821_v63 = vmax.f32 %v1693_v53, 0.0 }
 0x1da   :  { %v2842_v15 = vrot.slane %v2385_v34, %v6384_v48  ;;  %2294 = vadd.xlane.f32.xlu1 %v2293_v28  ;;  %v1820_v29 = vmax.f32 %v1692_v40, 0.0  ;;  %v2287_v41 = vsel %vm7632_vm0, %v1939_v61, 0.0  ;;  %v2392_v11 = vadd.f32 %v6281_v7, %v6851_v26 }
 0x1db   :  { %v2094_v62 = vpop.xlane.xlu1 %2093  ;;  %v2332_v52 = vsel %vm7632_vm0, %v1954_v16, 0.0  ;;  %v2290_v59 = vsel %vm7632_vm0, %v1940_v19, 0.0  ;;  %v1956_v47 = vmul.f32 %v6831_v4, %v1821_v63  ;;  %vm3266_vm6 = vcmask 1042434  }
 0x1dc   :  { %v2843_v24 = vsel %vm2674_vm11, %v2842_v15, %v2838_v32  ;;  %2315 = vadd.xlane.f32.xlu0 %v2314_v31  ;;  %v2388_v27 = vadd.f32 %v6281_v7, %v2094_v62  ;;  %v1955_v0 = vmul.f32 %v6831_v4, %v1820_v29  ;;  %v2393_v4 = vadd.f32 %v6281_v7, %v2109_v35 }
 0x1dd   :  { %v2848_v44 = vsel %vm2681_vm12, %v2847_v3, %v2843_v24  ;;  %v2124_v18 = vpop.xlane.xlu0 %2123  ;;  %v2338_v28 = vsel %vm7632_vm0, %v1956_v47, 0.0  ;;  %v2394_v62 = vadd.f32 %v6281_v7, %v6865_v30  ;;  %v2876_v26 = vrot.slane %v2392_v11, %v6309_v58 }
 0x1de   :  { %2330 = vadd.xlane.f32.xlu1 %v2329_v20  ;;  %v2857_v5 = vrot.slane %v2388_v27, %v6423_v25  ;;  %v2335_v13 = vsel %vm7632_vm0, %v1955_v0, 0.0  ;;  %v2881_v40 = vrot.slane %v2393_v4, %v6319_v39  ;;  %v2398_v16 = vadd.f32 %v6281_v7, %v2124_v18 }
 0x1df   :  { %v2091_v10 = vpop.xlane.xlu1 %2090  ;;  %v2886_v20 = vrot.slane %v2394_v62, %v6354_v1  ;;  %vm7647_vm0 = vcmask 392512  }
 0x1e0   :  { %v2387_v38 = vadd.f32 %v6281_v7, %v2091_v10  ;;  %2312 = vadd.xlane.f32.xlu0 %v2311_v23 }
 0x1e1   :  { %v2121_v22 = vpop.xlane.xlu0 %2120 }
 0x1e2   :  { %v2852_v55 = vrot.slane %v2387_v38, %v6539_v45  ;;  %2288 = vadd.xlane.f32.xlu1 %v2287_v41 }
 0x1e3   :  { %v2100_v32 = vpop.xlane.xlu1 %2099 }
 0x1e4   :  { %v2853_v2 = vsel %vm2688_vm13, %v2852_v55, %v2848_v44  ;;  %2333 = vadd.xlane.f32.xlu0 %v2332_v52  ;;  %v2390_v17 = vadd.f32 %v6281_v7, %v2100_v32  ;;  %v2906_v52 = vrot.slane %v2398_v16, %v6395_v33 }
 0x1e5   :  { %v2858_v36 = vsel %vm2695_vm14, %v2857_v5, %v2853_v2  ;;  %v2130_v34 = vpop.xlane.xlu0 %2129 }
 0x1e6   :  { %2291 = vadd.xlane.f32.xlu1 %v2290_v59  ;;  %v2867_v15 = vrot.slane %v2390_v17, %v6590_v42  ;;  %v2400_v63 = vadd.f32 %v6281_v7, %v2130_v34 }
 0x1e7   :  { %v2097_v50 = vpop.xlane.xlu1 %2096 }
 0x1e8   :  { %v2389_v51 = vadd.f32 %v6281_v7, %v2097_v50  ;;  %2336 = vadd.xlane.f32.xlu0 %v2335_v13  ;;  %v2916_v34 = vrot.slane %v2400_v63, %v6371_v60 }
 0x1e9   :  { %v2127_v6 = vpop.xlane.xlu0 %2126 }
 0x1ea   :  { %v2862_v9 = vrot.slane %v2389_v51, %v6597_v37  ;;  %2339 = vadd.xlane.f32.xlu1 %v2338_v28  ;;  %v2399_v29 = vadd.f32 %v6281_v7, %v2127_v6 }
 0x1eb   :  { %v2103_v3 = vpop.xlane.xlu1 %2102 }
 0x1ec   :  { %v2863_v12 = vsel %vm2702_vm15, %v2862_v9, %v2858_v36  ;;  %v2391_v53 = vadd.f32 %v6281_v7, %v2103_v3  ;;  %v2911_v59 = vrot.slane %v2399_v29, %v6346_v49 }
 0x1ed   :  { %v2868_v24 = vsel %vm2709_vm1, %v2867_v15, %v2863_v12  ;;  %v2136_v56 = vpop.xlane.xlu0 %2135 }
 0x1ee   :  { %v3267_v31 = vsel %vm3266_vm6, %v2868_v24, %v6795_v54  ;;  %v2872_v35 = vrot.slane %v2391_v53, %v6293_v21  ;;  %v2397_v54 = vadd.f32 %v6281_v7, %v2121_v22  ;;  %v2402_v18 = vadd.f32 %v6281_v7, %v2136_v56 }
 0x1ef   :  { %v2118_v46 = vpop.xlane.xlu1 %2117 }
 0x1f0   :  { %v2877_v30 = vsel %vm2611_vm2, %v2876_v26, %v2872_v35  ;;  %v2396_v10 = vadd.f32 %v6281_v7, %v2118_v46  ;;  %v2901_v32 = vrot.slane %v2397_v54, %v6374_v14  ;;  %v2926_v9 = vrot.slane %v2402_v18, %v6407_v8 }
 0x1f1   :  { %v2882_v44 = vsel %vm2618_vm3, %v2881_v40, %v2877_v30  ;;  %v2133_v27 = vpop.xlane.xlu0 %2132 }
 0x1f2   :  { %v2887_v61 = vsel %vm2625_vm4, %v2886_v20, %v2882_v44  ;;  %v2896_v55 = vrot.slane %v2396_v10, %v6312_v43  ;;  %v2401_v22 = vadd.f32 %v6281_v7, %v2133_v27 }
 0x1f3   :  { %v2115_v38 = vpop.xlane.xlu1 %2114 }
 0x1f4   :  { %v2395_v23 = vadd.f32 %v6281_v7, %v2115_v38  ;;  %v2921_v11 = vrot.slane %v2401_v22, %v6384_v48 }
 0x1f5   :  { %v2142_v19 = vpop.xlane.xlu0 %2141 }
 0x1f6   :  { %v2891_v41 = vrot.slane %v2395_v23, %v6306_v57  ;;  %v2404_v50 = vadd.f32 %v6281_v7, %v2142_v19 }
 0x1f7   :  { %v2148_v5 = vpop.xlane.xlu1 %2147 }
 0x1f8   :  { %v2892_v2 = vsel %vm2632_vm5, %v2891_v41, %v2887_v61  ;;  %v2406_v3 = vadd.f32 %v6281_v7, %v2148_v5  ;;  %v2936_v12 = vrot.slane %v2404_v50, %v6423_v25 }
 0x1f9   :  { %v2897_v0 = vsel %vm7647_vm0, %v2896_v55, %v2892_v2  ;;  %v2139_v47 = vpop.xlane.xlu0 %2138  ;;  %vm7633_vm0 = vcmask 1043459  }
 0x1fa   :  { %v2902_v36 = vsel %vm2646_vm7, %v2901_v32, %v2897_v0  ;;  %v2403_v51 = vadd.f32 %v6281_v7, %v2139_v47  ;;  %v2946_v20 = vrot.slane %v2406_v3, %v6590_v42 }
 0x1fb   :  { %v2907_v17 = vsel %vm2653_vm8, %v2906_v52, %v2902_v36  ;;  %v2151_v13 = vpop.xlane.xlu1 %2150 }
 0x1fc   :  { %v2912_v28 = vsel %vm2660_vm9, %v2911_v59, %v2907_v17  ;;  %v2931_v4 = vrot.slane %v2403_v51, %v6539_v45  ;;  %v2407_v56 = vadd.f32 %v6281_v7, %v2151_v13 }
 0x1fd   :  { %v2917_v6 = vsel %vm2667_vm10, %v2916_v34, %v2912_v28  ;;  %v2145_v62 = vpop.xlane.xlu0 %2144 }
 0x1fe   :  { %v2922_v15 = vsel %vm2674_vm11, %v2921_v11, %v2917_v6  ;;  %v2405_v24 = vadd.f32 %v6281_v7, %v2145_v62  ;;  %v2951_v54 = vrot.slane %v2407_v56, %v6293_v21 }
 0x1ff   :  { %v2927_v53 = vsel %vm2681_vm12, %v2926_v9, %v2922_v15  ;;  %v2157_v26 = vpop.xlane.xlu1 %2156 }
 0x200   :  { %v2932_v35 = vsel %vm2688_vm13, %v2931_v4, %v2927_v53  ;;  %v2941_v46 = vrot.slane %v2405_v24, %v6597_v37  ;;  %v2409_v30 = vadd.f32 %v6281_v7, %v2157_v26 }
 0x201   :  { %v2937_v40 = vsel %vm2695_vm14, %v2936_v12, %v2932_v35  ;;  %v2154_v44 = vpop.xlane.xlu0 %2153 }
 0x202   :  { %v2942_v61 = vsel %vm2702_vm15, %v2941_v46, %v2937_v40  ;;  %v2408_v27 = vadd.f32 %v6281_v7, %v2154_v44  ;;  %v2960_v29 = vrot.slane %v2409_v30, %v6319_v39 }
 0x203   :  { %v2166_v10 = vpop.xlane.xlu1 %2165  ;;  %v2947_v38 = vsel %vm2709_vm1, %v2946_v20, %v2942_v61 }
 0x204   :  { %v6965_v23 = vsel %vm7633_vm0, %v2947_v38, %v3267_v31  ;;  %v2955_v16 = vrot.slane %v2408_v27, %v6309_v58  ;;  %v2412_v2 = vadd.f32 %v6281_v7, %v2166_v10  ;;  %vm7648_vm0 = vcmask 392512  }
 0x205   :  { %v2160_v41 = vpop.xlane.xlu0 %2159 }
 0x206   :  { %v2956_v19 = vsel %vm2611_vm2, %v2955_v16, %v2951_v54  ;;  %v2410_v63 = vadd.f32 %v6281_v7, %v2160_v41  ;;  %v2975_v47 = vrot.slane %v2412_v2, %v6312_v43 }
 0x207   :  { %v2172_v55 = vpop.xlane.xlu1 %2171  ;;  %v2961_v5 = vsel %vm2618_vm3, %v2960_v29, %v2956_v19 }
 0x208   :  { %v2965_v32 = vrot.slane %v2410_v63, %v6354_v1  ;;  %v2414_v0 = vadd.f32 %v6281_v7, %v2172_v55 }
 0x209   :  { %v2163_v22 = vpop.xlane.xlu0 %2162 }
 0x20a   :  { %v2966_v31 = vsel %vm2625_vm4, %v2965_v32, %v2961_v5  ;;  %v2411_v52 = vadd.f32 %v6281_v7, %v2163_v22  ;;  %v2985_v13 = vrot.slane %v2414_v0, %v6395_v33 }
 0x20b   :  { %v2169_v18 = vpop.xlane.xlu1 %2168 }
 0x20c   :  { %v2413_v59 = vadd.f32 %v6281_v7, %v2169_v18  ;;  %v2970_v36 = vrot.slane %v2411_v52, %v6306_v57 }
 0x20d   :  { %v2196_v34 = vpop.xlane.xlu0 %2195 }
 0x20e   :  { %v2971_v17 = vsel %vm2632_vm5, %v2970_v36, %v2966_v31  ;;  %v2980_v50 = vrot.slane %v2413_v59, %v6374_v14  ;;  %v2422_v63 = vadd.f32 %v6281_v7, %v2196_v34 }
 0x20f   :  { %v2178_v51 = vpop.xlane.xlu1 %2177  ;;  %v2976_v28 = vsel %vm7648_vm0, %v2975_v47, %v2971_v17  ;;  %vm7634_vm0 = vcmask 1044484  }
 0x210   :  { %v2981_v11 = vsel %vm2646_vm7, %v2980_v50, %v2976_v28  ;;  %v2416_v4 = vadd.f32 %v6281_v7, %v2178_v51  ;;  %v3025_v52 = vrot.slane %v2422_v63, %v6590_v42 }
 0x211   :  { %v2986_v9 = vsel %vm2653_vm8, %v2985_v13, %v2981_v11  ;;  %v2193_v6 = vpop.xlane.xlu0 %2192 }
 0x212   :  { %v2995_v53 = vrot.slane %v2416_v4, %v6371_v60  ;;  %v2421_v41 = vadd.f32 %v6281_v7, %v2193_v6 }
 0x213   :  { %v2175_v15 = vpop.xlane.xlu1 %2174 }
 0x214   :  { %v2415_v3 = vadd.f32 %v6281_v7, %v2175_v15  ;;  %v3020_v22 = vrot.slane %v2421_v41, %v6597_v37 }
 0x215   :  { %v2199_v12 = vpop.xlane.xlu0 %2198 }
 0x216   :  { %v2990_v62 = vrot.slane %v2415_v3, %v6346_v49  ;;  %v2423_v50 = vadd.f32 %v6281_v7, %v2199_v12 }
 0x217   :  { %v2184_v24 = vpop.xlane.xlu1 %2183 }
 0x218   :  { %v2991_v26 = vsel %vm2660_vm9, %v2990_v62, %v2986_v9  ;;  %v2418_v40 = vadd.f32 %v6281_v7, %v2184_v24  ;;  %v3030_v4 = vrot.slane %v2423_v50, %v6293_v21 }
 0x219   :  { %v2996_v35 = vsel %vm2667_vm10, %v2995_v53, %v2991_v26  ;;  %v2214_v56 = vpop.xlane.xlu0 %2213 }
 0x21a   :  { %v3005_v61 = vrot.slane %v2418_v40, %v6407_v8  ;;  %v2428_v15 = vadd.f32 %v6281_v7, %v2214_v56 }
 0x21b   :  { %v2181_v46 = vpop.xlane.xlu1 %2180 }
 0x21c   :  { %v2417_v20 = vadd.f32 %v6281_v7, %v2181_v46  ;;  %v3054_v56 = vrot.slane %v2428_v15, %v6312_v43 }
 0x21d   :  { %v2211_v44 = vpop.xlane.xlu0 %2210 }
 0x21e   :  { %v3000_v30 = vrot.slane %v2417_v20, %v6384_v48  ;;  %v2427_v9 = vadd.f32 %v6281_v7, %v2211_v44 }
 0x21f   :  { %v2190_v27 = vpop.xlane.xlu1 %2189 }
 0x220   :  { %v3001_v10 = vsel %vm2674_vm11, %v3000_v30, %v2996_v35  ;;  %v2420_v16 = vadd.f32 %v6281_v7, %v2190_v27  ;;  %v3049_v35 = vrot.slane %v2427_v9, %v6306_v57 }
 0x221   :  { %v3006_v38 = vsel %vm2681_vm12, %v3005_v61, %v3001_v10  ;;  %v2220_v54 = vpop.xlane.xlu0 %2219 }
 0x222   :  { %v3015_v32 = vrot.slane %v2420_v16, %v6423_v25  ;;  %v2430_v12 = vadd.f32 %v6281_v7, %v2220_v54 }
 0x223   :  { %v2187_v29 = vpop.xlane.xlu1 %2186 }
 0x224   :  { %v2419_v19 = vadd.f32 %v6281_v7, %v2187_v29  ;;  %v3064_v10 = vrot.slane %v2430_v12, %v6395_v33 }
 0x225   :  { %v2217_v5 = vpop.xlane.xlu0 %2216 }
 0x226   :  { %v3010_v55 = vrot.slane %v2419_v19, %v6539_v45  ;;  %v2429_v3 = vadd.f32 %v6281_v7, %v2217_v5 }
 0x227   :  { %v2202_v2 = vpop.xlane.xlu1 %2201 }
 0x228   :  { %v3011_v31 = vsel %vm2688_vm13, %v3010_v55, %v3006_v38  ;;  %v2424_v36 = vadd.f32 %v6281_v7, %v2202_v2  ;;  %v3059_v44 = vrot.slane %v2429_v3, %v6374_v14 }
 0x229   :  { %v3016_v18 = vsel %vm2695_vm14, %v3015_v32, %v3011_v31  ;;  %v2226_v59 = vpop.xlane.xlu0 %2225 }
 0x22a   :  { %v3021_v0 = vsel %vm2702_vm15, %v3020_v22, %v3016_v18  ;;  %v3034_v13 = vrot.slane %v2424_v36, %v6309_v58  ;;  %v2432_v20 = vadd.f32 %v6281_v7, %v2226_v59 }
 0x22b   :  { %v2208_v47 = vpop.xlane.xlu1 %2207  ;;  %v3026_v34 = vsel %vm2709_vm1, %v3025_v52, %v3021_v0 }
 0x22c   :  { %v7013_v17 = vsel %vm7634_vm0, %v3026_v34, %v6965_v23  ;;  %v2426_v28 = vadd.f32 %v6281_v7, %v2208_v47  ;;  %v3035_v53 = vsel %vm2611_vm2, %v3034_v13, %v3030_v4  ;;  %vm7649_vm0 = vcmask 392512  }
 0x22d   :  { %v2223_v51 = vpop.xlane.xlu0 %2222  ;;  %v3074_v41 = vrot.slane %v2432_v20, %v6371_v60 }
 0x22e   :  { %v3044_v24 = vrot.slane %v2426_v28, %v6354_v1  ;;  %v2431_v46 = vadd.f32 %v6281_v7, %v2223_v51 }
 0x22f   :  { %v2205_v11 = vpop.xlane.xlu1 %2204 }
 0x230   :  { %v2425_v6 = vadd.f32 %v6281_v7, %v2205_v11  ;;  %v3069_v29 = vrot.slane %v2431_v46, %v6346_v49 }
 0x231   :  { %v2232_v62 = vpop.xlane.xlu0 %2231 }
 0x232   :  { %v3039_v23 = vrot.slane %v2425_v6, %v6319_v39  ;;  %v2434_v34 = vadd.f32 %v6281_v7, %v2232_v62 }
 0x233   :  { %v2238_v26 = vpop.xlane.xlu1 %2237 }
 0x234   :  { %v3040_v40 = vsel %vm2618_vm3, %v3039_v23, %v3035_v53  ;;  %v3084_v11 = vrot.slane %v2434_v34, %v6407_v8  ;;  %v2436_v9 = vadd.f32 %v6281_v7, %v2238_v26 }
 0x235   :  { %v3045_v30 = vsel %vm2625_vm4, %v3044_v24, %v3040_v40  ;;  %v2229_v27 = vpop.xlane.xlu0 %2228 }
 0x236   :  { %v3050_v61 = vsel %vm2632_vm5, %v3049_v35, %v3045_v30  ;;  %v2433_v18 = vadd.f32 %v6281_v7, %v2229_v27  ;;  %v3094_v12 = vrot.slane %v2436_v9, %v6423_v25 }
 0x237   :  { %v3055_v38 = vsel %vm7649_vm0, %v3054_v56, %v3050_v61  ;;  %v2241_v54 = vpop.xlane.xlu1 %2240  ;;  %vm7635_vm0 = vcmask 1045509  }
 0x238   :  { %v3060_v16 = vsel %vm2646_vm7, %v3059_v44, %v3055_v38  ;;  %v3079_v36 = vrot.slane %v2433_v18, %v6384_v48  ;;  %v2437_v3 = vadd.f32 %v6281_v7, %v2241_v54 }
 0x239   :  { %v3065_v19 = vsel %vm2653_vm8, %v3064_v10, %v3060_v16  ;;  %v2235_v55 = vpop.xlane.xlu0 %2234 }
 0x23a   :  { %v3070_v63 = vsel %vm2660_vm9, %v3069_v29, %v3065_v19  ;;  %v2435_v47 = vadd.f32 %v6281_v7, %v2235_v55  ;;  %v3099_v56 = vrot.slane %v2437_v3, %v6597_v37 }
 0x23b   :  { %v3075_v5 = vsel %vm2667_vm10, %v3074_v41, %v3070_v63  ;;  %v2250_v32 = vpop.xlane.xlu1 %2249 }
 0x23c   :  { %v3080_v13 = vsel %vm2674_vm11, %v3079_v36, %v3075_v5  ;;  %v3089_v28 = vrot.slane %v2435_v47, %v6539_v45  ;;  %v2440_v24 = vadd.f32 %v6281_v7, %v2250_v32 }
 0x23d   :  { %v2247_v2 = vpop.xlane.xlu0 %2246  ;;  %v3085_v4 = vsel %vm2681_vm12, %v3084_v11, %v3080_v13 }
 0x23e   :  { %v3090_v23 = vsel %vm2688_vm13, %v3089_v28, %v3085_v4  ;;  %v2439_v62 = vadd.f32 %v6281_v7, %v2247_v2  ;;  %v3113_v27 = vrot.slane %v2440_v24, %v6309_v58 }
 0x23f   :  { %v2256_v22 = vpop.xlane.xlu1 %2255  ;;  %v3095_v40 = vsel %vm2695_vm14, %v3094_v12, %v3090_v23 }
 0x240   :  { %v3109_v20 = vrot.slane %v2439_v62, %v6293_v21  ;;  %v2442_v10 = vadd.f32 %v6281_v7, %v2256_v22  ;;  %v3100_v38 = vsel %vm2702_vm15, %v3099_v56, %v3095_v40 }
 0x241   :  { %v2253_v31 = vpop.xlane.xlu0 %2252 }
 0x242   :  { %v2441_v53 = vadd.f32 %v6281_v7, %v2253_v31  ;;  %v3114_v41 = vsel %vm2611_vm2, %v3113_v27, %v3109_v20  ;;  %v3123_v32 = vrot.slane %v2442_v10, %v6354_v1 }
 0x243   :  { %v2262_v52 = vpop.xlane.xlu1 %2261 }
 0x244   :  { %v3118_v30 = vrot.slane %v2441_v53, %v6319_v39  ;;  %v2444_v2 = vadd.f32 %v6281_v7, %v2262_v52 }
 0x245   :  { %v7044_v0 = vpop.xlane.xlu0 %2285 }
 0x246   :  { %v3119_v63 = vsel %vm2618_vm3, %v3118_v30, %v3114_v41  ;;  %v3133_v47 = vrot.slane %v2444_v2, %v6312_v43  ;;  %v7652_v2 = vld [vmem:[#allocation14_spill] sm:$0xff] }
 0x247   :  { %v2259_v59 = vpop.xlane.xlu1 %2258  ;;  %v3124_v18 = vsel %vm2625_vm4, %v3123_v32, %v3119_v63  ;;  %v7651_v63 = vld [vmem:[#allocation13_spill] sm:$0xff] }
 0x248   :  { %v2443_v44 = vadd.f32 %v6281_v7, %v2259_v59 }
 0x249   :  { %v7049_v50 = vpop.xlane.xlu0 %2282 }
 0x24a   :  { %v3128_v55 = vrot.slane %v2443_v44, %v6306_v57 }
 0x24b   :  { %v2268_v51 = vpop.xlane.xlu1 %2267 }
 0x24c   :  { %v3129_v59 = vsel %vm2632_vm5, %v3128_v55, %v3124_v18  ;;  %v2446_v34 = vadd.f32 %v6281_v7, %v2268_v51 }
 0x24d   :  { %v2298_v6 = vpop.xlane.xlu0 %2297 }
 0x24e   :  { %v2456_v3 = vadd.f32 %v6281_v7, %v2298_v6 }
 0x24f   :  { %v2265_v15 = vpop.xlane.xlu1 %2264 }
 0x250   :  { %v2445_v5 = vadd.f32 %v6281_v7, %v2265_v15  ;;  %v3143_v15 = vrot.slane %v2446_v34, %v6395_v33  ;;  %v3192_v6 = vrot.slane %v2456_v3, %v6309_v58  ;;  %v2451_v58 = vadd.f32 %v6281_v7, %v7049_v50 }
 0x251   :  { %v2244_v35 = vpop.xlane.xlu0 %2243  ;;  %v2452_v34 = vadd.f32 %v6281_v7, %v7044_v0 }
 0x252   :  { %v2438_v46 = vadd.f32 %v6281_v7, %v2244_v35  ;;  %v3138_v36 = vrot.slane %v2445_v5, %v6374_v14 }
 0x253   :  { %v2274_v26 = vpop.xlane.xlu1 %2273 }
 0x254   :  { %v3104_v61 = vrot.slane %v2438_v46, %v6590_v42  ;;  %v2448_v23 = vadd.f32 %v6281_v7, %v2274_v26 }
 0x255   :  { %v2304_v54 = vpop.xlane.xlu0 %2303 }
 0x256   :  { %v3105_v16 = vsel %vm2709_vm1, %v3104_v61, %v3100_v38  ;;  %v2458_v24 = vadd.f32 %v6281_v7, %v2304_v54  ;;  %v3153_v26 = vrot.slane %v2448_v23, %v6371_v60 }
 0x257   :  { %v2271_v29 = vpop.xlane.xlu1 %2270  ;;  %v7076_v19 = vsel %vm7635_vm0, %v3105_v16, %v7013_v17  ;;  %vm7650_vm0 = vcmask 392512  }
 0x258   :  { %v2447_v17 = vadd.f32 %v6281_v7, %v2271_v29  ;;  %v3134_v11 = vsel %vm7650_vm0, %v3133_v47, %v3129_v59  ;;  %v3202_v10 = vrot.slane %v2458_v24, %v6354_v1  ;;  %v3173_v24 = vrot.slane %v2452_v34, %v6423_v25  ;;  %v4880_v34 = vld [vmem:[%s7613_s0 + $0xe0] sm:$0xff] }
 0x259   :  { %v2301_v22 = vpop.xlane.xlu0 %2300  ;;  %v3139_v52 = vsel %vm2646_vm7, %v3138_v36, %v3134_v11 }
 0x25a   :  { %v3148_v9 = vrot.slane %v2447_v17, %v6346_v49  ;;  %v2457_v12 = vadd.f32 %v6281_v7, %v2301_v22  ;;  %v3144_v53 = vsel %vm2653_vm8, %v3143_v15, %v3139_v52  ;;  %v2464_v22 = vadd.f32 %v6281_v7, %v7652_v2  ;;  %v7653_v17 = vld [vmem:[#allocation15_spill] sm:$0xff]  ;;  %v7654_v52 = vld [vmem:[#allocation16_spill] sm:$0xff] }
 0x25b   :  { %v2280_v31 = vpop.xlane.xlu1 %2279  ;;  %v2465_v47 = vadd.f32 %v6281_v7, %v7653_v17  ;;  %v7657_v2 = vld [vmem:[#allocation11_spill] sm:$0xff] }
 0x25c   :  { %v3149_v40 = vsel %vm2660_vm9, %v3148_v9, %v3144_v53  ;;  %v2450_v20 = vadd.f32 %v6281_v7, %v2280_v31  ;;  %v3197_v61 = vrot.slane %v2457_v12, %v6319_v39  ;;  %v2463_v39 = vadd.f32 %v6281_v7, %v7651_v63 }
 0x25d   :  { %v2310_v13 = vpop.xlane.xlu0 %2309  ;;  %v3154_v38 = vsel %vm2667_vm10, %v3153_v26, %v3149_v40  ;;  %v2466_v9 = vadd.f32 %v6281_v7, %v7654_v52  ;;  %v3232_v3 = vrot.slane %v2464_v22, %v6371_v60  ;;  %v3237_v53 = vrot.slane %v2465_v47, %v6384_v48  ;;  %v4879_v47 = vld [vmem:[%s7613_s0 + $0xe8] sm:$0xff]  ;;  %v4884_v52 = vld [vmem:[%s7613_s0 + $0xc0] sm:$0xff] }
 0x25e   :  { %v2460_v54 = vadd.f32 %v6281_v7, %v2310_v13  ;;  %v3163_v1 = vrot.slane %v2450_v20, %v6407_v8  ;;  %v3168_v13 = vrot.slane %v2451_v58, %v6539_v45  ;;  %v3227_v11 = vrot.slane %v2463_v39, %v6346_v49 }
 0x25f   :  { %v2277_v28 = vpop.xlane.xlu1 %2276 }
 0x260   :  { %v2449_v4 = vadd.f32 %v6281_v7, %v2277_v28  ;;  %v3212_v59 = vrot.slane %v2460_v54, %v6312_v43 }
 0x261   :  { %v2307_v62 = vpop.xlane.xlu0 %2306 }
 0x262   :  { %v3158_v46 = vrot.slane %v2449_v4, %v6384_v48  ;;  %v2459_v56 = vadd.f32 %v6281_v7, %v2307_v62 }
 0x263   :  { %v2295_v51 = vpop.xlane.xlu1 %2294 }
 0x264   :  { %v2455_v35 = vadd.f32 %v6281_v7, %v2295_v51  ;;  %v3159_v29 = vsel %vm2674_vm11, %v3158_v46, %v3154_v38 }
 0x265   :  { %v2316_v44 = vpop.xlane.xlu0 %2315 }
 0x266   :  { %v3188_v30 = vrot.slane %v2455_v35, %v6293_v21  ;;  %v3207_v21 = vrot.slane %v2459_v56, %v6306_v57  ;;  %v2462_v5 = vadd.f32 %v6281_v7, %v2316_v44  ;;  %v3164_v57 = vsel %vm2681_vm12, %v3163_v1, %v3159_v29  ;;  %v7656_v29 = vld [vmem:[#allocation12_spill] sm:$0xff] }
 0x267   :  { %v2331_v27 = vpop.xlane.xlu1 %2330  ;;  %v3169_v0 = vsel %vm2688_vm13, %v3168_v13, %v3164_v57  ;;  %v3242_v35 = vrot.slane %v2466_v9, %v6407_v8  ;;  %v7658_v57 = vmov 0.0   ;;  %v4881_v13 = vld [vmem:[%s7613_s0 + $0xd8] sm:$0xff] }
 0x268   :  { %v3193_v16 = vsel %vm2611_vm2, %v3192_v6, %v3188_v30  ;;  %v3222_v4 = vrot.slane %v2462_v5, %v6395_v33  ;;  %vm7655_vm2 = vmmov %vm7650_vm0  ;;  %v2467_v23 = vadd.f32 %v6281_v7, %v2331_v27  ;;  %v3174_v26 = vsel %vm2695_vm14, %v3173_v24, %v3169_v0  ;;  %v4885_v9 = vld [vmem:[%s7613_s0 + $0xb8] sm:$0xff]  ;;  %v4890_v0 = vld [vmem:[%s7613_s0 + $0x90] sm:$0xff] }
 0x269   :  { %v3198_v41 = vsel %vm2618_vm3, %v3197_v61, %v3193_v16  ;;  %v2313_v32 = vpop.xlane.xlu0 %2312  ;;  %vm3274_vm3 = vcmask 1046534   ;;  %v4897_v24 = vld [vmem:[%s7613_s0 + $0x158] sm:$0xff] }
 0x26a   :  { %v3203_v55 = vsel %vm2625_vm4, %v3202_v10, %v3198_v41  ;;  %v2461_v18 = vadd.f32 %v6281_v7, %v2313_v32  ;;  %v3247_v6 = vrot.slane %v2467_v23, %v6539_v45  ;;  %vm3276_vm4 = vcmask 1047559  }
 0x26b   :  { %v3208_v50 = vsel %vm2632_vm5, %v3207_v21, %v3203_v55  ;;  %v2289_v31 = vpop.xlane.xlu1 %2288  ;;  %vm2473_vm5 = vcmp.lt.s32.totalorder %v7656_v29, 16  ;;  %v4917_v29 = vld [vmem:[%s7613_s0 + $0x1b8] sm:$0xff] }
 0x26c   :  { %v2453_v36 = vadd.f32 %v6281_v7, %v2289_v31  ;;  %v3217_v28 = vrot.slane %v2461_v18, %v6374_v14  ;;  %v3213_v43 = vsel %vm7655_vm2, %v3212_v59, %v3208_v50  ;;  %v4877_v18 = vld [vmem:[%s7613_s0 + $0xf8] sm:$0xff] }
 0x26d   :  { %v2334_v15 = vpop.xlane.xlu0 %2333 }
 0x26e   :  { %v3218_v62 = vsel %vm2646_vm7, %v3217_v28, %v3213_v43  ;;  %v3178_v14 = vrot.slane %v2453_v36, %v6597_v37  ;;  %v2468_v33 = vadd.f32 %v6281_v7, %v2334_v15  ;;  %v4878_v36 = vld [vmem:[%s7613_s0 + $0xf0] sm:$0xff]  ;;  %v4887_v43 = vld [vmem:[%s7613_s0 + $0xa8] sm:$0xff]  ;;  %v4888_v15 = vld [vmem:[%s7613_s0 + $0xa0] sm:$0xff]  ;;  %vm7660_vm7 = vcmask 1041409  }
 0x26f   :  { %v2292_v12 = vpop.xlane.xlu1 %2291  ;;  %v3223_v49 = vsel %vm2653_vm8, %v3222_v4, %v3218_v62  ;;  %v4882_v28 = vld [vmem:[%s7613_s0 + $0xd0] sm:$0xff]  ;;  %v4891_v62 = vld [vmem:[%s7613_s0 + $0x88] sm:$0xff] }
 0x270   :  { %v2454_v51 = vadd.f32 %v6281_v7, %v2292_v12  ;;  %v3228_v60 = vsel %vm2660_vm9, %v3227_v11, %v3223_v49  ;;  %v3179_v44 = vsel %vm2702_vm15, %v3178_v14, %v3174_v26  ;;  %v3252_v8 = vrot.slane %v2468_v33, %v6423_v25  ;;  %v4883_v11 = vld [vmem:[%s7613_s0 + $0xc8] sm:$0xff]  ;;  %v4886_v4 = vld [vmem:[%s7613_s0 + $0xb0] sm:$0xff]  ;;  %v4892_v14 = vld [vmem:[%s7613_s0 + $0x80] sm:$0xff] }
 0x271   :  { %v3233_v40 = vsel %vm2667_vm10, %v3232_v3, %v3228_v60  ;;  %v2337_v56 = vpop.xlane.xlu0 %2336  ;;  %v4889_v3 = vld [vmem:[%s7613_s0 + $0x98] sm:$0xff]  ;;  %v4895_v33 = vld [vmem:[%s7613_s0 + $0x168] sm:$0xff]  ;;  %v4898_v60 = vld [vmem:[%s7613_s0 + $0x150] sm:$0xff] }
 0x272   :  { %v3183_v46 = vrot.slane %v2454_v51, %v6590_v42  ;;  %v3238_v20 = vsel %vm2674_vm11, %v3237_v53, %v3233_v40  ;;  %v2469_v48 = vadd.f32 %v6281_v7, %v2337_v56  ;;  %v4893_v49 = vld [vmem:[%s7613_s0 + $0x178] sm:$0xff]  ;;  %v4894_v51 = vld [vmem:[%s7613_s0 + $0x170] sm:$0xff]  ;;  %v4896_v53 = vld [vmem:[%s7613_s0 + $0x160] sm:$0xff] }
 0x273   :  { %v2340_v30 = vpop.xlane.xlu1 %2339  ;;  %v3243_v61 = vsel %vm2681_vm12, %v3242_v35, %v3238_v20  ;;  %v4899_v35 = vld [vmem:[%s7613_s0 + $0x148] sm:$0xff]  ;;  %v4900_v40 = vld [vmem:[%s7613_s0 + $0x140] sm:$0xff]  ;;  %v4902_v56 = vld [vmem:[%s7613_s0 + $0x130] sm:$0xff] }
 0x274   :  { %v2470_v27 = vadd.f32 %v6281_v7, %v2340_v30  ;;  %v3184_v10 = vsel %vm2709_vm1, %v3183_v46, %v3179_v44  ;;  %v3248_v38 = vsel %vm2688_vm13, %v3247_v6, %v3243_v61  ;;  %v3257_v45 = vrot.slane %v2469_v48, %v6597_v37  ;;  %v4901_v46 = vld [vmem:[%s7613_s0 + $0x138] sm:$0xff]  ;;  %v4903_v6 = vld [vmem:[%s7613_s0 + $0x128] sm:$0xff]  ;;  %v4904_v26 = vld [vmem:[%s7613_s0 + $0x120] sm:$0xff] }
 0x275   :  { %v3253_v54 = vsel %vm2695_vm14, %v3252_v8, %v3248_v38  ;;  %v3275_v7 = vsel %vm3274_vm3, %v3184_v10, %v7076_v19  ;;  %v4905_v20 = vld [vmem:[%s7613_s0 + $0x118] sm:$0xff]  ;;  %v4906_v30 = vld [vmem:[%s7613_s0 + $0x110] sm:$0xff]  ;;  %v4907_v48 = vld [vmem:[%s7613_s0 + $0x108] sm:$0xff] }
 0x276   :  { %v3262_v16 = vrot.slane %v2470_v27, %v6590_v42  ;;  %v3258_v58 = vsel %vm2702_vm15, %v3257_v45, %v3253_v54  ;;  %v4908_v61 = vld [vmem:[%s7613_s0 + $0x100] sm:$0xff]  ;;  %v4909_v8 = vld [vmem:[%s7613_s0 + $0x1f8] sm:$0xff]  ;;  %v4910_v27 = vld [vmem:[%s7613_s0 + $0x1f0] sm:$0xff] }
 0x277   :  { %v4911_v10 = vld [vmem:[%s7613_s0 + $0x1e8] sm:$0xff]  ;;  %v4912_v38 = vld [vmem:[%s7613_s0 + $0x1e0] sm:$0xff]  ;;  %v4913_v45 = vld [vmem:[%s7613_s0 + $0x1d8] sm:$0xff] }
 0x278   :  { %v3263_v25 = vsel %vm2709_vm1, %v3262_v16, %v3258_v58  ;;  %vm7659_vm1 = vmmov 0   ;;  %v4914_v54 = vld [vmem:[%s7613_s0 + $0x1d0] sm:$0xff]  ;;  %v4915_v16 = vld [vmem:[%s7613_s0 + $0x1c8] sm:$0xff]  ;;  %v4916_v58 = vld [vmem:[%s7613_s0 + $0x1c0] sm:$0xff] }
 0x279   :  { %v3277_v41 = vsel %vm3276_vm4, %v3263_v25, %v3275_v7  ;;  %v4918_v25 = vld [vmem:[%s7613_s0 + $0x1b0] sm:$0xff]  ;;  %v4919_v7 = vld [vmem:[%s7613_s0 + $0x1a8] sm:$0xff] }
 0x27a   :  { %v3279_v21 = vsel %vm2473_vm5, %v3277_v41, -1e+30  ;;  %v4920_v41 = vld [vmem:[%s7613_s0 + $0x1a0] sm:$0xff] }
 0x27b   :  { %3280 = vmax.xlane.f32.xlu0 %v3279_v21 }
 0x304   :  { %v3281_v37 = vpop.xlane.xlu0 %3280 }
 0x305   :  { %v3282_v63 = vsub.f32 %v3279_v21, %v3281_v37  ;;  %v4921_v21 = vld [vmem:[%s7613_s0 + $0x198] sm:$0xff]  ;;  %v4922_v37 = vld [vmem:[%s7613_s0 + $0x190] sm:$0xff] }
 0x307   :  { %v3283_v39 = vmul.f32 1.442695, %v3282_v63  ;;  %v4923_v63 = vld [vmem:[%s7613_s0 + $0x188] sm:$0xff] }
 0x309   :  { %4869 = vpow2.f32 %v3283_v39 }
 0x316   :  { %v4870_v1 = vpop.eup %4869 }
 0x317   :  { %3285 = vadd.xlane.f32.xlu1 %v4870_v1 }
 0x3a0   :  { %v3286_v42 = vpop.xlane.xlu1 %3285 }
 0x3a1   :  { %4871 = vrcp.f32 %v3286_v42  ;;  %v4925_v42 = vld [vmem:[%s7613_s0 + $0x278] sm:$0xff] }
 0x3ae   :  { %v4872_v55 = vpop.eup %4871 }
 0x3af   :  { %v3288_v5 = vmul.f32 %v4872_v55, %v4870_v1  ;;  %v4924_v1 = vld [vmem:[%s7613_s0 + $0x180] sm:$0xff]  ;;  %v4926_v55 = vld [vmem:[%s7613_s0 + $0x270] sm:$0xff] }
 0x3b1   :  { %v3290_v32 = vcombine.high %v3288_v5, %v3288_v5  ;;  %3931 = vst [vmem:[#allocation5] sm:$0xff] %v3288_v5  ;;  %v3297_v22 = vrot.slane %v3288_v5, %v7657_v2  ;;  %v4927_v5 = vld [vmem:[%s7613_s0 + $0x268] sm:$0xff] }
 0x3b3   :  { %v7175_v19 = vrot.slane %v3290_v32, %v7657_v2  ;;  %v7178_v50 = vrot.slane %v3297_v22, %v7657_v2  ;;  %v3305_v23 = vcombine.high %v3297_v22, %v3297_v22  ;;  %v4928_v32 = vld [vmem:[%s7613_s0 + $0x260] sm:$0xff]  ;;  %v4929_v22 = vld [vmem:[%s7613_s0 + $0x258] sm:$0xff] }
 0x3b5   :  { %4609 = vmatmul.mubr.f32.vlgmr.msra.gmra.mxu1 %v7178_v50  ;;  %v3306_v31 = vcombine.high %v7175_v19, %v7175_v19  ;;  %v7251_v12 = vrot.slane %v3305_v23, %v7657_v2  ;;  %v3335_v44 = vcombine.high %v7178_v50, %v7178_v50  ;;  %v4930_v50 = vld [vmem:[%s7613_s0 + $0x250] sm:$0xff]  ;;  %v4947_v23 = vld [vmem:[%s7613_s0 + $0x2c8] sm:$0xff] }
 0x3b6   :  { %4612 = vmatpush3.msra.mxu1 %v4877_v18  ;;  %4643 = vmatprep.mubr.msk.f32.mxu1 %vm7659_vm1, %v7658_v57  ;;  %v4932_v18 = vld [vmem:[%s7613_s0 + $0x240] sm:$0xff] }
 0x3b7   :  { %4613 = vmatprep.subr.mxu1 %v7658_v57  ;;  %v7190_v59 = vrot.slane %v3306_v31, %v7657_v2  ;;  %v3337_v39 = vcombine.high %v7251_v12, %v7251_v12  ;;  %v4931_v31 = vld [vmem:[%s7613_s0 + $0x248] sm:$0xff] }
 0x3b8   :  { %4614 = vmatpush3.msra.mxu1 %v4878_v36  ;;  %v4933_v36 = vld [vmem:[%s7613_s0 + $0x238] sm:$0xff] }
 0x3b9   :  { %4615 = vmatprep.subr.mxu1 %v7658_v57  ;;  %v3338_v17 = vcombine.high %v7190_v59, %v7190_v59 }
 0x3ba   :  { %4616 = vmatpush3.msra.mxu1 %v4879_v47  ;;  %v4935_v47 = vld [vmem:[%s7613_s0 + $0x228] sm:$0xff] }
 0x3bb   :  { %4617 = vmatprep.subr.mxu1 %v7658_v57  ;;  %4854 = vmatmul.mubr.f32.vlgmr.msra.gmra.mxu0 %v3338_v17  ;;  %v4934_v17 = vld [vmem:[%s7613_s0 + $0x230] sm:$0xff] }
 0x3bc   :  { %4618 = vmatpush3.msra.mxu1 %v4880_v34  ;;  %v4936_v34 = vld [vmem:[%s7613_s0 + $0x220] sm:$0xff] }
 0x3bd   :  { %4619 = vmatprep.subr.mxu1 %v7658_v57 }
 0x3be   :  { %4620 = vmatpush3.msra.mxu1 %v4881_v13  ;;  %v4937_v13 = vld [vmem:[%s7613_s0 + $0x218] sm:$0xff] }
 0x3bf   :  { %4621 = vmatprep.subr.mxu1 %v7658_v57 }
 0x3c0   :  { %4622 = vmatpush3.msra.mxu1 %v4882_v28  ;;  %v4938_v28 = vld [vmem:[%s7613_s0 + $0x210] sm:$0xff] }
 0x3c1   :  { %4623 = vmatprep.subr.mxu1 %v7658_v57 }
 0x3c2   :  { %4624 = vmatpush3.msra.mxu1 %v4883_v11  ;;  %v4939_v11 = vld [vmem:[%s7613_s0 + $0x208] sm:$0xff] }
 0x3c3   :  { %4625 = vmatprep.subr.mxu1 %v7658_v57 }
 0x3c4   :  { %4626 = vmatpush3.msra.mxu1 %v4884_v52  ;;  %v7458_v52 = vrot.slane %v7175_v19, %v7657_v2  ;;  %v4942_v2 = vld [vmem:[%s7613_s0 + $0x2f0] sm:$0xff]  ;;  %v4943_v19 = vld [vmem:[%s7613_s0 + $0x2e8] sm:$0xff] }
 0x3c5   :  { %4627 = vmatprep.subr.mxu1 %v7658_v57 }
 0x3c6   :  { %4628 = vmatpush3.msra.mxu1 %v4885_v9  ;;  %v4940_v9 = vld [vmem:[%s7613_s0 + $0x200] sm:$0xff] }
 0x3c7   :  { %4629 = vmatprep.subr.mxu1 %v7658_v57 }
 0x3c8   :  { %4630 = vmatpush3.msra.mxu1 %v4886_v4  ;;  %v4941_v4 = vld [vmem:[%s7613_s0 + $0x2f8] sm:$0xff] }
 0x3c9   :  { %4631 = vmatprep.subr.mxu1 %v7658_v57 }
 0x3ca   :  { %4632 = vmatpush3.msra.mxu1 %v4887_v43  ;;  %v4944_v43 = vld [vmem:[%s7613_s0 + $0x2e0] sm:$0xff] }
 0x3cb   :  { %4633 = vmatprep.subr.mxu1 %v7658_v57 }
 0x3cc   :  { %4634 = vmatpush3.msra.mxu1 %v4888_v15  ;;  %v4945_v15 = vld [vmem:[%s7613_s0 + $0x2d8] sm:$0xff] }
 0x3cd   :  { %4635 = vmatprep.subr.mxu1 %v7658_v57 }
 0x3ce   :  { %4636 = vmatpush3.msra.mxu1 %v4889_v3  ;;  %v4946_v3 = vld [vmem:[%s7613_s0 + $0x2d0] sm:$0xff] }
 0x3cf   :  { %4637 = vmatprep.subr.mxu1 %v7658_v57 }
 0x3d0   :  { %4638 = vmatpush3.msra.mxu1 %v4890_v0  ;;  %v4948_v0 = vld [vmem:[%s7613_s0 + $0x2c0] sm:$0xff] }
 0x3d1   :  { %4639 = vmatprep.subr.mxu1 %v7658_v57 }
 0x3d2   :  { %4640 = vmatpush3.msra.mxu1 %v4891_v62  ;;  %v4949_v62 = vld [vmem:[%s7613_s0 + $0x2b8] sm:$0xff] }
 0x3d3   :  { %4641 = vmatprep.subr.mxu1 %v7658_v57 }
 0x3d4   :  { %4642 = vmatpush3.msra.mxu1 %v4892_v14  ;;  %v4951_v14 = vld [vmem:[%s7613_s0 + $0x2a8] sm:$0xff] }
 0x3d5   :  { %4644 = vmatmul.mubr.f32.vlgmr.msra.gmra.mxu1 %v7251_v12  ;;  %4646 = vmatprep.subr.mxu1 %v7658_v57  ;;  %v4950_v12 = vld [vmem:[%s7613_s0 + $0x2b0] sm:$0xff] }
 0x3d6   :  { %4647 = vmatpush3.msra.mxu1 %v4893_v49  ;;  %4678 = vmatprep.mubr.msk.f32.mxu1 %vm7659_vm1, %v7658_v57  ;;  %v4952_v49 = vld [vmem:[%s7613_s0 + $0x2a0] sm:$0xff] }
 0x3d7   :  { %4648 = vmatprep.subr.mxu1 %v7658_v57 }
 0x3d8   :  { %4649 = vmatpush3.msra.mxu1 %v4894_v51  ;;  %v4953_v51 = vld [vmem:[%s7613_s0 + $0x298] sm:$0xff] }
 0x3d9   :  { %4650 = vmatprep.subr.mxu1 %v7658_v57 }
 0x3da   :  { %4651 = vmatpush3.msra.mxu1 %v4895_v33  ;;  %v4954_v33 = vld [vmem:[%s7613_s0 + $0x290] sm:$0xff] }
 0x3db   :  { %4652 = vmatprep.subr.mxu1 %v7658_v57 }
 0x3dc   :  { %4653 = vmatpush3.msra.mxu1 %v4896_v53  ;;  %v4955_v53 = vld [vmem:[%s7613_s0 + $0x288] sm:$0xff] }
 0x3dd   :  { %4654 = vmatprep.subr.mxu1 %v7658_v57 }
 0x3de   :  { %4655 = vmatpush3.msra.mxu1 %v4897_v24  ;;  %v4956_v24 = vld [vmem:[%s7613_s0 + $0x280] sm:$0xff] }
 0x3df   :  { %4656 = vmatprep.subr.mxu1 %v7658_v57 }
 0x3e0   :  { %4657 = vmatpush3.msra.mxu1 %v4898_v60  ;;  %v4957_v60 = vld [vmem:[%s7613_s0 + $0x378] sm:$0xff] }
 0x3e1   :  { %4658 = vmatprep.subr.mxu1 %v7658_v57 }
 0x3e2   :  { %4659 = vmatpush3.msra.mxu1 %v4899_v35  ;;  %v4958_v35 = vld [vmem:[%s7613_s0 + $0x370] sm:$0xff] }
 0x3e3   :  { %4660 = vmatprep.subr.mxu1 %v7658_v57 }
 0x3e4   :  { %4661 = vmatpush3.msra.mxu1 %v4900_v40  ;;  %v4960_v40 = vld [vmem:[%s7613_s0 + $0x360] sm:$0xff] }
 0x3e5   :  { %4662 = vmatprep.subr.mxu1 %v7658_v57 }
 0x3e6   :  { %4663 = vmatpush3.msra.mxu1 %v4901_v46  ;;  %v4961_v46 = vld [vmem:[%s7613_s0 + $0x358] sm:$0xff] }
 0x3e7   :  { %4664 = vmatprep.subr.mxu1 %v7658_v57 }
 0x3e8   :  { %4665 = vmatpush3.msra.mxu1 %v4902_v56  ;;  %v4962_v56 = vld [vmem:[%s7613_s0 + $0x350] sm:$0xff] }
 0x3e9   :  { %4666 = vmatprep.subr.mxu1 %v7658_v57 }
 0x3ea   :  { %4667 = vmatpush3.msra.mxu1 %v4903_v6  ;;  %v4963_v6 = vld [vmem:[%s7613_s0 + $0x348] sm:$0xff] }
 0x3eb   :  { %4668 = vmatprep.subr.mxu1 %v7658_v57 }
 0x3ec   :  { %4669 = vmatpush3.msra.mxu1 %v4904_v26  ;;  %v4964_v26 = vld [vmem:[%s7613_s0 + $0x340] sm:$0xff] }
 0x3ed   :  { %4670 = vmatprep.subr.mxu1 %v7658_v57 }
 0x3ee   :  { %4671 = vmatpush3.msra.mxu1 %v4905_v20  ;;  %v4965_v20 = vld [vmem:[%s7613_s0 + $0x338] sm:$0xff] }
 0x3ef   :  { %4672 = vmatprep.subr.mxu1 %v7658_v57 }
 0x3f0   :  { %4673 = vmatpush3.msra.mxu1 %v4906_v30  ;;  %v4966_v30 = vld [vmem:[%s7613_s0 + $0x330] sm:$0xff] }
 0x3f1   :  { %4674 = vmatprep.subr.mxu1 %v7658_v57 }
 0x3f2   :  { %4675 = vmatpush3.msra.mxu1 %v4907_v48  ;;  %v4967_v48 = vld [vmem:[%s7613_s0 + $0x328] sm:$0xff] }
 0x3f3   :  { %4676 = vmatprep.subr.mxu1 %v7658_v57 }
 0x3f4   :  { %4677 = vmatpush3.msra.mxu1 %v4908_v61  ;;  %v4969_v61 = vld [vmem:[%s7613_s0 + $0x318] sm:$0xff] }
 0x3f5   :  { %4679 = vmatmul.mubr.f32.vlgmr.msra.gmra.mxu1 %v3335_v44  ;;  %4681 = vmatprep.subr.mxu1 %v7658_v57  ;;  %v4968_v44 = vld [vmem:[%s7613_s0 + $0x320] sm:$0xff] }
 0x3f6   :  { %4682 = vmatpush3.msra.mxu1 %v4909_v8  ;;  %4713 = vmatprep.mubr.msk.f32.mxu1 %vm7659_vm1, %v7658_v57  ;;  %v4970_v8 = vld [vmem:[%s7613_s0 + $0x310] sm:$0xff] }
 0x3f7   :  { %4683 = vmatprep.subr.mxu1 %v7658_v57 }
 0x3f8   :  { %4684 = vmatpush3.msra.mxu1 %v4910_v27  ;;  %v4971_v27 = vld [vmem:[%s7613_s0 + $0x308] sm:$0xff] }
 0x3f9   :  { %4685 = vmatprep.subr.mxu1 %v7658_v57 }
 0x3fa   :  { %4686 = vmatpush3.msra.mxu1 %v4911_v10  ;;  %v3336_v10 = vcombine.high %v7458_v52, %v7458_v52 }
 0x3fb   :  { %4687 = vmatprep.subr.mxu1 %v7658_v57 }
 0x3fc   :  { %4688 = vmatpush3.msra.mxu1 %v4912_v38  ;;  %v4972_v38 = vld [vmem:[%s7613_s0 + $0x300] sm:$0xff] }
 0x3fd   :  { %4689 = vmatprep.subr.mxu1 %v7658_v57 }
 0x3fe   :  { %4690 = vmatpush3.msra.mxu1 %v4913_v45 }
 0x3ff   :  { %4691 = vmatprep.subr.mxu1 %v7658_v57 }
 0x400   :  { %4692 = vmatpush3.msra.mxu1 %v4914_v54 }
 0x401   :  { %4693 = vmatprep.subr.mxu1 %v7658_v57 }
 0x402   :  { %4694 = vmatpush3.msra.mxu1 %v4915_v16 }
 0x403   :  { %4695 = vmatprep.subr.mxu1 %v7658_v57 }
 0x404   :  { %4696 = vmatpush3.msra.mxu1 %v4916_v58 }
 0x405   :  { %4697 = vmatprep.subr.mxu1 %v7658_v57 }
 0x406   :  { %4698 = vmatpush3.msra.mxu1 %v4917_v29 }
 0x407   :  { %4699 = vmatprep.subr.mxu1 %v7658_v57 }
 0x408   :  { %4700 = vmatpush3.msra.mxu1 %v4918_v25 }
 0x409   :  { %4701 = vmatprep.subr.mxu1 %v7658_v57 }
 0x40a   :  { %4702 = vmatpush3.msra.mxu1 %v4919_v7 }
 0x40b   :  { %4703 = vmatprep.subr.mxu1 %v7658_v57 }
 0x40c   :  { %4704 = vmatpush3.msra.mxu1 %v4920_v41 }
 0x40d   :  { %4705 = vmatprep.subr.mxu1 %v7658_v57 }
 0x40e   :  { %4706 = vmatpush3.msra.mxu1 %v4921_v21 }
 0x40f   :  { %4707 = vmatprep.subr.mxu1 %v7658_v57 }
 0x410   :  { %4708 = vmatpush3.msra.mxu1 %v4922_v37 }
 0x411   :  { %4709 = vmatprep.subr.mxu1 %v7658_v57 }
 0x412   :  { %4710 = vmatpush3.msra.mxu1 %v4923_v63 }
 0x413   :  { %4711 = vmatprep.subr.mxu1 %v7658_v57 }
 0x414   :  { %4712 = vmatpush3.msra.mxu1 %v4924_v1 }
 0x415   :  { %4714 = vmatmul.mubr.f32.vlgmr.msra.gmra.mxu1 %v3337_v39  ;;  %4716 = vmatprep.subr.mxu1 %v7658_v57 }
 0x416   :  { %4717 = vmatpush3.msra.mxu1 %v4925_v42  ;;  %4748 = vmatprep.mubr.msk.f32.mxu1 %vm7659_vm1, %v7658_v57 }
 0x417   :  { %4718 = vmatprep.subr.mxu1 %v7658_v57 }
 0x418   :  { %4719 = vmatpush3.msra.mxu1 %v4926_v55 }
 0x419   :  { %4720 = vmatprep.subr.mxu1 %v7658_v57 }
 0x41a   :  { %4721 = vmatpush3.msra.mxu1 %v4927_v5 }
 0x41b   :  { %4722 = vmatprep.subr.mxu1 %v7658_v57 }
 0x41c   :  { %4723 = vmatpush3.msra.mxu1 %v4928_v32 }
 0x41d   :  { %4724 = vmatprep.subr.mxu1 %v7658_v57 }
 0x41e   :  { %4725 = vmatpush3.msra.mxu1 %v4929_v22 }
 0x41f   :  { %4726 = vmatprep.subr.mxu1 %v7658_v57 }
 0x420   :  { %4727 = vmatpush3.msra.mxu1 %v4930_v50 }
 0x421   :  { %4728 = vmatprep.subr.mxu1 %v7658_v57 }
 0x422   :  { %4729 = vmatpush3.msra.mxu1 %v4931_v31 }
 0x423   :  { %4730 = vmatprep.subr.mxu1 %v7658_v57 }
 0x424   :  { %4731 = vmatpush3.msra.mxu1 %v4932_v18 }
 0x425   :  { %4732 = vmatprep.subr.mxu1 %v7658_v57 }
 0x426   :  { %4733 = vmatpush3.msra.mxu1 %v4933_v36 }
 0x427   :  { %4734 = vmatprep.subr.mxu1 %v7658_v57 }
 0x428   :  { %4735 = vmatpush3.msra.mxu1 %v4934_v17 }
 0x429   :  { %4736 = vmatprep.subr.mxu1 %v7658_v57 }
 0x42a   :  { %4737 = vmatpush3.msra.mxu1 %v4935_v47 }
 0x42b   :  { %4738 = vmatprep.subr.mxu1 %v7658_v57 }
 0x42c   :  { %4739 = vmatpush3.msra.mxu1 %v4936_v34 }
 0x42d   :  { %4740 = vmatprep.subr.mxu1 %v7658_v57 }
 0x42e   :  { %4741 = vmatpush3.msra.mxu1 %v4937_v13 }
 0x42f   :  { %4742 = vmatprep.subr.mxu1 %v7658_v57 }
 0x430   :  { %4743 = vmatpush3.msra.mxu1 %v4938_v28 }
 0x431   :  { %4744 = vmatprep.subr.mxu1 %v7658_v57 }
 0x432   :  { %4745 = vmatpush3.msra.mxu1 %v4939_v11 }
 0x433   :  { %4746 = vmatprep.subr.mxu1 %v7658_v57 }
 0x434   :  { %4747 = vmatpush3.msra.mxu1 %v4940_v9 }
 0x435   :  { %4749 = vmatmul.mubr.f32.vlgmr.msra.gmra.mxu1 %v7458_v52  ;;  %4751 = vmatprep.subr.mxu1 %v7658_v57 }
 0x436   :  { %4752 = vmatpush3.msra.mxu1 %v4941_v4  ;;  %4783 = vmatprep.mubr.msk.f32.mxu1 %vm7659_vm1, %v7658_v57 }
 0x437   :  { %4753 = vmatprep.subr.mxu1 %v7658_v57 }
 0x438   :  { %4754 = vmatpush3.msra.mxu1 %v4942_v2 }
 0x439   :  { %4755 = vmatprep.subr.mxu1 %v7658_v57 }
 0x43a   :  { %4756 = vmatpush3.msra.mxu1 %v4943_v19 }
 0x43b   :  { %4757 = vmatprep.subr.mxu1 %v7658_v57 }
 0x43c   :  { %4758 = vmatpush3.msra.mxu1 %v4944_v43 }
 0x43d   :  { %4759 = vmatprep.subr.mxu1 %v7658_v57 }
 0x43e   :  { %4760 = vmatpush3.msra.mxu1 %v4945_v15 }
 0x43f   :  { %4761 = vmatprep.subr.mxu1 %v7658_v57 }
 0x440   :  { %4762 = vmatpush3.msra.mxu1 %v4946_v3 }
 0x441   :  { %4763 = vmatprep.subr.mxu1 %v7658_v57 }
 0x442   :  { %4764 = vmatpush3.msra.mxu1 %v4947_v23 }
 0x443   :  { %4765 = vmatprep.subr.mxu1 %v7658_v57 }
 0x444   :  { %4766 = vmatpush3.msra.mxu1 %v4948_v0 }
 0x445   :  { %4767 = vmatprep.subr.mxu1 %v7658_v57 }
 0x446   :  { %4768 = vmatpush3.msra.mxu1 %v4949_v62 }
 0x447   :  { %4769 = vmatprep.subr.mxu1 %v7658_v57 }
 0x448   :  { %4770 = vmatpush3.msra.mxu1 %v4950_v12 }
 0x449   :  { %4771 = vmatprep.subr.mxu1 %v7658_v57 }
 0x44a   :  { %4772 = vmatpush3.msra.mxu1 %v4951_v14 }
 0x44b   :  { %4773 = vmatprep.subr.mxu1 %v7658_v57 }
 0x44c   :  { %4774 = vmatpush3.msra.mxu1 %v4952_v49 }
 0x44d   :  { %4775 = vmatprep.subr.mxu1 %v7658_v57 }
 0x44e   :  { %4776 = vmatpush3.msra.mxu1 %v4953_v51 }
 0x44f   :  { %4777 = vmatprep.subr.mxu1 %v7658_v57 }
 0x450   :  { %4778 = vmatpush3.msra.mxu1 %v4954_v33 }
 0x451   :  { %4779 = vmatprep.subr.mxu1 %v7658_v57 }
 0x452   :  { %4780 = vmatpush3.msra.mxu1 %v4955_v53 }
 0x453   :  { %4781 = vmatprep.subr.mxu1 %v7658_v57 }
 0x454   :  { %4782 = vmatpush3.msra.mxu1 %v4956_v24 }
 0x455   :  { %4784 = vmatmul.mubr.f32.vlgmr.msra.gmra.mxu1 %v7190_v59  ;;  %4786 = vmatprep.subr.mxu1 %v7658_v57  ;;  %v4959_v59 = vld [vmem:[%s7613_s0 + $0x368] sm:$0xff]  ;;  %s4973_s0 = scalar_lea.vmem %s3949_s10, 128 }
 0x456   :  { %4787 = vmatpush3.msra.mxu1 %v4957_v60  ;;  %4818 = vmatprep.mubr.msk.f32.mxu1 %vm7659_vm1, %v7658_v57  ;;  %p4974_p0 = scmp.ne.s32.totalorder %s3949_s10, %s4973_s0  ;;  %p4979_p2 = scmp.lt.s32.totalorder %s4973_s0, %s4973_s0 }
 0x457   :  { %4788 = vmatprep.subr.mxu1 %v7658_v57 }
 0x458   :  { %4789 = vmatpush3.msra.mxu1 %v4958_v35  ;;  %p4980_p3 = por %p4979_p2, %p4978_p1 }
 0x459   :  { %4790 = vmatprep.subr.mxu1 %v7658_v57 }
 0x45a   :  { %4791 = vmatpush3.msra.mxu1 %v4959_v59  ;;  %p4981_p4 = pnand %p4980_p3, %p4974_p0 }
 0x45b   :  { %4792 = vmatprep.subr.mxu1 %v7658_v57 }
 0x45c   :  { %4793 = vmatpush3.msra.mxu1 %v4960_v40 }
 0x45d   :  { %4794 = vmatprep.subr.mxu1 %v7658_v57 }
 0x45e   :  { %4795 = vmatpush3.msra.mxu1 %v4961_v46 }
 0x45f   :  { %4796 = vmatprep.subr.mxu1 %v7658_v57 }
 0x460   :  { %4797 = vmatpush3.msra.mxu1 %v4962_v56 }
 0x461   :  { %4798 = vmatprep.subr.mxu1 %v7658_v57 }
 0x462   :  { %4799 = vmatpush3.msra.mxu1 %v4963_v6 }
 0x463   :  { %4800 = vmatprep.subr.mxu1 %v7658_v57 }
 0x464   :  { %4801 = vmatpush3.msra.mxu1 %v4964_v26 }
 0x465   :  { %4802 = vmatprep.subr.mxu1 %v7658_v57 }
 0x466   :  { %4803 = vmatpush3.msra.mxu1 %v4965_v20 }
 0x467   :  { %4804 = vmatprep.subr.mxu1 %v7658_v57 }
 0x468   :  { %4805 = vmatpush3.msra.mxu1 %v4966_v30 }
 0x469   :  { %4806 = vmatprep.subr.mxu1 %v7658_v57 }
 0x46a   :  { %4807 = vmatpush3.msra.mxu1 %v4967_v48 }
 0x46b   :  { %4808 = vmatprep.subr.mxu1 %v7658_v57 }
 0x46c   :  { %4809 = vmatpush3.msra.mxu1 %v4968_v44 }
 0x46d   :  { %4810 = vmatprep.subr.mxu1 %v7658_v57 }
 0x46e   :  { %4811 = vmatpush3.msra.mxu1 %v4969_v61 }
 0x46f   :  { %4812 = vmatprep.subr.mxu1 %v7658_v57 }
 0x470   :  { %4813 = vmatpush3.msra.mxu1 %v4970_v8 }
 0x471   :  { %4814 = vmatprep.subr.mxu1 %v7658_v57 }
 0x472   :  { %4815 = vmatpush3.msra.mxu1 %v4971_v27 }
 0x473   :  { %4816 = vmatprep.subr.mxu1 %v7658_v57 }
 0x474   :  { %4817 = vmatpush3.msra.mxu1 %v4972_v38 }
 0x475   :  { %4819 = vmatmul.mubr.f32.vlgmr.msra.gmra.mxu1 %v3336_v10  ;;  %v3413_v45 = vpop.f32.mrf.mxu1 }
 0x477   :  { %v4610_v54 = vpop.f32.mrf.mxu1 }
 0x47b   :  { %v3903_v16 = vpop.f32.mrf.mxu0 }
 0x47d   :  { %v4855_v58 = vpop.f32.mrf.mxu0 }
 0x495   :  { %v3483_v29 = vpop.f32.mrf.mxu1 }
 0x496   :  { %v3915_v25 = vrot.slane %v3483_v29, 7 }
 0x497   :  { %v4645_v7 = vpop.f32.mrf.mxu1 }
 0x498   :  { %v3916_v41 = vsel %vm7660_vm7, %v3915_v25, %v3413_v45 }
 0x4b5   :  { %v3553_v21 = vpop.f32.mrf.mxu1 }
 0x4b6   :  { %v3917_v57 = vrot.slane %v3553_v21, 6 }
 0x4b7   :  { %v4680_v37 = vpop.f32.mrf.mxu1 }
 0x4b8   :  { %v3918_v63 = vsel %vm3266_vm6, %v3917_v57, %v3916_v41 }
 0x4b9   :  { %4984 = shalt.err (!%p4981_p4)
}
 0x4ba   :  { %3951 = dma.vmem_to_hbm [thread:$0]  %s3949_s10, 128, %s7622_s9, [#allocation6]   ;;  %vm7661_vm8 = vcmask 1043459   ;;  %vm7662_vm9 = vcmask 1044484   ;;  %v3927_v34 = vrot.slane %v3903_v16, 1  ;;  %vm7663_vm10 = vcmask 1045509  }
 0x4bb   :  { %s5021_s3 = smov [#allocation3]   ;;  %vm7664_vm11 = vcmask 261120  }
 0x4bc   :  { %s3938_s6 = sshll.u32 %s5021_s3, 4  ;;  %s3939_s6 = int_to_ptr.vmem [resolvable:$true] %s3938_s6 }
 0x4bd   :  { %s4993_s9 = scalar_lea.vmem %s3939_s6, 128  ;;  %p4998_p6 = scmp.lt.s32.totalorder %s3939_s6, %s3939_s6 }
 0x4be   :  { %p4994_p5 = scmp.ne.s32.totalorder %s3939_s6, %s4993_s9  ;;  %p4999_p7 = scmp.lt.s32.totalorder %s4993_s9, %s4993_s9 }
 0x4c0   :  { %p5000_p8 = por %p4999_p7, %p4998_p6 }
 0x4c2   :  { %p5001_p9 = pnand %p5000_p8, %p4994_p5 }
 0x4d5   :  { %v3623_v39 = vpop.f32.mrf.mxu1 }
 0x4d6   :  { %v3919_v1 = vrot.slane %v3623_v39, 5 }
 0x4d7   :  { %v4715_v42 = vpop.f32.mrf.mxu1 }
 0x4d8   :  { %v3920_v55 = vsel %vm7661_vm8, %v3919_v1, %v3918_v63 }
 0x4f5   :  { %v3693_v5 = vpop.f32.mrf.mxu1 }
 0x4f6   :  { %v3921_v31 = vrot.slane %v3693_v5, 4 }
 0x4f7   :  { %v4750_v32 = vpop.f32.mrf.mxu1 }
 0x4f8   :  { %v3922_v17 = vsel %vm7662_vm9, %v3921_v31, %v3920_v55 }
 0x515   :  { %v3763_v22 = vpop.f32.mrf.mxu1 }
 0x516   :  { %v3923_v18 = vrot.slane %v3763_v22, 3 }
 0x517   :  { %v4785_v50 = vpop.f32.mrf.mxu1 }
 0x518   :  { %v3924_v13 = vsel %vm7663_vm10, %v3923_v18, %v3922_v17 }
 0x535   :  { %v3833_v36 = vpop.f32.mrf.mxu1 }
 0x536   :  { %v3925_v47 = vrot.slane %v3833_v36, 2 }
 0x537   :  { %v4820_v28 = vpop.f32.mrf.mxu1 }
 0x538   :  { %v3926_v11 = vsel %vm3274_vm3, %v3925_v47, %v3924_v13 }
 0x539   :  { %v3928_v52 = vsel %vm3276_vm4, %v3927_v34, %v3926_v11 }
 0x53a   :  { %3930 = vst.msk [vmem:[#allocation3] sm:$0xff] %vm7664_vm11, %v3928_v52 }
 0x53b   :  { %5004 = shalt.err (!%p5001_p9)
}
 0x53c   :  { %3941 = dma.vmem_to_hbm [thread:$0]  %s3939_s6, 128, %s7621_s8, [#allocation4]  }
 0x53d   :  { %5013 = dma.done.wait [#allocation4], 128  }
 0x53e   :  { %5014 = vsyncadd [#allocation4], 4294967168 }
 0x53f   :  { %5015 = dma.done.wait [#allocation6], 128  }
 0x540   :  { %5016 = vsyncadd [#allocation6], 4294967168 }
 0x541   :  { %3958 = vsyncpa [#allocation4], 1 }
 0x542   :  { %3959 = vsyncpa [#allocation6], 1 }

</bundles_post_ra>
